<compile_context>
chip_gen: v5e
topology: v5e:2x2
jax: 0.10.0
libtpu: 0.0.40
codegen_flags: <defaults>
</compile_context>

<pallas_src>
import jax
import jax.numpy as jnp
from jax import lax
from jax.experimental import pallas as pl

# ---------------- small, module-consistent config ----------------
BS = 2        # batch size
K = 3         # self.k
ML = 8        # max_seq_len (small)
HS = 128      # hidden_size (lane-aligned)
VOCAB = 64
DIN1 = 2 * ML * HS   # actual classify_input width (see TODO above)


# =================== single fused Pallas kernel ===================
def fused_kernel(sen_ref, des_ref, senflat_ref, v_ref, waT_ref, wbT_ref,
                 wcsum_ref, b1_ref, w1sen_ref, w1des_ref, b1c_ref,
                 w2T_ref, b2_ref, w3T_ref, b3_ref,
                 logits_ref, fcos_ref):
    f32 = jnp.float32
    bf16 = jnp.bfloat16

    # full-tile loads; merging leading dims is layout-free (lane dim untouched)
    sen_all = sen_ref[...].reshape(BS * K * ML, HS)            # [BS*K*ML, HS] bf16
    des_all = des_ref[...].reshape(BS * K * ML, HS)

    # shared mlp_v1 partial matmuls, batched over ALL (b, k) tiles; bias folded once
    a_all = jnp.dot(sen_all, waT_ref[...], preferred_element_type=f32) + b1_ref[...]
    b_all = jnp.dot(des_all, wbT_ref[...], preferred_element_type=f32)

    wcsum = wcsum_ref[...].reshape(1, 1, HS)                   # hoisted (bk-invariant)

    # ---- relation module, (b, k) unrolled in-kernel ----
    dessim = []                                                # per-(b,k) [ML, HS] f32
    for bk in range(BS * K):
        k = bk % K
        lo = bk * ML
        sen_k = sen_ref[bk]                                    # [ML, HS] bf16
        des_k = des_ref[bk]
        a_k = a_all[lo:lo + ML]                                # f32 (b1 already folded in)
        b_k = b_all[lo:lo + ML]
        # token_features = einsum('mn,nk,qk->mq', des, V_k, sen)
        dv = jnp.dot(des_k, v_ref[k], preferred_element_type=f32)      # [ML, HS]
        tf = lax.dot_general(dv.astype(bf16), sen_k, (((1,), (1,)), ((), ())),
                             preferred_element_type=f32)       # [ml_des, ml_sen]
        # mlp_v1(concat(sen, des, tf*ones)) = sen@Wa^T + des@Wb^T + tf*rowsum(Wc) + b1
        rel = a_k[None, :, :] + b_k[:, None, :] + tf[:, :, None] * wcsum
        sim = jnp.max(rel, axis=1)                             # max over sen positions
        # des_feature_weight = softmax(-sim) over des positions (the /0.02 cancels);
        # stabilized and computed with an exact divide (feature_cos is an output).
        neg = -sim
        neg = neg - jnp.max(neg, axis=0, keepdims=True)
        e = jnp.exp(neg)
        w = e / jnp.sum(e, axis=0, keepdims=True)
        fcos_ref[bk] = w * sim                                 # feature_cos tile
        dessim.append(des_k.astype(f32) * w)                   # des_similarity tile

    # ---- mlp1: classify_input = concat(sen_flat, dessim_flat) ----
    # sen half: ONE [BS*K, ML*HS] @ [ML*HS, HS] matmul on the pre-flattened input.
    # des half: ML per-position matmuls against the matching weight slice — only the
    # needed contraction is computed (no wide matmul, no iota/where masking).
    acc = (jnp.dot(senflat_ref[...], w1sen_ref[...], preferred_element_type=f32)
           + b1c_ref[...])                                     # [BS*K, HS]
    for m in range(ML):
        d_m = jnp.concatenate([dessim[bk][m:m + 1, :] for bk in range(BS * K)],
                              axis=0).astype(bf16)             # [BS*K, HS]
        acc = acc + jnp.dot(d_m, w1des_ref[m], preferred_element_type=f32)
    x1 = jnp.maximum(acc, 0.0)                                 # relu(mlp1) -> [BS*K, HS]

    # ---- mlp2 (+relu) and mlp3 head (batch folded into the matmul rows) ----
    rows = [jnp.concatenate([x1[b * K + kk: b * K + kk + 1, :] for kk in range(K)],
                            axis=1) for b in range(BS)]        # each [1, K*HS]
    x2_in = jnp.concatenate(rows, axis=0).astype(bf16)         # [BS, K*HS]
    h2 = jnp.maximum(jnp.dot(x2_in, w2T_ref[...], preferred_element_type=f32)
                     + b2_ref[...], 0.0)                       # [BS, HS]
    logits_ref[...] = (jnp.dot(h2.astype(bf16), w3T_ref[...],
                               preferred_element_type=f32)
                       + b3_ref[...])                          # [BS, HS] (first K valid)


def fused_classify(sen_out, des_out, p):
    """One grid-less pallas_call: relation module + mlp1 + mlp2 + mlp3 (batch folded)."""
    bf16 = jnp.bfloat16

    w1T = p["w1T"]
    waT = w1T[:HS].astype(bf16)                                 # acts on the sen slice
    wbT = w1T[HS:2 * HS].astype(bf16)                           # acts on the des slice
    wcsum = jnp.sum(w1T[2 * HS:], axis=0, keepdims=True)        # acts on tf * ones slice
    b1_2d = p["b1"].reshape(1, HS)

    # mlp1 weight split into the sen / des_sim halves (original layout, no re-layout)
    w1c = p["w1cT"]                                             # [2*ML*HS, HS]
    w1_sen = w1c[:ML * HS].astype(bf16)                         # [ML*HS, HS]
    w1_des3 = w1c[ML * HS:].reshape(ML, HS, HS).astype(bf16)    # per-position slices
    b1c_2d = p["b1c"].reshape(1, HS)

    w2T = p["w2T"].astype(bf16)
    b2_2d = p["b2"].reshape(1, HS)
    # lane-dense head: pad the K-wide mlp3 to HS lanes, slice back to K in JAX
    w3T_pad = jnp.pad(p["w3T"], ((0, 0), (0, HS - K))).astype(bf16)
    b3_pad = jnp.pad(p["b3"], (0, HS - K)).reshape(1, HS)

    # activations: bf16 operands, two layouts of sen (relation-module tiles + the
    # pre-flattened mlp1 row layout; the extra copy is ~12 KiB of DMA)
    sen3d = sen_out.reshape(BS * K, ML, HS).astype(bf16)
    des3d = des_out.reshape(BS * K, ML, HS).astype(bf16)
    senflat = sen_out.reshape(BS * K, ML * HS).astype(bf16)
    mlpv = p["mlp_v"].astype(bf16)

    logits_pad, fcos_flat = pl.pallas_call(
        fused_kernel,
        out_shape=(jax.ShapeDtypeStruct((BS, HS), jnp.float32),
                   jax.ShapeDtypeStruct((BS * K, ML, HS), jnp.float32)),
        cost_estimate=pl.CostEstimate(flops=8_300_000,
                                      transcendentals=BS * K * ML * HS,
                                      bytes_accessed=1_000_000),
    )(sen3d, des3d, senflat, mlpv, waT, wbT, wcsum, b1_2d,
      w1_sen, w1_des3, b1c_2d, w2T, b2_2d, w3T_pad, b3_pad)

    return logits_pad[:, :K], fcos_flat.reshape(BS, K, ML, HS)


# =================== glue: synthetic encoder + params + forward ===================
def synthetic_encoder(input_ids, att_masks, emb, w_enc, b_enc):
    # TODO(synk): stands in for self.bert(...).last_hidden_state
    h = emb[input_ids]                                  # [bs, k, ml, hs]
    h = jnp.tanh(h @ w_enc + b_enc)
    return h * att_masks[..., None].astype(h.dtype)


def init_params(key):
    ks = jax.random.split(key, 12)
    s = 0.02
    p = {
        "emb":    jax.random.normal(ks[0], (VOCAB, HS), jnp.float32) * s,
        "w_enc":  jax.random.normal(ks[1], (HS, HS), jnp.float32) * s,
        "b_enc":  jnp.zeros((HS,), jnp.float32),
        "mlp_v":  jax.random.normal(ks[2], (K, HS, HS), jnp.float32) * s,
        "w1T":    jax.random.normal(ks[3], (3 * HS, HS), jnp.float32) * s,   # mlp_v1
        "b1":     jax.random.normal(ks[4], (HS,), jnp.float32) * s,
        "w1cT":   jax.random.normal(ks[5], (DIN1, HS), jnp.float32) * s,     # mlp1
        "b1c":    jax.random.normal(ks[6], (HS,), jnp.float32) * s,
        "w2T":    jax.random.normal(ks[7], (K * HS, HS), jnp.float32) * s,   # mlp2
        "b2":     jax.random.normal(ks[8], (HS,), jnp.float32) * s,
        "w3T":    jax.random.normal(ks[9], (HS, K), jnp.float32) * s,        # mlp3
        "b3":     jax.random.normal(ks[10], (K,), jnp.float32) * s,
    }
    return p


@jax.jit
def classify_forward(params, st_input_ids, st_att_masks, ds_input_ids,
                     ds_att_masks, vec_idx_arr):
    # per-example "BERT" encodings for sentence and description sequences
    sen_out = synthetic_encoder(st_input_ids, st_att_masks,
                                params["emb"], params["w_enc"], params["b_enc"])
    des_out = synthetic_encoder(ds_input_ids, ds_att_masks,
                                params["emb"], params["w_enc"], params["b_enc"])

    # fused relation module + classifier head (single Pallas launch)
    logits, feature_cos = fused_classify(sen_out, des_out, params)

    # inference path (target_idx_arr is None)
    max_idx = jnp.argmax(logits, axis=1)
    converted_max_idx = jnp.take_along_axis(vec_idx_arr, max_idx[:, None], axis=1)[:, 0]
    return converted_max_idx, logits, feature_cos


if __name__ == "__main__":
    root = jax.random.PRNGKey(0)
    kp, k1, k2, k3 = jax.random.split(root, 4)
    params = init_params(kp)

    st_input_ids = jax.random.randint(k1, (BS, K, ML), 0, VOCAB, jnp.int32)
    ds_input_ids = jax.random.randint(k2, (BS, K, ML), 0, VOCAB, jnp.int32)
    st_att_masks = jnp.ones((BS, K, ML), jnp.int32)
    ds_att_masks = jnp.ones((BS, K, ML), jnp.int32)
    vec_idx_arr = jax.random.randint(k3, (BS, K), 0, 100, jnp.int32)

    converted, logits, fcos = classify_forward(
        params, st_input_ids, st_att_masks, ds_input_ids, ds_att_masks, vec_idx_arr)
    jax.block_until_ready((converted, logits, fcos))

    assert converted.shape == (BS,)
    assert logits.shape == (BS, K)
    assert fcos.shape == (BS, K, ML, HS)
    print("KERNEL_OK")
</pallas_src>

<mosaic_0001>
module attributes {stable_mosaic.version = 11 : i64} {
  func.func @fused_kernel(%arg0: memref<6x8x128xbf16, #tpu.memory_space<vmem>>, %arg1: memref<6x8x128xbf16, #tpu.memory_space<vmem>>, %arg2: memref<6x1024xbf16, #tpu.memory_space<vmem>>, %arg3: memref<3x128x128xbf16, #tpu.memory_space<vmem>>, %arg4: memref<128x128xbf16, #tpu.memory_space<vmem>>, %arg5: memref<128x128xbf16, #tpu.memory_space<vmem>>, %arg6: memref<1x128xf32, #tpu.memory_space<vmem>>, %arg7: memref<1x128xf32, #tpu.memory_space<vmem>>, %arg8: memref<1024x128xbf16, #tpu.memory_space<vmem>>, %arg9: memref<8x128x128xbf16, #tpu.memory_space<vmem>>, %arg10: memref<1x128xf32, #tpu.memory_space<vmem>>, %arg11: memref<384x128xbf16, #tpu.memory_space<vmem>>, %arg12: memref<1x128xf32, #tpu.memory_space<vmem>>, %arg13: memref<128x128xbf16, #tpu.memory_space<vmem>>, %arg14: memref<1x128xf32, #tpu.memory_space<vmem>>, %arg15: memref<2x128xf32, #tpu.memory_space<vmem>>, %arg16: memref<6x8x128xf32, #tpu.memory_space<vmem>>) attributes {dimension_semantics = [], scalar_prefetch = 0 : i64, scratch_operands = 0 : i64, tpu.core_type = #tpu.core_type<tc>} {
    %c0 = arith.constant 0 : index
    %c0_0 = arith.constant 0 : index
    %c0_1 = arith.constant 0 : index
    %0 = vector.load %arg0[%c0, %c0_0, %c0_1] : memref<6x8x128xbf16, #tpu.memory_space<vmem>>, vector<6x8x128xbf16>
    %1 = vector.shape_cast %0 : vector<6x8x128xbf16> to vector<48x128xbf16>
    %c0_2 = arith.constant 0 : index
    %c0_3 = arith.constant 0 : index
    %c0_4 = arith.constant 0 : index
    %2 = vector.load %arg1[%c0_2, %c0_3, %c0_4] : memref<6x8x128xbf16, #tpu.memory_space<vmem>>, vector<6x8x128xbf16>
    %3 = vector.shape_cast %2 : vector<6x8x128xbf16> to vector<48x128xbf16>
    %c0_5 = arith.constant 0 : index
    %c0_6 = arith.constant 0 : index
    %4 = vector.load %arg4[%c0_5, %c0_6] : memref<128x128xbf16, #tpu.memory_space<vmem>>, vector<128x128xbf16>
    %cst = arith.constant dense<0.000000e+00> : vector<48x128xf32>
    %5 = tpu.matmul %1, %4, %cst {dimension_numbers = #tpu.dot_dimension_numbers<[1], [0], [0], [1], [0, 0, 1, 1], [], []>} : vector<48x128xbf16>, vector<128x128xbf16>, vector<48x128xf32> -> vector<48x128xf32>
    %c0_7 = arith.constant 0 : index
    %c0_8 = arith.constant 0 : index
    %6 = vector.load %arg7[%c0_7, %c0_8] : memref<1x128xf32, #tpu.memory_space<vmem>>, vector<1x128xf32>
    %7 = vector.broadcast %6 : vector<1x128xf32> to vector<48x128xf32>
    %8 = arith.addf %5, %7 : vector<48x128xf32>
    %c0_9 = arith.constant 0 : index
    %c0_10 = arith.constant 0 : index
    %9 = vector.load %arg5[%c0_9, %c0_10] : memref<128x128xbf16, #tpu.memory_space<vmem>>, vector<128x128xbf16>
    %cst_11 = arith.constant dense<0.000000e+00> : vector<48x128xf32>
    %10 = tpu.matmul %3, %9, %cst_11 {dimension_numbers = #tpu.dot_dimension_numbers<[1], [0], [0], [1], [0, 0, 1, 1], [], []>} : vector<48x128xbf16>, vector<128x128xbf16>, vector<48x128xf32> -> vector<48x128xf32>
    %c0_12 = arith.constant 0 : index
    %c0_13 = arith.constant 0 : index
    %11 = vector.load %arg6[%c0_12, %c0_13] : memref<1x128xf32, #tpu.memory_space<vmem>>, vector<1x128xf32>
    %12 = vector.shape_cast %11 : vector<1x128xf32> to vector<1x1x128xf32>
    %c0_14 = arith.constant 0 : index
    %c0_15 = arith.constant 0 : index
    %c0_16 = arith.constant 0 : index
    %13 = vector.load %arg0[%c0_14, %c0_15, %c0_16] : memref<6x8x128xbf16, #tpu.memory_space<vmem>>, vector<1x8x128xbf16>
    %14 = vector.shape_cast %13 : vector<1x8x128xbf16> to vector<8x128xbf16>
    %c0_17 = arith.constant 0 : index
    %c0_18 = arith.constant 0 : index
    %c0_19 = arith.constant 0 : index
    %15 = vector.load %arg1[%c0_17, %c0_18, %c0_19] : memref<6x8x128xbf16, #tpu.memory_space<vmem>>, vector<1x8x128xbf16>
    %16 = vector.shape_cast %15 : vector<1x8x128xbf16> to vector<8x128xbf16>
    %17 = vector.extract_strided_slice %8 {offsets = [0, 0], sizes = [8, 128], strides = [1, 1]} : vector<48x128xf32> to vector<8x128xf32>
    %18 = vector.extract_strided_slice %10 {offsets = [0, 0], sizes = [8, 128], strides = [1, 1]} : vector<48x128xf32> to vector<8x128xf32>
    %c0_20 = arith.constant 0 : index
    %c0_21 = arith.constant 0 : index
    %c0_22 = arith.constant 0 : index
    %19 = vector.load %arg3[%c0_20, %c0_21, %c0_22] : memref<3x128x128xbf16, #tpu.memory_space<vmem>>, vector<1x128x128xbf16>
    %20 = vector.shape_cast %19 : vector<1x128x128xbf16> to vector<128x128xbf16>
    %cst_23 = arith.constant dense<0.000000e+00> : vector<8x128xf32>
    %21 = tpu.matmul %16, %20, %cst_23 {dimension_numbers = #tpu.dot_dimension_numbers<[1], [0], [0], [1], [0, 0, 1, 1], [], []>} : vector<8x128xbf16>, vector<128x128xbf16>, vector<8x128xf32> -> vector<8x128xf32>
    %22 = arith.truncf %21 : vector<8x128xf32> to vector<8x128xbf16>
    %cst_24 = arith.constant dense<0.000000e+00> : vector<8x8xf32>
    %23 = tpu.matmul %22, %14, %cst_24 {dimension_numbers = #tpu.dot_dimension_numbers<[1], [1], [0], [0], [0, 0, 1, 0], [], []>} : vector<8x128xbf16>, vector<8x128xbf16>, vector<8x8xf32> -> vector<8x8xf32>
    %24 = vector.shape_cast %17 : vector<8x128xf32> to vector<1x8x128xf32>
    %25 = vector.shape_cast %18 : vector<8x128xf32> to vector<8x1x128xf32>
    %26 = vector.broadcast %24 : vector<1x8x128xf32> to vector<8x8x128xf32>
    %27 = vector.broadcast %25 : vector<8x1x128xf32> to vector<8x8x128xf32>
    %28 = arith.addf %26, %27 : vector<8x8x128xf32>
    %29 = vector.shape_cast %23 : vector<8x8xf32> to vector<8x8x1xf32>
    %30 = vector.broadcast %29 : vector<8x8x1xf32> to vector<8x8x128xf32>
    %31 = vector.broadcast %12 : vector<1x1x128xf32> to vector<8x8x128xf32>
    %32 = arith.mulf %30, %31 : vector<8x8x128xf32>
    %33 = arith.addf %28, %32 : vector<8x8x128xf32>
    %cst_25 = arith.constant dense<0xFF800000> : vector<8x128xf32>
    %34 = vector.multi_reduction <maximumf>, %33, %cst_25 [1] : vector<8x8x128xf32> to vector<8x128xf32>
    %cst_26 = arith.constant 0.000000e+00 : f32
    %35 = vector.broadcast %cst_26 : f32 to vector<8x128xf32>
    %36 = arith.subf %35, %34 : vector<8x128xf32>
    %cst_27 = arith.constant dense<0xFF800000> : vector<128xf32>
    %37 = vector.multi_reduction <maximumf>, %36, %cst_27 [0] : vector<8x128xf32> to vector<128xf32>
    %38 = vector.shape_cast %37 : vector<128xf32> to vector<1x128xf32>
    %39 = vector.broadcast %38 : vector<1x128xf32> to vector<8x128xf32>
    %40 = arith.subf %36, %39 : vector<8x128xf32>
    %41 = math.exp %40 : vector<8x128xf32>
    %cst_28 = arith.constant dense<0.000000e+00> : vector<128xf32>
    %42 = vector.multi_reduction <add>, %41, %cst_28 [0] : vector<8x128xf32> to vector<128xf32>
    %43 = vector.shape_cast %42 : vector<128xf32> to vector<1x128xf32>
    %44 = vector.broadcast %43 : vector<1x128xf32> to vector<8x128xf32>
    %45 = arith.divf %41, %44 : vector<8x128xf32>
    %46 = arith.mulf %45, %34 : vector<8x128xf32>
    %c0_29 = arith.constant 0 : index
    %c0_30 = arith.constant 0 : index
    %c0_31 = arith.constant 0 : index
    %47 = vector.load %arg16[%c0_29, %c0_30, %c0_31] : memref<6x8x128xf32, #tpu.memory_space<vmem>>, vector<1x8x128xf32>
    %48 = vector.shape_cast %47 : vector<1x8x128xf32> to vector<8x128xf32>
    %49 = vector.shape_cast %46 : vector<8x128xf32> to vector<1x8x128xf32>
    tpu.vector_store %arg16[%c0_29, %c0_30, %c0_31], %49 {strides = array<i32>} : memref<6x8x128xf32, #tpu.memory_space<vmem>>, vector<1x8x128xf32>,
    %50 = arith.extf %16 : vector<8x128xbf16> to vector<8x128xf32>
    %51 = arith.mulf %50, %45 : vector<8x128xf32>
    %c1 = arith.constant 1 : index
    %c0_32 = arith.constant 0 : index
    %c0_33 = arith.constant 0 : index
    %52 = vector.load %arg0[%c1, %c0_32, %c0_33] : memref<6x8x128xbf16, #tpu.memory_space<vmem>>, vector<1x8x128xbf16>
    %53 = vector.shape_cast %52 : vector<1x8x128xbf16> to vector<8x128xbf16>
    %c1_34 = arith.constant 1 : index
    %c0_35 = arith.constant 0 : index
    %c0_36 = arith.constant 0 : index
    %54 = vector.load %arg1[%c1_34, %c0_35, %c0_36] : memref<6x8x128xbf16, #tpu.memory_space<vmem>>, vector<1x8x128xbf16>
    %55 = vector.shape_cast %54 : vector<1x8x128xbf16> to vector<8x128xbf16>
    %56 = vector.extract_strided_slice %8 {offsets = [8, 0], sizes = [8, 128], strides = [1, 1]} : vector<48x128xf32> to vector<8x128xf32>
    %57 = vector.extract_strided_slice %10 {offsets = [8, 0], sizes = [8, 128], strides = [1, 1]} : vector<48x128xf32> to vector<8x128xf32>
    %c1_37 = arith.constant 1 : index
    %c0_38 = arith.constant 0 : index
    %c0_39 = arith.constant 0 : index
    %58 = vector.load %arg3[%c1_37, %c0_38, %c0_39] : memref<3x128x128xbf16, #tpu.memory_space<vmem>>, vector<1x128x128xbf16>
    %59 = vector.shape_cast %58 : vector<1x128x128xbf16> to vector<128x128xbf16>
    %cst_40 = arith.constant dense<0.000000e+00> : vector<8x128xf32>
    %60 = tpu.matmul %55, %59, %cst_40 {dimension_numbers = #tpu.dot_dimension_numbers<[1], [0], [0], [1], [0, 0, 1, 1], [], []>} : vector<8x128xbf16>, vector<128x128xbf16>, vector<8x128xf32> -> vector<8x128xf32>
    %61 = arith.truncf %60 : vector<8x128xf32> to vector<8x128xbf16>
    %cst_41 = arith.constant dense<0.000000e+00> : vector<8x8xf32>
    %62 = tpu.matmul %61, %53, %cst_41 {dimension_numbers = #tpu.dot_dimension_numbers<[1], [1], [0], [0], [0, 0, 1, 0], [], []>} : vector<8x128xbf16>, vector<8x128xbf16>, vector<8x8xf32> -> vector<8x8xf32>
    %63 = vector.shape_cast %56 : vector<8x128xf32> to vector<1x8x128xf32>
    %64 = vector.shape_cast %57 : vector<8x128xf32> to vector<8x1x128xf32>
    %65 = vector.broadcast %63 : vector<1x8x128xf32> to vector<8x8x128xf32>
    %66 = vector.broadcast %64 : vector<8x1x128xf32> to vector<8x8x128xf32>
    %67 = arith.addf %65, %66 : vector<8x8x128xf32>
    %68 = vector.shape_cast %62 : vector<8x8xf32> to vector<8x8x1xf32>
    %69 = vector.broadcast %68 : vector<8x8x1xf32> to vector<8x8x128xf32>
    %70 = vector.broadcast %12 : vector<1x1x128xf32> to vector<8x8x128xf32>
    %71 = arith.mulf %69, %70 : vector<8x8x128xf32>
    %72 = arith.addf %67, %71 : vector<8x8x128xf32>
    %cst_42 = arith.constant dense<0xFF800000> : vector<8x128xf32>
    %73 = vector.multi_reduction <maximumf>, %72, %cst_42 [1] : vector<8x8x128xf32> to vector<8x128xf32>
    %cst_43 = arith.constant 0.000000e+00 : f32
    %74 = vector.broadcast %cst_43 : f32 to vector<8x128xf32>
    %75 = arith.subf %74, %73 : vector<8x128xf32>
    %cst_44 = arith.constant dense<0xFF800000> : vector<128xf32>
    %76 = vector.multi_reduction <maximumf>, %75, %cst_44 [0] : vector<8x128xf32> to vector<128xf32>
    %77 = vector.shape_cast %76 : vector<128xf32> to vector<1x128xf32>
    %78 = vector.broadcast %77 : vector<1x128xf32> to vector<8x128xf32>
    %79 = arith.subf %75, %78 : vector<8x128xf32>
    %80 = math.exp %79 : vector<8x128xf32>
    %cst_45 = arith.constant dense<0.000000e+00> : vector<128xf32>
    %81 = vector.multi_reduction <add>, %80, %cst_45 [0] : vector<8x128xf32> to vector<128xf32>
    %82 = vector.shape_cast %81 : vector<128xf32> to vector<1x128xf32>
    %83 = vector.broadcast %82 : vector<1x128xf32> to vector<8x128xf32>
    %84 = arith.divf %80, %83 : vector<8x128xf32>
    %85 = arith.mulf %84, %73 : vector<8x128xf32>
    %c1_46 = arith.constant 1 : index
    %c0_47 = arith.constant 0 : index
    %c0_48 = arith.constant 0 : index
    %86 = vector.load %arg16[%c1_46, %c0_47, %c0_48] : memref<6x8x128xf32, #tpu.memory_space<vmem>>, vector<1x8x128xf32>
    %87 = vector.shape_cast %86 : vector<1x8x128xf32> to vector<8x128xf32>
    %88 = vector.shape_cast %85 : vector<8x128xf32> to vector<1x8x128xf32>
    tpu.vector_store %arg16[%c1_46, %c0_47, %c0_48], %88 {strides = array<i32>} : memref<6x8x128xf32, #tpu.memory_space<vmem>>, vector<1x8x128xf32>,
    %89 = arith.extf %55 : vector<8x128xbf16> to vector<8x128xf32>
    %90 = arith.mulf %89, %84 : vector<8x128xf32>
    %c2 = arith.constant 2 : index
    %c0_49 = arith.constant 0 : index
    %c0_50 = arith.constant 0 : index
    %91 = vector.load %arg0[%c2, %c0_49, %c0_50] : memref<6x8x128xbf16, #tpu.memory_space<vmem>>, vector<1x8x128xbf16>
    %92 = vector.shape_cast %91 : vector<1x8x128xbf16> to vector<8x128xbf16>
    %c2_51 = arith.constant 2 : index
    %c0_52 = arith.constant 0 : index
    %c0_53 = arith.constant 0 : index
    %93 = vector.load %arg1[%c2_51, %c0_52, %c0_53] : memref<6x8x128xbf16, #tpu.memory_space<vmem>>, vector<1x8x128xbf16>
    %94 = vector.shape_cast %93 : vector<1x8x128xbf16> to vector<8x128xbf16>
    %95 = vector.extract_strided_slice %8 {offsets = [16, 0], sizes = [8, 128], strides = [1, 1]} : vector<48x128xf32> to vector<8x128xf32>
    %96 = vector.extract_strided_slice %10 {offsets = [16, 0], sizes = [8, 128], strides = [1, 1]} : vector<48x128xf32> to vector<8x128xf32>
    %c2_54 = arith.constant 2 : index
    %c0_55 = arith.constant 0 : index
    %c0_56 = arith.constant 0 : index
    %97 = vector.load %arg3[%c2_54, %c0_55, %c0_56] : memref<3x128x128xbf16, #tpu.memory_space<vmem>>, vector<1x128x128xbf16>
    %98 = vector.shape_cast %97 : vector<1x128x128xbf16> to vector<128x128xbf16>
    %cst_57 = arith.constant dense<0.000000e+00> : vector<8x128xf32>
    %99 = tpu.matmul %94, %98, %cst_57 {dimension_numbers = #tpu.dot_dimension_numbers<[1], [0], [0], [1], [0, 0, 1, 1], [], []>} : vector<8x128xbf16>, vector<128x128xbf16>, vector<8x128xf32> -> vector<8x128xf32>
    %100 = arith.truncf %99 : vector<8x128xf32> to vector<8x128xbf16>
    %cst_58 = arith.constant dense<0.000000e+00> : vector<8x8xf32>
    %101 = tpu.matmul %100, %92, %cst_58 {dimension_numbers = #tpu.dot_dimension_numbers<[1], [1], [0], [0], [0, 0, 1, 0], [], []>} : vector<8x128xbf16>, vector<8x128xbf16>, vector<8x8xf32> -> vector<8x8xf32>
    %102 = vector.shape_cast %95 : vector<8x128xf32> to vector<1x8x128xf32>
    %103 = vector.shape_cast %96 : vector<8x128xf32> to vector<8x1x128xf32>
    %104 = vector.broadcast %102 : vector<1x8x128xf32> to vector<8x8x128xf32>
    %105 = vector.broadcast %103 : vector<8x1x128xf32> to vector<8x8x128xf32>
    %106 = arith.addf %104, %105 : vector<8x8x128xf32>
    %107 = vector.shape_cast %101 : vector<8x8xf32> to vector<8x8x1xf32>
    %108 = vector.broadcast %107 : vector<8x8x1xf32> to vector<8x8x128xf32>
    %109 = vector.broadcast %12 : vector<1x1x128xf32> to vector<8x8x128xf32>
    %110 = arith.mulf %108, %109 : vector<8x8x128xf32>
    %111 = arith.addf %106, %110 : vector<8x8x128xf32>
    %cst_59 = arith.constant dense<0xFF800000> : vector<8x128xf32>
    %112 = vector.multi_reduction <maximumf>, %111, %cst_59 [1] : vector<8x8x128xf32> to vector<8x128xf32>
    %cst_60 = arith.constant 0.000000e+00 : f32
    %113 = vector.broadcast %cst_60 : f32 to vector<8x128xf32>
    %114 = arith.subf %113, %112 : vector<8x128xf32>
    %cst_61 = arith.constant dense<0xFF800000> : vector<128xf32>
    %115 = vector.multi_reduction <maximumf>, %114, %cst_61 [0] : vector<8x128xf32> to vector<128xf32>
    %116 = vector.shape_cast %115 : vector<128xf32> to vector<1x128xf32>
    %117 = vector.broadcast %116 : vector<1x128xf32> to vector<8x128xf32>
    %118 = arith.subf %114, %117 : vector<8x128xf32>
    %119 = math.exp %118 : vector<8x128xf32>
    %cst_62 = arith.constant dense<0.000000e+00> : vector<128xf32>
    %120 = vector.multi_reduction <add>, %119, %cst_62 [0] : vector<8x128xf32> to vector<128xf32>
    %121 = vector.shape_cast %120 : vector<128xf32> to vector<1x128xf32>
    %122 = vector.broadcast %121 : vector<1x128xf32> to vector<8x128xf32>
    %123 = arith.divf %119, %122 : vector<8x128xf32>
    %124 = arith.mulf %123, %112 : vector<8x128xf32>
    %c2_63 = arith.constant 2 : index
    %c0_64 = arith.constant 0 : index
    %c0_65 = arith.constant 0 : index
    %125 = vector.load %arg16[%c2_63, %c0_64, %c0_65] : memref<6x8x128xf32, #tpu.memory_space<vmem>>, vector<1x8x128xf32>
    %126 = vector.shape_cast %125 : vector<1x8x128xf32> to vector<8x128xf32>
    %127 = vector.shape_cast %124 : vector<8x128xf32> to vector<1x8x128xf32>
    tpu.vector_store %arg16[%c2_63, %c0_64, %c0_65], %127 {strides = array<i32>} : memref<6x8x128xf32, #tpu.memory_space<vmem>>, vector<1x8x128xf32>,
    %128 = arith.extf %94 : vector<8x128xbf16> to vector<8x128xf32>
    %129 = arith.mulf %128, %123 : vector<8x128xf32>
    %c3 = arith.constant 3 : index
    %c0_66 = arith.constant 0 : index
    %c0_67 = arith.constant 0 : index
    %130 = vector.load %arg0[%c3, %c0_66, %c0_67] : memref<6x8x128xbf16, #tpu.memory_space<vmem>>, vector<1x8x128xbf16>
    %131 = vector.shape_cast %130 : vector<1x8x128xbf16> to vector<8x128xbf16>
    %c3_68 = arith.constant 3 : index
    %c0_69 = arith.constant 0 : index
    %c0_70 = arith.constant 0 : index
    %132 = vector.load %arg1[%c3_68, %c0_69, %c0_70] : memref<6x8x128xbf16, #tpu.memory_space<vmem>>, vector<1x8x128xbf16>
    %133 = vector.shape_cast %132 : vector<1x8x128xbf16> to vector<8x128xbf16>
    %134 = vector.extract_strided_slice %8 {offsets = [24, 0], sizes = [8, 128], strides = [1, 1]} : vector<48x128xf32> to vector<8x128xf32>
    %135 = vector.extract_strided_slice %10 {offsets = [24, 0], sizes = [8, 128], strides = [1, 1]} : vector<48x128xf32> to vector<8x128xf32>
    %c0_71 = arith.constant 0 : index
    %c0_72 = arith.constant 0 : index
    %c0_73 = arith.constant 0 : index
    %136 = vector.load %arg3[%c0_71, %c0_72, %c0_73] : memref<3x128x128xbf16, #tpu.memory_space<vmem>>, vector<1x128x128xbf16>
    %137 = vector.shape_cast %136 : vector<1x128x128xbf16> to vector<128x128xbf16>
    %cst_74 = arith.constant dense<0.000000e+00> : vector<8x128xf32>
    %138 = tpu.matmul %133, %137, %cst_74 {dimension_numbers = #tpu.dot_dimension_numbers<[1], [0], [0], [1], [0, 0, 1, 1], [], []>} : vector<8x128xbf16>, vector<128x128xbf16>, vector<8x128xf32> -> vector<8x128xf32>
    %139 = arith.truncf %138 : vector<8x128xf32> to vector<8x128xbf16>
    %cst_75 = arith.constant dense<0.000000e+00> : vector<8x8xf32>
    %140 = tpu.matmul %139, %131, %cst_75 {dimension_numbers = #tpu.dot_dimension_numbers<[1], [1], [0], [0], [0, 0, 1, 0], [], []>} : vector<8x128xbf16>, vector<8x128xbf16>, vector<8x8xf32> -> vector<8x8xf32>
    %141 = vector.shape_cast %134 : vector<8x128xf32> to vector<1x8x128xf32>
    %142 = vector.shape_cast %135 : vector<8x128xf32> to vector<8x1x128xf32>
    %143 = vector.broadcast %141 : vector<1x8x128xf32> to vector<8x8x128xf32>
    %144 = vector.broadcast %142 : vector<8x1x128xf32> to vector<8x8x128xf32>
    %145 = arith.addf %143, %144 : vector<8x8x128xf32>
    %146 = vector.shape_cast %140 : vector<8x8xf32> to vector<8x8x1xf32>
    %147 = vector.broadcast %146 : vector<8x8x1xf32> to vector<8x8x128xf32>
    %148 = vector.broadcast %12 : vector<1x1x128xf32> to vector<8x8x128xf32>
    %149 = arith.mulf %147, %148 : vector<8x8x128xf32>
    %150 = arith.addf %145, %149 : vector<8x8x128xf32>
    %cst_76 = arith.constant dense<0xFF800000> : vector<8x128xf32>
    %151 = vector.multi_reduction <maximumf>, %150, %cst_76 [1] : vector<8x8x128xf32> to vector<8x128xf32>
    %cst_77 = arith.constant 0.000000e+00 : f32
    %152 = vector.broadcast %cst_77 : f32 to vector<8x128xf32>
    %153 = arith.subf %152, %151 : vector<8x128xf32>
    %cst_78 = arith.constant dense<0xFF800000> : vector<128xf32>
    %154 = vector.multi_reduction <maximumf>, %153, %cst_78 [0] : vector<8x128xf32> to vector<128xf32>
    %155 = vector.shape_cast %154 : vector<128xf32> to vector<1x128xf32>
    %156 = vector.broadcast %155 : vector<1x128xf32> to vector<8x128xf32>
    %157 = arith.subf %153, %156 : vector<8x128xf32>
    %158 = math.exp %157 : vector<8x128xf32>
    %cst_79 = arith.constant dense<0.000000e+00> : vector<128xf32>
    %159 = vector.multi_reduction <add>, %158, %cst_79 [0] : vector<8x128xf32> to vector<128xf32>
    %160 = vector.shape_cast %159 : vector<128xf32> to vector<1x128xf32>
    %161 = vector.broadcast %160 : vector<1x128xf32> to vector<8x128xf32>
    %162 = arith.divf %158, %161 : vector<8x128xf32>
    %163 = arith.mulf %162, %151 : vector<8x128xf32>
    %c3_80 = arith.constant 3 : index
    %c0_81 = arith.constant 0 : index
    %c0_82 = arith.constant 0 : index
    %164 = vector.load %arg16[%c3_80, %c0_81, %c0_82] : memref<6x8x128xf32, #tpu.memory_space<vmem>>, vector<1x8x128xf32>
    %165 = vector.shape_cast %164 : vector<1x8x128xf32> to vector<8x128xf32>
    %166 = vector.shape_cast %163 : vector<8x128xf32> to vector<1x8x128xf32>
    tpu.vector_store %arg16[%c3_80, %c0_81, %c0_82], %166 {strides = array<i32>} : memref<6x8x128xf32, #tpu.memory_space<vmem>>, vector<1x8x128xf32>,
    %167 = arith.extf %133 : vector<8x128xbf16> to vector<8x128xf32>
    %168 = arith.mulf %167, %162 : vector<8x128xf32>
    %c4 = arith.constant 4 : index
    %c0_83 = arith.constant 0 : index
    %c0_84 = arith.constant 0 : index
    %169 = vector.load %arg0[%c4, %c0_83, %c0_84] : memref<6x8x128xbf16, #tpu.memory_space<vmem>>, vector<1x8x128xbf16>
    %170 = vector.shape_cast %169 : vector<1x8x128xbf16> to vector<8x128xbf16>
    %c4_85 = arith.constant 4 : index
    %c0_86 = arith.constant 0 : index
    %c0_87 = arith.constant 0 : index
    %171 = vector.load %arg1[%c4_85, %c0_86, %c0_87] : memref<6x8x128xbf16, #tpu.memory_space<vmem>>, vector<1x8x128xbf16>
    %172 = vector.shape_cast %171 : vector<1x8x128xbf16> to vector<8x128xbf16>
    %173 = vector.extract_strided_slice %8 {offsets = [32, 0], sizes = [8, 128], strides = [1, 1]} : vector<48x128xf32> to vector<8x128xf32>
    %174 = vector.extract_strided_slice %10 {offsets = [32, 0], sizes = [8, 128], strides = [1, 1]} : vector<48x128xf32> to vector<8x128xf32>
    %c1_88 = arith.constant 1 : index
    %c0_89 = arith.constant 0 : index
    %c0_90 = arith.constant 0 : index
    %175 = vector.load %arg3[%c1_88, %c0_89, %c0_90] : memref<3x128x128xbf16, #tpu.memory_space<vmem>>, vector<1x128x128xbf16>
    %176 = vector.shape_cast %175 : vector<1x128x128xbf16> to vector<128x128xbf16>
    %cst_91 = arith.constant dense<0.000000e+00> : vector<8x128xf32>
    %177 = tpu.matmul %172, %176, %cst_91 {dimension_numbers = #tpu.dot_dimension_numbers<[1], [0], [0], [1], [0, 0, 1, 1], [], []>} : vector<8x128xbf16>, vector<128x128xbf16>, vector<8x128xf32> -> vector<8x128xf32>
    %178 = arith.truncf %177 : vector<8x128xf32> to vector<8x128xbf16>
    %cst_92 = arith.constant dense<0.000000e+00> : vector<8x8xf32>
    %179 = tpu.matmul %178, %170, %cst_92 {dimension_numbers = #tpu.dot_dimension_numbers<[1], [1], [0], [0], [0, 0, 1, 0], [], []>} : vector<8x128xbf16>, vector<8x128xbf16>, vector<8x8xf32> -> vector<8x8xf32>
    %180 = vector.shape_cast %173 : vector<8x128xf32> to vector<1x8x128xf32>
    %181 = vector.shape_cast %174 : vector<8x128xf32> to vector<8x1x128xf32>
    %182 = vector.broadcast %180 : vector<1x8x128xf32> to vector<8x8x128xf32>
    %183 = vector.broadcast %181 : vector<8x1x128xf32> to vector<8x8x128xf32>
    %184 = arith.addf %182, %183 : vector<8x8x128xf32>
    %185 = vector.shape_cast %179 : vector<8x8xf32> to vector<8x8x1xf32>
    %186 = vector.broadcast %185 : vector<8x8x1xf32> to vector<8x8x128xf32>
    %187 = vector.broadcast %12 : vector<1x1x128xf32> to vector<8x8x128xf32>
    %188 = arith.mulf %186, %187 : vector<8x8x128xf32>
    %189 = arith.addf %184, %188 : vector<8x8x128xf32>
    %cst_93 = arith.constant dense<0xFF800000> : vector<8x128xf32>
    %190 = vector.multi_reduction <maximumf>, %189, %cst_93 [1] : vector<8x8x128xf32> to vector<8x128xf32>
    %cst_94 = arith.constant 0.000000e+00 : f32
    %191 = vector.broadcast %cst_94 : f32 to vector<8x128xf32>
    %192 = arith.subf %191, %190 : vector<8x128xf32>
    %cst_95 = arith.constant dense<0xFF800000> : vector<128xf32>
    %193 = vector.multi_reduction <maximumf>, %192, %cst_95 [0] : vector<8x128xf32> to vector<128xf32>
    %194 = vector.shape_cast %193 : vector<128xf32> to vector<1x128xf32>
    %195 = vector.broadcast %194 : vector<1x128xf32> to vector<8x128xf32>
    %196 = arith.subf %192, %195 : vector<8x128xf32>
    %197 = math.exp %196 : vector<8x128xf32>
    %cst_96 = arith.constant dense<0.000000e+00> : vector<128xf32>
    %198 = vector.multi_reduction <add>, %197, %cst_96 [0] : vector<8x128xf32> to vector<128xf32>
    %199 = vector.shape_cast %198 : vector<128xf32> to vector<1x128xf32>
    %200 = vector.broadcast %199 : vector<1x128xf32> to vector<8x128xf32>
    %201 = arith.divf %197, %200 : vector<8x128xf32>
    %202 = arith.mulf %201, %190 : vector<8x128xf32>
    %c4_97 = arith.constant 4 : index
    %c0_98 = arith.constant 0 : index
    %c0_99 = arith.constant 0 : index
    %203 = vector.load %arg16[%c4_97, %c0_98, %c0_99] : memref<6x8x128xf32, #tpu.memory_space<vmem>>, vector<1x8x128xf32>
    %204 = vector.shape_cast %203 : vector<1x8x128xf32> to vector<8x128xf32>
    %205 = vector.shape_cast %202 : vector<8x128xf32> to vector<1x8x128xf32>
    tpu.vector_store %arg16[%c4_97, %c0_98, %c0_99], %205 {strides = array<i32>} : memref<6x8x128xf32, #tpu.memory_space<vmem>>, vector<1x8x128xf32>,
    %206 = arith.extf %172 : vector<8x128xbf16> to vector<8x128xf32>
    %207 = arith.mulf %206, %201 : vector<8x128xf32>
    %c5 = arith.constant 5 : index
    %c0_100 = arith.constant 0 : index
    %c0_101 = arith.constant 0 : index
    %208 = vector.load %arg0[%c5, %c0_100, %c0_101] : memref<6x8x128xbf16, #tpu.memory_space<vmem>>, vector<1x8x128xbf16>
    %209 = vector.shape_cast %208 : vector<1x8x128xbf16> to vector<8x128xbf16>
    %c5_102 = arith.constant 5 : index
    %c0_103 = arith.constant 0 : index
    %c0_104 = arith.constant 0 : index
    %210 = vector.load %arg1[%c5_102, %c0_103, %c0_104] : memref<6x8x128xbf16, #tpu.memory_space<vmem>>, vector<1x8x128xbf16>
    %211 = vector.shape_cast %210 : vector<1x8x128xbf16> to vector<8x128xbf16>
    %212 = vector.extract_strided_slice %8 {offsets = [40, 0], sizes = [8, 128], strides = [1, 1]} : vector<48x128xf32> to vector<8x128xf32>
    %213 = vector.extract_strided_slice %10 {offsets = [40, 0], sizes = [8, 128], strides = [1, 1]} : vector<48x128xf32> to vector<8x128xf32>
    %c2_105 = arith.constant 2 : index
    %c0_106 = arith.constant 0 : index
    %c0_107 = arith.constant 0 : index
    %214 = vector.load %arg3[%c2_105, %c0_106, %c0_107] : memref<3x128x128xbf16, #tpu.memory_space<vmem>>, vector<1x128x128xbf16>
    %215 = vector.shape_cast %214 : vector<1x128x128xbf16> to vector<128x128xbf16>
    %cst_108 = arith.constant dense<0.000000e+00> : vector<8x128xf32>
    %216 = tpu.matmul %211, %215, %cst_108 {dimension_numbers = #tpu.dot_dimension_numbers<[1], [0], [0], [1], [0, 0, 1, 1], [], []>} : vector<8x128xbf16>, vector<128x128xbf16>, vector<8x128xf32> -> vector<8x128xf32>
    %217 = arith.truncf %216 : vector<8x128xf32> to vector<8x128xbf16>
    %cst_109 = arith.constant dense<0.000000e+00> : vector<8x8xf32>
    %218 = tpu.matmul %217, %209, %cst_109 {dimension_numbers = #tpu.dot_dimension_numbers<[1], [1], [0], [0], [0, 0, 1, 0], [], []>} : vector<8x128xbf16>, vector<8x128xbf16>, vector<8x8xf32> -> vector<8x8xf32>
    %219 = vector.shape_cast %212 : vector<8x128xf32> to vector<1x8x128xf32>
    %220 = vector.shape_cast %213 : vector<8x128xf32> to vector<8x1x128xf32>
    %221 = vector.broadcast %219 : vector<1x8x128xf32> to vector<8x8x128xf32>
    %222 = vector.broadcast %220 : vector<8x1x128xf32> to vector<8x8x128xf32>
    %223 = arith.addf %221, %222 : vector<8x8x128xf32>
    %224 = vector.shape_cast %218 : vector<8x8xf32> to vector<8x8x1xf32>
    %225 = vector.broadcast %224 : vector<8x8x1xf32> to vector<8x8x128xf32>
    %226 = vector.broadcast %12 : vector<1x1x128xf32> to vector<8x8x128xf32>
    %227 = arith.mulf %225, %226 : vector<8x8x128xf32>
    %228 = arith.addf %223, %227 : vector<8x8x128xf32>
    %cst_110 = arith.constant dense<0xFF800000> : vector<8x128xf32>
    %229 = vector.multi_reduction <maximumf>, %228, %cst_110 [1] : vector<8x8x128xf32> to vector<8x128xf32>
    %cst_111 = arith.constant 0.000000e+00 : f32
    %230 = vector.broadcast %cst_111 : f32 to vector<8x128xf32>
    %231 = arith.subf %230, %229 : vector<8x128xf32>
    %cst_112 = arith.constant dense<0xFF800000> : vector<128xf32>
    %232 = vector.multi_reduction <maximumf>, %231, %cst_112 [0] : vector<8x128xf32> to vector<128xf32>
    %233 = vector.shape_cast %232 : vector<128xf32> to vector<1x128xf32>
    %234 = vector.broadcast %233 : vector<1x128xf32> to vector<8x128xf32>
    %235 = arith.subf %231, %234 : vector<8x128xf32>
    %236 = math.exp %235 : vector<8x128xf32>
    %cst_113 = arith.constant dense<0.000000e+00> : vector<128xf32>
    %237 = vector.multi_reduction <add>, %236, %cst_113 [0] : vector<8x128xf32> to vector<128xf32>
    %238 = vector.shape_cast %237 : vector<128xf32> to vector<1x128xf32>
    %239 = vector.broadcast %238 : vector<1x128xf32> to vector<8x128xf32>
    %240 = arith.divf %236, %239 : vector<8x128xf32>
    %241 = arith.mulf %240, %229 : vector<8x128xf32>
    %c5_114 = arith.constant 5 : index
    %c0_115 = arith.constant 0 : index
    %c0_116 = arith.constant 0 : index
    %242 = vector.load %arg16[%c5_114, %c0_115, %c0_116] : memref<6x8x128xf32, #tpu.memory_space<vmem>>, vector<1x8x128xf32>
    %243 = vector.shape_cast %242 : vector<1x8x128xf32> to vector<8x128xf32>
    %244 = vector.shape_cast %241 : vector<8x128xf32> to vector<1x8x128xf32>
    tpu.vector_store %arg16[%c5_114, %c0_115, %c0_116], %244 {strides = array<i32>} : memref<6x8x128xf32, #tpu.memory_space<vmem>>, vector<1x8x128xf32>,
    %245 = arith.extf %211 : vector<8x128xbf16> to vector<8x128xf32>
    %246 = arith.mulf %245, %240 : vector<8x128xf32>
    %c0_117 = arith.constant 0 : index
    %c0_118 = arith.constant 0 : index
    %247 = vector.load %arg2[%c0_117, %c0_118] : memref<6x1024xbf16, #tpu.memory_space<vmem>>, vector<6x1024xbf16>
    %c0_119 = arith.constant 0 : index
    %c0_120 = arith.constant 0 : index
    %248 = vector.load %arg8[%c0_119, %c0_120] : memref<1024x128xbf16, #tpu.memory_space<vmem>>, vector<1024x128xbf16>
    %cst_121 = arith.constant dense<0.000000e+00> : vector<6x128xf32>
    %249 = tpu.matmul %247, %248, %cst_121 {dimension_numbers = #tpu.dot_dimension_numbers<[1], [0], [0], [1], [0, 0, 1, 1], [], []>} : vector<6x1024xbf16>, vector<1024x128xbf16>, vector<6x128xf32> -> vector<6x128xf32>
    %c0_122 = arith.constant 0 : index
    %c0_123 = arith.constant 0 : index
    %250 = vector.load %arg10[%c0_122, %c0_123] : memref<1x128xf32, #tpu.memory_space<vmem>>, vector<1x128xf32>
    %251 = vector.broadcast %250 : vector<1x128xf32> to vector<6x128xf32>
    %252 = arith.addf %249, %251 : vector<6x128xf32>
    %253 = vector.extract_strided_slice %51 {offsets = [0, 0], sizes = [1, 128], strides = [1, 1]} : vector<8x128xf32> to vector<1x128xf32>
    %254 = vector.extract_strided_slice %90 {offsets = [0, 0], sizes = [1, 128], strides = [1, 1]} : vector<8x128xf32> to vector<1x128xf32>
    %255 = vector.extract_strided_slice %129 {offsets = [0, 0], sizes = [1, 128], strides = [1, 1]} : vector<8x128xf32> to vector<1x128xf32>
    %256 = vector.extract_strided_slice %168 {offsets = [0, 0], sizes = [1, 128], strides = [1, 1]} : vector<8x128xf32> to vector<1x128xf32>
    %257 = vector.extract_strided_slice %207 {offsets = [0, 0], sizes = [1, 128], strides = [1, 1]} : vector<8x128xf32> to vector<1x128xf32>
    %258 = vector.extract_strided_slice %246 {offsets = [0, 0], sizes = [1, 128], strides = [1, 1]} : vector<8x128xf32> to vector<1x128xf32>
    %259 = tpu.concatenate %253, %254, %255, %256, %257, %258 in 0 : vector<1x128xf32>, vector<1x128xf32>, vector<1x128xf32>, vector<1x128xf32>, vector<1x128xf32>, vector<1x128xf32> -> vector<6x128xf32>
    %260 = arith.truncf %259 : vector<6x128xf32> to vector<6x128xbf16>
    %c0_124 = arith.constant 0 : index
    %c0_125 = arith.constant 0 : index
    %c0_126 = arith.constant 0 : index
    %261 = vector.load %arg9[%c0_124, %c0_125, %c0_126] : memref<8x128x128xbf16, #tpu.memory_space<vmem>>, vector<1x128x128xbf16>
    %262 = vector.shape_cast %261 : vector<1x128x128xbf16> to vector<128x128xbf16>
    %cst_127 = arith.constant dense<0.000000e+00> : vector<6x128xf32>
    %263 = tpu.matmul %260, %262, %cst_127 {dimension_numbers = #tpu.dot_dimension_numbers<[1], [0], [0], [1], [0, 0, 1, 1], [], []>} : vector<6x128xbf16>, vector<128x128xbf16>, vector<6x128xf32> -> vector<6x128xf32>
    %264 = arith.addf %252, %263 : vector<6x128xf32>
    %265 = vector.extract_strided_slice %51 {offsets = [1, 0], sizes = [1, 128], strides = [1, 1]} : vector<8x128xf32> to vector<1x128xf32>
    %266 = vector.extract_strided_slice %90 {offsets = [1, 0], sizes = [1, 128], strides = [1, 1]} : vector<8x128xf32> to vector<1x128xf32>
    %267 = vector.extract_strided_slice %129 {offsets = [1, 0], sizes = [1, 128], strides = [1, 1]} : vector<8x128xf32> to vector<1x128xf32>
    %268 = vector.extract_strided_slice %168 {offsets = [1, 0], sizes = [1, 128], strides = [1, 1]} : vector<8x128xf32> to vector<1x128xf32>
    %269 = vector.extract_strided_slice %207 {offsets = [1, 0], sizes = [1, 128], strides = [1, 1]} : vector<8x128xf32> to vector<1x128xf32>
    %270 = vector.extract_strided_slice %246 {offsets = [1, 0], sizes = [1, 128], strides = [1, 1]} : vector<8x128xf32> to vector<1x128xf32>
    %271 = tpu.concatenate %265, %266, %267, %268, %269, %270 in 0 : vector<1x128xf32>, vector<1x128xf32>, vector<1x128xf32>, vector<1x128xf32>, vector<1x128xf32>, vector<1x128xf32> -> vector<6x128xf32>
    %272 = arith.truncf %271 : vector<6x128xf32> to vector<6x128xbf16>
    %c1_128 = arith.constant 1 : index
    %c0_129 = arith.constant 0 : index
    %c0_130 = arith.constant 0 : index
    %273 = vector.load %arg9[%c1_128, %c0_129, %c0_130] : memref<8x128x128xbf16, #tpu.memory_space<vmem>>, vector<1x128x128xbf16>
    %274 = vector.shape_cast %273 : vector<1x128x128xbf16> to vector<128x128xbf16>
    %cst_131 = arith.constant dense<0.000000e+00> : vector<6x128xf32>
    %275 = tpu.matmul %272, %274, %cst_131 {dimension_numbers = #tpu.dot_dimension_numbers<[1], [0], [0], [1], [0, 0, 1, 1], [], []>} : vector<6x128xbf16>, vector<128x128xbf16>, vector<6x128xf32> -> vector<6x128xf32>
    %276 = arith.addf %264, %275 : vector<6x128xf32>
    %277 = vector.extract_strided_slice %51 {offsets = [2, 0], sizes = [1, 128], strides = [1, 1]} : vector<8x128xf32> to vector<1x128xf32>
    %278 = vector.extract_strided_slice %90 {offsets = [2, 0], sizes = [1, 128], strides = [1, 1]} : vector<8x128xf32> to vector<1x128xf32>
    %279 = vector.extract_strided_slice %129 {offsets = [2, 0], sizes = [1, 128], strides = [1, 1]} : vector<8x128xf32> to vector<1x128xf32>
    %280 = vector.extract_strided_slice %168 {offsets = [2, 0], sizes = [1, 128], strides = [1, 1]} : vector<8x128xf32> to vector<1x128xf32>
    %281 = vector.extract_strided_slice %207 {offsets = [2, 0], sizes = [1, 128], strides = [1, 1]} : vector<8x128xf32> to vector<1x128xf32>
    %282 = vector.extract_strided_slice %246 {offsets = [2, 0], sizes = [1, 128], strides = [1, 1]} : vector<8x128xf32> to vector<1x128xf32>
    %283 = tpu.concatenate %277, %278, %279, %280, %281, %282 in 0 : vector<1x128xf32>, vector<1x128xf32>, vector<1x128xf32>, vector<1x128xf32>, vector<1x128xf32>, vector<1x128xf32> -> vector<6x128xf32>
    %284 = arith.truncf %283 : vector<6x128xf32> to vector<6x128xbf16>
    %c2_132 = arith.constant 2 : index
    %c0_133 = arith.constant 0 : index
    %c0_134 = arith.constant 0 : index
    %285 = vector.load %arg9[%c2_132, %c0_133, %c0_134] : memref<8x128x128xbf16, #tpu.memory_space<vmem>>, vector<1x128x128xbf16>
    %286 = vector.shape_cast %285 : vector<1x128x128xbf16> to vector<128x128xbf16>
    %cst_135 = arith.constant dense<0.000000e+00> : vector<6x128xf32>
    %287 = tpu.matmul %284, %286, %cst_135 {dimension_numbers = #tpu.dot_dimension_numbers<[1], [0], [0], [1], [0, 0, 1, 1], [], []>} : vector<6x128xbf16>, vector<128x128xbf16>, vector<6x128xf32> -> vector<6x128xf32>
    %288 = arith.addf %276, %287 : vector<6x128xf32>
    %289 = vector.extract_strided_slice %51 {offsets = [3, 0], sizes = [1, 128], strides = [1, 1]} : vector<8x128xf32> to vector<1x128xf32>
    %290 = vector.extract_strided_slice %90 {offsets = [3, 0], sizes = [1, 128], strides = [1, 1]} : vector<8x128xf32> to vector<1x128xf32>
    %291 = vector.extract_strided_slice %129 {offsets = [3, 0], sizes = [1, 128], strides = [1, 1]} : vector<8x128xf32> to vector<1x128xf32>
    %292 = vector.extract_strided_slice %168 {offsets = [3, 0], sizes = [1, 128], strides = [1, 1]} : vector<8x128xf32> to vector<1x128xf32>
    %293 = vector.extract_strided_slice %207 {offsets = [3, 0], sizes = [1, 128], strides = [1, 1]} : vector<8x128xf32> to vector<1x128xf32>
    %294 = vector.extract_strided_slice %246 {offsets = [3, 0], sizes = [1, 128], strides = [1, 1]} : vector<8x128xf32> to vector<1x128xf32>
    %295 = tpu.concatenate %289, %290, %291, %292, %293, %294 in 0 : vector<1x128xf32>, vector<1x128xf32>, vector<1x128xf32>, vector<1x128xf32>, vector<1x128xf32>, vector<1x128xf32> -> vector<6x128xf32>
    %296 = arith.truncf %295 : vector<6x128xf32> to vector<6x128xbf16>
    %c3_136 = arith.constant 3 : index
    %c0_137 = arith.constant 0 : index
    %c0_138 = arith.constant 0 : index
    %297 = vector.load %arg9[%c3_136, %c0_137, %c0_138] : memref<8x128x128xbf16, #tpu.memory_space<vmem>>, vector<1x128x128xbf16>
    %298 = vector.shape_cast %297 : vector<1x128x128xbf16> to vector<128x128xbf16>
    %cst_139 = arith.constant dense<0.000000e+00> : vector<6x128xf32>
    %299 = tpu.matmul %296, %298, %cst_139 {dimension_numbers = #tpu.dot_dimension_numbers<[1], [0], [0], [1], [0, 0, 1, 1], [], []>} : vector<6x128xbf16>, vector<128x128xbf16>, vector<6x128xf32> -> vector<6x128xf32>
    %300 = arith.addf %288, %299 : vector<6x128xf32>
    %301 = vector.extract_strided_slice %51 {offsets = [4, 0], sizes = [1, 128], strides = [1, 1]} : vector<8x128xf32> to vector<1x128xf32>
    %302 = vector.extract_strided_slice %90 {offsets = [4, 0], sizes = [1, 128], strides = [1, 1]} : vector<8x128xf32> to vector<1x128xf32>
    %303 = vector.extract_strided_slice %129 {offsets = [4, 0], sizes = [1, 128], strides = [1, 1]} : vector<8x128xf32> to vector<1x128xf32>
    %304 = vector.extract_strided_slice %168 {offsets = [4, 0], sizes = [1, 128], strides = [1, 1]} : vector<8x128xf32> to vector<1x128xf32>
    %305 = vector.extract_strided_slice %207 {offsets = [4, 0], sizes = [1, 128], strides = [1, 1]} : vector<8x128xf32> to vector<1x128xf32>
    %306 = vector.extract_strided_slice %246 {offsets = [4, 0], sizes = [1, 128], strides = [1, 1]} : vector<8x128xf32> to vector<1x128xf32>
    %307 = tpu.concatenate %301, %302, %303, %304, %305, %306 in 0 : vector<1x128xf32>, vector<1x128xf32>, vector<1x128xf32>, vector<1x128xf32>, vector<1x128xf32>, vector<1x128xf32> -> vector<6x128xf32>
    %308 = arith.truncf %307 : vector<6x128xf32> to vector<6x128xbf16>
    %c4_140 = arith.constant 4 : index
    %c0_141 = arith.constant 0 : index
    %c0_142 = arith.constant 0 : index
    %309 = vector.load %arg9[%c4_140, %c0_141, %c0_142] : memref<8x128x128xbf16, #tpu.memory_space<vmem>>, vector<1x128x128xbf16>
    %310 = vector.shape_cast %309 : vector<1x128x128xbf16> to vector<128x128xbf16>
    %cst_143 = arith.constant dense<0.000000e+00> : vector<6x128xf32>
    %311 = tpu.matmul %308, %310, %cst_143 {dimension_numbers = #tpu.dot_dimension_numbers<[1], [0], [0], [1], [0, 0, 1, 1], [], []>} : vector<6x128xbf16>, vector<128x128xbf16>, vector<6x128xf32> -> vector<6x128xf32>
    %312 = arith.addf %300, %311 : vector<6x128xf32>
    %313 = vector.extract_strided_slice %51 {offsets = [5, 0], sizes = [1, 128], strides = [1, 1]} : vector<8x128xf32> to vector<1x128xf32>
    %314 = vector.extract_strided_slice %90 {offsets = [5, 0], sizes = [1, 128], strides = [1, 1]} : vector<8x128xf32> to vector<1x128xf32>
    %315 = vector.extract_strided_slice %129 {offsets = [5, 0], sizes = [1, 128], strides = [1, 1]} : vector<8x128xf32> to vector<1x128xf32>
    %316 = vector.extract_strided_slice %168 {offsets = [5, 0], sizes = [1, 128], strides = [1, 1]} : vector<8x128xf32> to vector<1x128xf32>
    %317 = vector.extract_strided_slice %207 {offsets = [5, 0], sizes = [1, 128], strides = [1, 1]} : vector<8x128xf32> to vector<1x128xf32>
    %318 = vector.extract_strided_slice %246 {offsets = [5, 0], sizes = [1, 128], strides = [1, 1]} : vector<8x128xf32> to vector<1x128xf32>
    %319 = tpu.concatenate %313, %314, %315, %316, %317, %318 in 0 : vector<1x128xf32>, vector<1x128xf32>, vector<1x128xf32>, vector<1x128xf32>, vector<1x128xf32>, vector<1x128xf32> -> vector<6x128xf32>
    %320 = arith.truncf %319 : vector<6x128xf32> to vector<6x128xbf16>
    %c5_144 = arith.constant 5 : index
    %c0_145 = arith.constant 0 : index
    %c0_146 = arith.constant 0 : index
    %321 = vector.load %arg9[%c5_144, %c0_145, %c0_146] : memref<8x128x128xbf16, #tpu.memory_space<vmem>>, vector<1x128x128xbf16>
    %322 = vector.shape_cast %321 : vector<1x128x128xbf16> to vector<128x128xbf16>
    %cst_147 = arith.constant dense<0.000000e+00> : vector<6x128xf32>
    %323 = tpu.matmul %320, %322, %cst_147 {dimension_numbers = #tpu.dot_dimension_numbers<[1], [0], [0], [1], [0, 0, 1, 1], [], []>} : vector<6x128xbf16>, vector<128x128xbf16>, vector<6x128xf32> -> vector<6x128xf32>
    %324 = arith.addf %312, %323 : vector<6x128xf32>
    %325 = vector.extract_strided_slice %51 {offsets = [6, 0], sizes = [1, 128], strides = [1, 1]} : vector<8x128xf32> to vector<1x128xf32>
    %326 = vector.extract_strided_slice %90 {offsets = [6, 0], sizes = [1, 128], strides = [1, 1]} : vector<8x128xf32> to vector<1x128xf32>
    %327 = vector.extract_strided_slice %129 {offsets = [6, 0], sizes = [1, 128], strides = [1, 1]} : vector<8x128xf32> to vector<1x128xf32>
    %328 = vector.extract_strided_slice %168 {offsets = [6, 0], sizes = [1, 128], strides = [1, 1]} : vector<8x128xf32> to vector<1x128xf32>
    %329 = vector.extract_strided_slice %207 {offsets = [6, 0], sizes = [1, 128], strides = [1, 1]} : vector<8x128xf32> to vector<1x128xf32>
    %330 = vector.extract_strided_slice %246 {offsets = [6, 0], sizes = [1, 128], strides = [1, 1]} : vector<8x128xf32> to vector<1x128xf32>
    %331 = tpu.concatenate %325, %326, %327, %328, %329, %330 in 0 : vector<1x128xf32>, vector<1x128xf32>, vector<1x128xf32>, vector<1x128xf32>, vector<1x128xf32>, vector<1x128xf32> -> vector<6x128xf32>
    %332 = arith.truncf %331 : vector<6x128xf32> to vector<6x128xbf16>
    %c6 = arith.constant 6 : index
    %c0_148 = arith.constant 0 : index
    %c0_149 = arith.constant 0 : index
    %333 = vector.load %arg9[%c6, %c0_148, %c0_149] : memref<8x128x128xbf16, #tpu.memory_space<vmem>>, vector<1x128x128xbf16>
    %334 = vector.shape_cast %333 : vector<1x128x128xbf16> to vector<128x128xbf16>
    %cst_150 = arith.constant dense<0.000000e+00> : vector<6x128xf32>
    %335 = tpu.matmul %332, %334, %cst_150 {dimension_numbers = #tpu.dot_dimension_numbers<[1], [0], [0], [1], [0, 0, 1, 1], [], []>} : vector<6x128xbf16>, vector<128x128xbf16>, vector<6x128xf32> -> vector<6x128xf32>
    %336 = arith.addf %324, %335 : vector<6x128xf32>
    %337 = vector.extract_strided_slice %51 {offsets = [7, 0], sizes = [1, 128], strides = [1, 1]} : vector<8x128xf32> to vector<1x128xf32>
    %338 = vector.extract_strided_slice %90 {offsets = [7, 0], sizes = [1, 128], strides = [1, 1]} : vector<8x128xf32> to vector<1x128xf32>
    %339 = vector.extract_strided_slice %129 {offsets = [7, 0], sizes = [1, 128], strides = [1, 1]} : vector<8x128xf32> to vector<1x128xf32>
    %340 = vector.extract_strided_slice %168 {offsets = [7, 0], sizes = [1, 128], strides = [1, 1]} : vector<8x128xf32> to vector<1x128xf32>
    %341 = vector.extract_strided_slice %207 {offsets = [7, 0], sizes = [1, 128], strides = [1, 1]} : vector<8x128xf32> to vector<1x128xf32>
    %342 = vector.extract_strided_slice %246 {offsets = [7, 0], sizes = [1, 128], strides = [1, 1]} : vector<8x128xf32> to vector<1x128xf32>
    %343 = tpu.concatenate %337, %338, %339, %340, %341, %342 in 0 : vector<1x128xf32>, vector<1x128xf32>, vector<1x128xf32>, vector<1x128xf32>, vector<1x128xf32>, vector<1x128xf32> -> vector<6x128xf32>
    %344 = arith.truncf %343 : vector<6x128xf32> to vector<6x128xbf16>
    %c7 = arith.constant 7 : index
    %c0_151 = arith.constant 0 : index
    %c0_152 = arith.constant 0 : index
    %345 = vector.load %arg9[%c7, %c0_151, %c0_152] : memref<8x128x128xbf16, #tpu.memory_space<vmem>>, vector<1x128x128xbf16>
    %346 = vector.shape_cast %345 : vector<1x128x128xbf16> to vector<128x128xbf16>
    %cst_153 = arith.constant dense<0.000000e+00> : vector<6x128xf32>
    %347 = tpu.matmul %344, %346, %cst_153 {dimension_numbers = #tpu.dot_dimension_numbers<[1], [0], [0], [1], [0, 0, 1, 1], [], []>} : vector<6x128xbf16>, vector<128x128xbf16>, vector<6x128xf32> -> vector<6x128xf32>
    %348 = arith.addf %336, %347 : vector<6x128xf32>
    %cst_154 = arith.constant 0.000000e+00 : f32
    %349 = vector.broadcast %cst_154 : f32 to vector<6x128xf32>
    %350 = arith.maximumf %348, %349 : vector<6x128xf32>
    %351 = vector.extract_strided_slice %350 {offsets = [0, 0], sizes = [1, 128], strides = [1, 1]} : vector<6x128xf32> to vector<1x128xf32>
    %352 = vector.extract_strided_slice %350 {offsets = [1, 0], sizes = [1, 128], strides = [1, 1]} : vector<6x128xf32> to vector<1x128xf32>
    %353 = vector.extract_strided_slice %350 {offsets = [2, 0], sizes = [1, 128], strides = [1, 1]} : vector<6x128xf32> to vector<1x128xf32>
    %354 = tpu.concatenate %351, %352, %353 in 1 : vector<1x128xf32>, vector<1x128xf32>, vector<1x128xf32> -> vector<1x384xf32>
    %355 = vector.extract_strided_slice %350 {offsets = [3, 0], sizes = [1, 128], strides = [1, 1]} : vector<6x128xf32> to vector<1x128xf32>
    %356 = vector.extract_strided_slice %350 {offsets = [4, 0], sizes = [1, 128], strides = [1, 1]} : vector<6x128xf32> to vector<1x128xf32>
    %357 = vector.extract_strided_slice %350 {offsets = [5, 0], sizes = [1, 128], strides = [1, 1]} : vector<6x128xf32> to vector<1x128xf32>
    %358 = tpu.concatenate %355, %356, %357 in 1 : vector<1x128xf32>, vector<1x128xf32>, vector<1x128xf32> -> vector<1x384xf32>
    %359 = tpu.concatenate %354, %358 in 0 : vector<1x384xf32>, vector<1x384xf32> -> vector<2x384xf32>
    %360 = arith.truncf %359 : vector<2x384xf32> to vector<2x384xbf16>
    %c0_155 = arith.constant 0 : index
    %c0_156 = arith.constant 0 : index
    %361 = vector.load %arg11[%c0_155, %c0_156] : memref<384x128xbf16, #tpu.memory_space<vmem>>, vector<384x128xbf16>
    %cst_157 = arith.constant dense<0.000000e+00> : vector<2x128xf32>
    %362 = tpu.matmul %360, %361, %cst_157 {dimension_numbers = #tpu.dot_dimension_numbers<[1], [0], [0], [1], [0, 0, 1, 1], [], []>} : vector<2x384xbf16>, vector<384x128xbf16>, vector<2x128xf32> -> vector<2x128xf32>
    %c0_158 = arith.constant 0 : index
    %c0_159 = arith.constant 0 : index
    %363 = vector.load %arg12[%c0_158, %c0_159] : memref<1x128xf32, #tpu.memory_space<vmem>>, vector<1x128xf32>
    %364 = vector.broadcast %363 : vector<1x128xf32> to vector<2x128xf32>
    %365 = arith.addf %362, %364 : vector<2x128xf32>
    %cst_160 = arith.constant 0.000000e+00 : f32
    %366 = vector.broadcast %cst_160 : f32 to vector<2x128xf32>
    %367 = arith.maximumf %365, %366 : vector<2x128xf32>
    %368 = arith.truncf %367 : vector<2x128xf32> to vector<2x128xbf16>
    %c0_161 = arith.constant 0 : index
    %c0_162 = arith.constant 0 : index
    %369 = vector.load %arg13[%c0_161, %c0_162] : memref<128x128xbf16, #tpu.memory_space<vmem>>, vector<128x128xbf16>
    %cst_163 = arith.constant dense<0.000000e+00> : vector<2x128xf32>
    %370 = tpu.matmul %368, %369, %cst_163 {dimension_numbers = #tpu.dot_dimension_numbers<[1], [0], [0], [1], [0, 0, 1, 1], [], []>} : vector<2x128xbf16>, vector<128x128xbf16>, vector<2x128xf32> -> vector<2x128xf32>
    %c0_164 = arith.constant 0 : index
    %c0_165 = arith.constant 0 : index
    %371 = vector.load %arg14[%c0_164, %c0_165] : memref<1x128xf32, #tpu.memory_space<vmem>>, vector<1x128xf32>
    %372 = vector.broadcast %371 : vector<1x128xf32> to vector<2x128xf32>
    %373 = arith.addf %370, %372 : vector<2x128xf32>
    %c0_166 = arith.constant 0 : index
    %c0_167 = arith.constant 0 : index
    %374 = vector.load %arg15[%c0_166, %c0_167] : memref<2x128xf32, #tpu.memory_space<vmem>>, vector<2x128xf32>
    tpu.vector_store %arg15[%c0_166, %c0_167], %373 {strides = array<i32>} : memref<2x128xf32, #tpu.memory_space<vmem>>, vector<2x128xf32>,
    return
  }
}

</mosaic_0001>

<bundles_post_ra>
// kernel: classify_forward.1
= control target key start
LH: loop header
LB: loop body
LE: loop exit
PB: predicated region body
PF: predicated region fallthrough
CT: control target
= control target key end

     0   :  { %s7854_s0 = inlined_call_operand.vmem [shape: bf16[6,8,128], index: 0, kind: input, shape index: {}]   ;;  %s7855_s1 = inlined_call_operand.vmem [shape: bf16[6,8,128], index: 1, kind: input, shape index: {}]   ;;  %s7856_s2 = inlined_call_operand.vmem [shape: bf16[6,1024], index: 2, kind: input, shape index: {}]   ;;  %s7857_s3 = inlined_call_operand.vmem [shape: bf16[3,128,128], index: 3, kind: input, shape index: {}]   ;;  %s7858_s4 = inlined_call_operand.vmem [shape: bf16[128,128], index: 4, kind: input, shape index: {}]   ;;  %s7859_s5 = inlined_call_operand.vmem [shape: bf16[128,128], index: 5, kind: input, shape index: {}]   ;;  %s7860_s6 = inlined_call_operand.vmem [shape: f32[1,128], index: 6, kind: input, shape index: {}]   ;;  %s7861_s7 = inlined_call_operand.vmem [shape: f32[1,128], index: 7, kind: input, shape index: {}]   ;;  %s7862_s8 = inlined_call_operand.vmem [shape: bf16[1024,128], index: 8, kind: input, shape index: {}]   ;;  %s7863_s9 = inlined_call_operand.vmem [shape: bf16[8,128,128], index: 9, kind: input, shape index: {}]   ;;  %s7864_s10 = inlined_call_operand.vmem [shape: f32[1,128], index: 10, kind: input, shape index: {}]   ;;  %s7865_s11 = inlined_call_operand.vmem [shape: bf16[384,128], index: 11, kind: input, shape index: {}]   ;;  %s7866_s12 = inlined_call_operand.vmem [shape: f32[1,128], index: 12, kind: input, shape index: {}]   ;;  %s7867_s13 = inlined_call_operand.vmem [shape: bf16[128,128], index: 13, kind: input, shape index: {}]   ;;  %s7868_s14 = inlined_call_operand.vmem [shape: f32[1,128], index: 14, kind: input, shape index: {}]   ;;  %s7869_s15 = inlined_call_operand.vmem [shape: f32[2,128], index: 15, kind: output, shape index: {0}]   ;;  %s7870_s16 = inlined_call_operand.hbm [shape: f32[6,8,128], index: 16, kind: output, shape index: {1}]  }
   0x1   :  { %7879 = sst [smem:[#allocation13_spill]] %s7854_s0 }
   0x2   :  { %v5570_v0 = vld [vmem:[%s7858_s4 + $0x38] sm:$0xff]  ;;  %v5569_v2 = vld [vmem:[%s7858_s4 + $0x30] sm:$0xff]  ;;  %v5568_v4 = vld [vmem:[%s7858_s4 + $0x28] sm:$0xff] }
   0x3   :  { %v5586_v1 = vld [vmem:[%s7857_s3 + $0x38] sm:$0xff]  ;;  %152 = vmatpush.bf16.msra.mxu0 %v5570_v0  ;;  %v5585_v3 = vld [vmem:[%s7857_s3 + $0x30] sm:$0xff]  ;;  %v5584_v5 = vld [vmem:[%s7857_s3 + $0x28] sm:$0xff] }
   0x4   :  { %349 = vmatpush.bf16.msra.mxu2 %v5586_v1 }
   0x7   :  { %153 = vmatpush.bf16.msra.mxu0 %v5569_v2 }
   0x8   :  { %350 = vmatpush.bf16.msra.mxu2 %v5585_v3 }
   0x9   :  { %22 = vsyncpa [#allocation3], 0  ;;  %v5567_v6 = vld [vmem:[%s7858_s4 + $0x20] sm:$0xff]  ;;  %v5566_v8 = vld [vmem:[%s7858_s4 + $0x18] sm:$0xff]  ;;  %s7880_s27 = sld [smem:[#allocation13_spill]]  ;;  %vm579_vm0 = vcmask 1041409  }
   0xa   :  { %v5583_v7 = vld [vmem:[%s7857_s3 + $0x20] sm:$0xff]  ;;  %v5582_v9 = vld [vmem:[%s7857_s3 + $0x18] sm:$0xff]  ;;  %v5565_v10 = vld [vmem:[%s7858_s4 + $0x10] sm:$0xff]  ;;  %vm582_vm1 = vcmask 1042434   ;;  %vm585_vm2 = vcmask 1043459   ;;  %vm588_vm3 = vcmask 1044484  }
   0xb   :  { %154 = vmatpush.bf16.msra.mxu0 %v5568_v4  ;;  %v5581_v11 = vld [vmem:[%s7857_s3 + $0x10] sm:$0xff]  ;;  %v5564_v12 = vld [vmem:[%s7858_s4 + $0x8] sm:$0xff]  ;;  %v5563_v14 = vld [vmem:[%s7858_s4] sm:$0xff]  ;;  %vm591_vm4 = vcmask 1045509   ;;  %vm594_vm5 = vcmask 1046534   ;;  %vm597_vm6 = vcmask 1047559  }
   0xc   :  { %351 = vmatpush.bf16.msra.mxu2 %v5584_v5  ;;  %v5580_v13 = vld [vmem:[%s7857_s3 + $0x8] sm:$0xff]  ;;  %v5579_v15 = vld [vmem:[%s7857_s3] sm:$0xff]  ;;  %v5610_v16 = vld [vmem:[%s7857_s3 + $0x38] sm:$0xff]  ;;  %s5940_s0 = smov [#allocation2]   ;;  %s5942_s18 = smov 8  }
   0xd   :  { %v284_v18 = vld [vmem:[%s7855_s1] sm:$0xf]  ;;  %v5609_v19 = vld [vmem:[%s7857_s3 + $0x30] sm:$0xff]  ;;  %v5608_v20 = vld [vmem:[%s7857_s3 + $0x28] sm:$0xff]  ;;  %s4435_s17 = sshll.u32 %s5940_s0, 4  ;;  %s4436_s17 = int_to_ptr.vmem [resolvable:$true] %s4435_s17 }
   0xe   :  { %v5607_v21 = vld [vmem:[%s7857_s3 + $0x20] sm:$0xff]  ;;  %v5606_v22 = vld [vmem:[%s7857_s3 + $0x18] sm:$0xff]  ;;  %v5605_v24 = vld [vmem:[%s7857_s3 + $0x10] sm:$0xff] }
   0xf   :  { %155 = vmatpush.bf16.msra.mxu0 %v5567_v6  ;;  %v5557_v17 = vld [vmem:[%s7880_s27] sm:$0xff]  ;;  %v5558_v23 = vld [vmem:[%s7880_s27 + $0x8] sm:$0xff]  ;;  %v5626_v27 = vld [vmem:[%s7857_s3 + $0xb8] sm:$0xff] }
  0x10   :  { %352 = vmatpush.bf16.msra.mxu2 %v5583_v7  ;;  %v5604_v25 = vld [vmem:[%s7857_s3 + $0x8] sm:$0xff]  ;;  %v5603_v26 = vld [vmem:[%s7857_s3] sm:$0xff]  ;;  %v5625_v28 = vld [vmem:[%s7857_s3 + $0xb0] sm:$0xff] }
  0x11   :  { %v5559_v29 = vld [vmem:[%s7880_s27 + $0x10] sm:$0xff]  ;;  %v5624_v30 = vld [vmem:[%s7857_s3 + $0xa8] sm:$0xff]  ;;  %v5578_v31 = vld [vmem:[%s7859_s5 + $0x38] sm:$0xff] }
  0x12   :  { %v283_v32 = vld [vmem:[%s7880_s27] sm:$0xf]  ;;  %v5594_v33 = vld [vmem:[%s7857_s3 + $0x78] sm:$0xff]  ;;  %258 = vmatpush.bf16.msra.mxu1 %v5578_v31  ;;  %v5577_v34 = vld [vmem:[%s7859_s5 + $0x30] sm:$0xff] }
  0x13   :  { %156 = vmatpush.bf16.msra.mxu0 %v5566_v8  ;;  %370 = vmatpush.bf16.xpose.msra.mxu3 %v283_v32  ;;  %v5623_v35 = vld [vmem:[%s7857_s3 + $0xa0] sm:$0xff]  ;;  %v5593_v36 = vld [vmem:[%s7857_s3 + $0x70] sm:$0xff]  ;;  %v5576_v37 = vld [vmem:[%s7859_s5 + $0x28] sm:$0xff] }
  0x14   :  { %353 = vmatpush.bf16.msra.mxu2 %v5582_v9  ;;  %v5622_v38 = vld [vmem:[%s7857_s3 + $0x98] sm:$0xff]  ;;  %v5592_v39 = vld [vmem:[%s7857_s3 + $0x68] sm:$0xff]  ;;  %v5575_v40 = vld [vmem:[%s7859_s5 + $0x20] sm:$0xff] }
  0x15   :  { %v5621_v41 = vld [vmem:[%s7857_s3 + $0x90] sm:$0xff]  ;;  %v5591_v42 = vld [vmem:[%s7857_s3 + $0x60] sm:$0xff]  ;;  %v4672_v43 = vld [vmem:[%s7855_s1 + $0xc] sm:$0xf] }
  0x16   :  { %259 = vmatpush.bf16.msra.mxu1 %v5577_v34  ;;  %v5574_v44 = vld [vmem:[%s7859_s5 + $0x18] sm:$0xff]  ;;  %v5620_v45 = vld [vmem:[%s7857_s3 + $0x88] sm:$0xff]  ;;  %v5573_v47 = vld [vmem:[%s7859_s5 + $0x10] sm:$0xff] }
  0x17   :  { %157 = vmatpush.bf16.msra.mxu0 %v5565_v10  ;;  %v5590_v46 = vld [vmem:[%s7857_s3 + $0x58] sm:$0xff]  ;;  %v5619_v48 = vld [vmem:[%s7857_s3 + $0x80] sm:$0xff]  ;;  %v5572_v49 = vld [vmem:[%s7859_s5 + $0x8] sm:$0xff] }
  0x18   :  { %354 = vmatpush.bf16.msra.mxu2 %v5581_v11  ;;  %v4756_v50 = vld [vmem:[%s7855_s1 + $0x14] sm:$0xf]  ;;  %v5571_v51 = vld [vmem:[%s7859_s5] sm:$0xff]  ;;  %v5588_v54 = vld [vmem:[%s7857_s3 + $0x48] sm:$0xff] }
  0x19   :  { %v5589_v52 = vld [vmem:[%s7857_s3 + $0x50] sm:$0xff]  ;;  %v5560_v53 = vld [vmem:[%s7855_s1] sm:$0xff]  ;;  %v5561_v56 = vld [vmem:[%s7855_s1 + $0x8] sm:$0xff] }
  0x1a   :  { %260 = vmatpush.bf16.msra.mxu1 %v5576_v37  ;;  %v5587_v55 = vld [vmem:[%s7857_s3 + $0x40] sm:$0xff]  ;;  %v5562_v58 = vld [vmem:[%s7855_s1 + $0x10] sm:$0xff]  ;;  %v5602_v61 = vld [vmem:[%s7857_s3 + $0xb8] sm:$0xff] }
  0x1b   :  { %158 = vmatpush.bf16.msra.mxu0 %v5564_v12  ;;  %755 = vmatpush.bf16.msrb.mxu3 %v5594_v33  ;;  %v6207_v59 = vld [vmem:[%s7861_s7] ss:$0 sm:$0xff]  ;;  %v4671_v1 = vld [vmem:[%s7880_s27 + $0xc] sm:$0xf]  ;;  %v5601_v2 = vld [vmem:[%s7857_s3 + $0xb0] sm:$0xff] }
  0x1c   :  { %355 = vmatpush.bf16.msra.mxu2 %v5580_v13  ;;  %v5600_v4 = vld [vmem:[%s7857_s3 + $0xa8] sm:$0xff]  ;;  %v5599_v7 = vld [vmem:[%s7857_s3 + $0xa0] sm:$0xff]  ;;  %v5598_v9 = vld [vmem:[%s7857_s3 + $0x98] sm:$0xff] }
  0x1d   :  { %v4572_v8 = vld [vmem:[%s7855_s1 + $0x4] sm:$0xf]  ;;  %v4755_v11 = vld [vmem:[%s7880_s27 + $0x14] sm:$0xf]  ;;  %v5596_v13 = vld [vmem:[%s7857_s3 + $0x88] sm:$0xff] }
  0x1e   :  { %261 = vmatpush.bf16.msra.mxu1 %v5575_v40  ;;  %v5597_v12 = vld [vmem:[%s7857_s3 + $0x90] sm:$0xff] }
  0x1f   :  { %159 = vmatpush.bf16.msra.mxu0 %v5563_v14  ;;  %756 = vmatpush.bf16.msrb.mxu3 %v5593_v36 }
  0x20   :  { %356 = vmatpush.bf16.msra.mxu2 %v5579_v15 }
  0x22   :  { %160 = vmatmul.bf16.vlgmr.msra.gmra.mxu0 %v5557_v17  ;;  %262 = vmatpush.bf16.msra.mxu1 %v5574_v44  ;;  %v4622_v17 = vld [vmem:[%s7855_s1 + $0x8] sm:$0xf]  ;;  %v5618_v44 = vld [vmem:[%s7857_s3 + $0x78] sm:$0xff] }
  0x23   :  { %1548 = vmatpush.bf16.msrb.mxu0 %v5610_v16  ;;  %357 = vmatmul.bf16.vlgmr.msra.gmra.mxu2 %v284_v18  ;;  %v5595_v16 = vld [vmem:[%s7857_s3 + $0x80] sm:$0xff] }
  0x24   :  { %757 = vmatpush.bf16.msrb.mxu3 %v5592_v39 }
  0x26   :  { %263 = vmatpush.bf16.msra.mxu1 %v5573_v47 }
  0x27   :  { %1549 = vmatpush.bf16.msrb.mxu0 %v5609_v19 }
  0x28   :  { %758 = vmatpush.bf16.msrb.mxu3 %v5591_v42 }
  0x2a   :  { %264 = vmatpush.bf16.msra.mxu1 %v5572_v49 }
  0x2b   :  { %1550 = vmatpush.bf16.msrb.mxu0 %v5608_v20 }
  0x2c   :  { %759 = vmatpush.bf16.msrb.mxu3 %v5590_v46 }
  0x2e   :  { %265 = vmatpush.bf16.msra.mxu1 %v5571_v51 }
  0x2f   :  { %1551 = vmatpush.bf16.msrb.mxu0 %v5607_v21 }
  0x30   :  { %760 = vmatpush.bf16.msrb.mxu3 %v5589_v52  ;;  %v5615_v52 = vld [vmem:[%s7857_s3 + $0x60] sm:$0xff] }
  0x31   :  { %266 = vmatmul.bf16.vlgmr.msra.gmra.mxu1 %v5560_v53 }
  0x32   :  { %165 = vmatmul.bf16.gmra.mxu0 %v5558_v23  ;;  %1569 = vmatpush.bf16.xpose.msrb.mxu1 %v4671_v1  ;;  %v5612_v1 = vld [vmem:[%s7857_s3 + $0x48] sm:$0xff] }
  0x33   :  { %1552 = vmatpush.bf16.msrb.mxu0 %v5606_v22 }
  0x34   :  { %761 = vmatpush.bf16.msrb.mxu3 %v5588_v54  ;;  %v5614_v54 = vld [vmem:[%s7857_s3 + $0x58] sm:$0xff] }
  0x37   :  { %1553 = vmatpush.bf16.msrb.mxu0 %v5605_v24  ;;  %v409_v24 = vlaneseq }
  0x38   :  { %762 = vmatpush.bf16.msrb.mxu3 %v5587_v55 }
  0x3a   :  { %2361 = vmatpush.bf16.xpose.msra.mxu1 %v4755_v11 }
  0x3b   :  { %1554 = vmatpush.bf16.msrb.mxu0 %v5604_v25 }
  0x3f   :  { %1555 = vmatpush.bf16.msrb.mxu0 %v5603_v26  ;;  %v410_v26 = vshrl.u32 %v409_v24, 7 }
  0x41   :  { %271 = vmatmul.bf16.gmra.mxu1 %v5561_v56  ;;  %5792 = vset.pattern.permute.xlu0 %v410_v26 }
  0x42   :  { %170 = vmatmul.bf16.gmra.mxu0 %v5559_v29  ;;  %5791 = vset.pattern.permute.xlu2 %v410_v26 }
  0x43   :  { %2340 = vmatpush.bf16.msra.mxu0 %v5626_v27  ;;  %5790 = vset.pattern.permute.xlu1 %v410_v26 }
  0x47   :  { %2341 = vmatpush.bf16.msra.mxu0 %v5625_v28  ;;  %v4571_v28 = vld [vmem:[%s7880_s27 + $0x4] sm:$0xf] }
  0x48   :  { %776 = vmatpush.bf16.xpose.msrb.mxu2 %v4571_v28 }
  0x4b   :  { %2342 = vmatpush.bf16.msra.mxu0 %v5624_v30  ;;  %v4621_v30 = vld [vmem:[%s7880_s27 + $0x8] sm:$0xf] }
  0x4f   :  { %2343 = vmatpush.bf16.msra.mxu0 %v5623_v35 }
  0x50   :  { %1173 = vmatpush.bf16.xpose.msra.mxu2 %v4621_v30 }
  0x51   :  { %276 = vmatmul.bf16.gmra.mxu1 %v5562_v58  ;;  %v5613_v58 = vld [vmem:[%s7857_s3 + $0x50] sm:$0xff] }
  0x52   :  { %1556 = vmatmul.bf16.vlgmr.msrb.gmra.mxu0 %v4672_v43 }
  0x53   :  { %2344 = vmatpush.bf16.msra.mxu0 %v5622_v38 }
  0x57   :  { %2345 = vmatpush.bf16.msra.mxu0 %v5621_v41 }
  0x5b   :  { %2346 = vmatpush.bf16.msra.mxu0 %v5620_v45 }
  0x5f   :  { %2347 = vmatpush.bf16.msra.mxu0 %v5619_v48  ;;  %v5617_v48 = vld [vmem:[%s7857_s3 + $0x70] sm:$0xff] }
  0x62   :  { %2348 = vmatmul.bf16.vlgmr.msra.gmra.mxu0 %v4756_v50  ;;  %v5616_v50 = vld [vmem:[%s7857_s3 + $0x68] sm:$0xff] }
  0x9f   :  { %v6199_v57 = vpop.f32.mrf.mxu0 }
  0xa6   :  { %v358_v60 = vpop.f32.mrf.mxu2 }
  0xa7   :  { %v362_v62 = vpack.c.bf16 %v358_v60, %v358_v60  ;;  %v163_v63 = vpop.f32.mrf.mxu0 }
  0xa8   :  { %v6213_v0 = vadd.f32 %v6207_v59, %v163_v63 }
  0xa9   :  { %371 = vmatmul.bf16.vlgmr.msra.gmra.mxu3 %v362_v62 }
  0xaa   :  { %1152 = vmatpush.bf16.msra.mxu3 %v5602_v61 }
  0xae   :  { %v360_v3 = vpop.f32.mrf.mxu2  ;;  %1153 = vmatpush.bf16.msra.mxu3 %v5601_v2  ;;  %v6262_v29 = vpop.f32.mrf.mxu1 }
  0xaf   :  { %v166_v5 = vpop.f32.mrf.mxu0 }
  0xb0   :  { %v6225_v6 = vadd.f32 %v6207_v59, %v166_v5 }
  0xb2   :  { %1154 = vmatpush.bf16.msra.mxu3 %v5600_v4 }
  0xb6   :  { %1155 = vmatpush.bf16.msra.mxu3 %v5599_v7  ;;  %v6267_v31 = vpop.f32.mrf.mxu1  ;;  %v5611_v7 = vld [vmem:[%s7857_s3 + $0x40] sm:$0xff] }
  0xb7   :  { %v6236_v10 = vpop.f32.mrf.mxu0 }
  0xb9   :  { %763 = vmatmul.bf16.vlgmr.msrb.gmra.mxu3 %v4572_v8  ;;  %v4706_v8 = vld [vmem:[%s7855_s1 + $0x10] sm:$0xf] }
  0xba   :  { %1156 = vmatpush.bf16.msra.mxu3 %v5598_v9 }
  0xbe   :  { %1157 = vmatpush.bf16.msra.mxu3 %v5597_v12  ;;  %v6269_v32 = vpop.f32.mrf.mxu1 }
  0xbf   :  { %v171_v14 = vpop.f32.mrf.mxu0 }
  0xc0   :  { %v6248_v15 = vadd.f32 %v6207_v59, %v171_v14 }
  0xc2   :  { %1158 = vmatpush.bf16.msra.mxu3 %v5596_v13 }
  0xc6   :  { %1159 = vmatpush.bf16.msra.mxu3 %v5595_v16  ;;  %v6271_v37 = vpop.f32.mrf.mxu1 }
  0xc7   :  { %v173_v18 = vpop.f32.mrf.mxu0 }
  0xc8   :  { %v6257_v19 = vadd.f32 %v6207_v59, %v173_v18 }
  0xc9   :  { %1160 = vmatmul.bf16.vlgmr.msra.gmra.mxu3 %v4622_v17 }
  0xce   :  { %v6273_v43 = vpop.f32.mrf.mxu1 }
  0xcf   :  { %v1557_v20 = vpop.f32.mrf.mxu0 }
  0xd0   :  { %v1561_v21 = vpack.c.bf16 %v1557_v20, %v1557_v20 }
  0xd2   :  { %1570 = vmatmul.bf16.vlgmr.msrb.gmra.mxu1 %v1561_v21 }
  0xd6   :  { %v6284_v51 = vpop.f32.mrf.mxu1 }
  0xd7   :  { %v1559_v22 = vpop.f32.mrf.mxu0  ;;  %v2368_v21 = vrot.slane %v6284_v51, 1  ;;  %v2370_v28 = vrot.slane %v6284_v51, 3  ;;  %v2374_v30 = vrot.slane %v6284_v51, 7 }
  0xd8   :  { %v2371_v22 = vrot.slane %v6284_v51, 4 }
  0xda   :  { %v2379_v24 = vperm.slane %v2371_v22, 0 }
  0xdc   :  { %v6317_v26 = vadd.f32 %v2379_v24, %v6257_v19 }
  0xdf   :  { %v2349_v23 = vpop.f32.mrf.mxu0 }
  0xe0   :  { %v2353_v25 = vpack.c.bf16 %v2349_v23, %v2349_v23  ;;  %v2376_v23 = vperm.slane %v2368_v21, 0 }
  0xe2   :  { %2362 = vmatmul.bf16.vlgmr.msra.gmra.mxu1 %v2353_v25  ;;  %v6314_v25 = vadd.f32 %v2376_v23, %v6257_v19 }
  0xe7   :  { %v2351_v27 = vpop.f32.mrf.mxu0 }
  0xe8   :  { %v2369_v27 = vrot.slane %v6284_v51, 2 }
 0x12c   :  { %v372_v33 = vpop.f32.mrf.mxu3 }
 0x12d   :  { %v422_v34 = vperm.slane %v372_v33, 2  ;;  %v415_v35 = vperm.slane %v372_v33, 1  ;;  %v408_v36 = vperm.slane %v372_v33, 0  ;;  %v443_v39 = vperm.slane %v372_v33, 5 }
 0x12e   :  { %v436_v40 = vperm.slane %v372_v33, 4  ;;  %v429_v41 = vperm.slane %v372_v33, 3  ;;  %v457_v46 = vperm.slane %v372_v33, 7  ;;  %v450_v47 = vperm.slane %v372_v33, 6 }
 0x12f   :  { %427 = vperm.xlu0 %5792, %v422_v34   ;;  %420 = vperm.xlu2 %5791, %v415_v35   ;;  %v2377_v33 = vperm.slane %v2369_v27, 0  ;;  %v2375_v34 = vperm.slane %v6284_v51, 0  ;;  %v2378_v35 = vperm.slane %v2370_v28, 0 }
 0x130   :  { %413 = vperm.xlu1 %5790, %v408_v36   ;;  %v2382_v36 = vperm.slane %v2374_v30, 0 }
 0x134   :  { %v374_v38 = vpop.f32.mrf.mxu3 }
 0x135   :  { %v6324_v38 = vadd.f32 %v2377_v33, %v6257_v19 }
 0x137   :  { %448 = vperm.xlu0 %5792, %v443_v39   ;;  %441 = vperm.xlu2 %5791, %v436_v40   ;;  %v6327_v39 = vadd.f32 %v2375_v34, %v6257_v19  ;;  %v6330_v40 = vadd.f32 %v2378_v35, %v6257_v19 }
 0x138   :  { %434 = vperm.xlu1 %5790, %v429_v41   ;;  %v6333_v41 = vadd.f32 %v2382_v36, %v6257_v19 }
 0x139   :  { %7881 = vst [vmem:[#allocation5_spill] sm:$0xff] %v6330_v40 }
 0x13a   :  { %7882 = vst [vmem:[#allocation6_spill] sm:$0xff] %v6333_v41 }
 0x13c   :  { %v764_v42 = vpop.f32.mrf.mxu3 }
 0x13d   :  { %v768_v45 = vpack.c.bf16 %v764_v42, %v764_v42  ;;  %v2373_v42 = vrot.slane %v6284_v51, 6 }
 0x13f   :  { %462 = vperm.xlu2 %5791, %v457_v46   ;;  %777 = vmatmul.bf16.vlgmr.msrb.gmra.mxu2 %v768_v45  ;;  %v2381_v45 = vperm.slane %v2373_v42, 0 }
 0x140   :  { %455 = vperm.xlu1 %5790, %v450_v47   ;;  %1944 = vmatpush.bf16.msrb.mxu2 %v5618_v44  ;;  %v2372_v44 = vrot.slane %v6284_v51, 5  ;;  %v383_v51 = vrot.slane %v6262_v29, 7 }
 0x141   :  { %v6338_v47 = vadd.f32 %v2381_v45, %v6257_v19 }
 0x142   :  { %v2380_v46 = vperm.slane %v2372_v44, 0 }
 0x143   :  { %7883 = vst [vmem:[#allocation7_spill] sm:$0xff] %v6338_v47 }
 0x144   :  { %v766_v49 = vpop.f32.mrf.mxu3  ;;  %1945 = vmatpush.bf16.msrb.mxu2 %v5617_v48  ;;  %v6341_v48 = vadd.f32 %v2380_v46, %v6257_v19 }
 0x146   :  { %7884 = vst [vmem:[#allocation8_spill] sm:$0xff] %v6341_v48 }
 0x148   :  { %1946 = vmatpush.bf16.msrb.mxu2 %v5616_v50 }
 0x14c   :  { %v1161_v53 = vpop.f32.mrf.mxu3  ;;  %1947 = vmatpush.bf16.msrb.mxu2 %v5615_v52  ;;  %v377_v52 = vrot.slane %v6262_v29, 1 }
 0x14d   :  { %v1165_v55 = vpack.c.bf16 %v1161_v53, %v1161_v53  ;;  %v380_v53 = vrot.slane %v6262_v29, 4 }
 0x14e   :  { %v385_v19 = vperm.slane %v377_v52, 0 }
 0x14f   :  { %1174 = vmatmul.bf16.vlgmr.msra.gmra.mxu2 %v1165_v55  ;;  %v1571_v56 = vpop.f32.mrf.mxu1  ;;  %v378_v55 = vrot.slane %v6262_v29, 2 }
 0x150   :  { %1948 = vmatpush.bf16.msrb.mxu2 %v5614_v54  ;;  %v1621_v60 = vperm.slane %v1571_v56, 2  ;;  %v1614_v61 = vperm.slane %v1571_v56, 1  ;;  %v1607_v62 = vperm.slane %v1571_v56, 0  ;;  %v1642_v2 = vperm.slane %v1571_v56, 5  ;;  %v6348_v54 = vld [vmem:[%s7860_s6] ss:$0 sm:$0xff] }
 0x151   :  { %v1635_v3 = vperm.slane %v1571_v56, 4  ;;  %v1628_v5 = vperm.slane %v1571_v56, 3  ;;  %v1656_v9 = vperm.slane %v1571_v56, 7  ;;  %v1649_v12 = vperm.slane %v1571_v56, 6 }
 0x152   :  { %1626 = vperm.xlu2 %5791, %v1621_v60   ;;  %1619 = vperm.xlu1 %5790, %v1614_v61   ;;  %v162_v56 = vadd.f32 %v6207_v59, %v6199_v57  ;;  %v384_v61 = vperm.slane %v6262_v29, 0 }
 0x153   :  { %1612 = vperm.xlu0 %5792, %v1607_v62  }
 0x154   :  { %v1163_v63 = vpop.f32.mrf.mxu3  ;;  %1949 = vmatpush.bf16.msrb.mxu2 %v5613_v58  ;;  %v388_v58 = vperm.slane %v380_v53, 0 }
 0x157   :  { %v1573_v4 = vpop.f32.mrf.mxu1 }
 0x158   :  { %1950 = vmatpush.bf16.msrb.mxu2 %v5612_v1  ;;  %v391_v1 = vperm.slane %v383_v51, 0  ;;  %v381_v4 = vrot.slane %v6262_v29, 5 }
 0x15a   :  { %1647 = vperm.xlu2 %5791, %v1642_v2   ;;  %1640 = vperm.xlu1 %5790, %v1635_v3   ;;  %v386_v2 = vperm.slane %v378_v55, 0  ;;  %v389_v24 = vperm.slane %v381_v4, 0 }
 0x15b   :  { %1633 = vperm.xlu0 %5792, %v1628_v5   ;;  %v401_v5 = vadd.f32 %v385_v19, %v162_v56 }
 0x15c   :  { %1951 = vmatpush.bf16.msrb.mxu2 %v5611_v7  ;;  %v404_v7 = vadd.f32 %v388_v58, %v162_v56  ;;  %v405_v42 = vadd.f32 %v389_v24, %v162_v56 }
 0x15f   :  { %1952 = vmatmul.bf16.vlgmr.msrb.gmra.mxu2 %v4706_v8  ;;  %v6304_v11 = vpop.f32.mrf.mxu1 }
 0x160   :  { %v2406_v13 = vperm.slane %v6304_v11, 1  ;;  %v2427_v14 = vperm.slane %v6304_v11, 4  ;;  %v2399_v16 = vperm.slane %v6304_v11, 0  ;;  %v2413_v17 = vperm.slane %v6304_v11, 2 }
 0x161   :  { %v2420_v20 = vperm.slane %v6304_v11, 3 }
 0x162   :  { %1661 = vperm.xlu1 %5790, %v1656_v9   ;;  %2411 = vperm.xlu2 %5791, %v2406_v13  }
 0x163   :  { %1654 = vperm.xlu0 %5792, %v1649_v12   ;;  %v400_v12 = vadd.f32 %v384_v61, %v162_v56 }
 0x167   :  { %v2365_v18 = vpop.f32.mrf.mxu1 }
 0x168   :  { %v407_v18 = vadd.f32 %v391_v1, %v162_v56 }
 0x16a   :  { %2432 = vperm.xlu2 %5791, %v2427_v14   ;;  %2404 = vperm.xlu1 %5790, %v2399_v16   ;;  %v379_v14 = vrot.slane %v6262_v29, 3 }
 0x16b   :  { %2418 = vperm.xlu0 %5792, %v2413_v17  }
 0x16c   :  { %v387_v27 = vperm.slane %v379_v14, 0 }
 0x16e   :  { %v403_v46 = vadd.f32 %v387_v27, %v162_v56 }
 0x172   :  { %2425 = vperm.xlu1 %5790, %v2420_v20   ;;  %v402_v20 = vadd.f32 %v386_v2, %v162_v56 }
 0x189   :  { %v421_v49 = vpop.permute.xlu2 %420 }
 0x18a   :  { %v468_v62 = vmul.f32 %v6348_v54, %v421_v49 }
 0x18c   :  { %v476_v16 = vadd.f32 %v468_v62, %v401_v5 }
 0x18e   :  { %v489_v28 = vrot.slane %v476_v16, 4 }
 0x190   :  { %v490_v52 = vmax.f32 %v476_v16, %v489_v28 }
 0x191   :  { %v442_v50 = vpop.permute.xlu2 %441 }
 0x192   :  { %v471_v63 = vmul.f32 %v6348_v54, %v442_v50  ;;  %v382_v50 = vrot.slane %v6262_v29, 6  ;;  %v491_v2 = vrot.slane %v490_v52, 2 }
 0x194   :  { %v479_v17 = vadd.f32 %v471_v63, %v404_v7  ;;  %v390_v1 = vperm.slane %v382_v50, 0 }
 0x196   :  { %v507_v30 = vrot.slane %v479_v17, 4  ;;  %v406_v14 = vadd.f32 %v390_v1, %v162_v56 }
 0x198   :  { %v508_v53 = vmax.f32 %v479_v17, %v507_v30  ;;  %v492_v17 = vmax.f32 %v490_v52, %v491_v2 }
 0x199   :  { %v463_v60 = vpop.permute.xlu2 %462 }
 0x19a   :  { %v474_v8 = vmul.f32 %v6348_v54, %v463_v60  ;;  %v493_v56 = vrot.slane %v492_v17, 1 }
 0x19c   :  { %v482_v22 = vadd.f32 %v474_v8, %v407_v18 }
 0x19e   :  { %v525_v35 = vrot.slane %v482_v22, 4 }
 0x1a0   :  { %v526_v60 = vmax.f32 %v482_v22, %v525_v35 }
 0x1a1   :  { %v428_v3 = vpop.permute.xlu0 %427 }
 0x1a2   :  { %v469_v57 = vmul.f32 %v6348_v54, %v428_v3  ;;  %v414_v9 = vpop.permute.xlu1 %413  ;;  %v509_v3 = vrot.slane %v508_v53, 2  ;;  %v527_v8 = vrot.slane %v526_v60, 2 }
 0x1a3   :  { %v467_v13 = vmul.f32 %v6348_v54, %v414_v9 }
 0x1a4   :  { %v477_v23 = vadd.f32 %v469_v57, %v402_v20  ;;  %v510_v18 = vmax.f32 %v508_v53, %v509_v3  ;;  %v528_v27 = vmax.f32 %v526_v60, %v527_v8  ;;  %v1578_v60 = vrot.slane %v6271_v37, 3 }
 0x1a5   :  { %v475_v21 = vadd.f32 %v467_v13, %v400_v12  ;;  %v1577_v13 = vrot.slane %v6271_v37, 2 }
 0x1a6   :  { %v495_v36 = vrot.slane %v477_v23, 4 }
 0x1a7   :  { %v483_v33 = vrot.slane %v475_v21, 4 }
 0x1a8   :  { %v496_v61 = vmax.f32 %v477_v23, %v495_v36  ;;  %v511_v36 = vrot.slane %v510_v18, 1 }
 0x1a9   :  { %v449_v34 = vpop.permute.xlu0 %448  ;;  %v484_v55 = vmax.f32 %v475_v21, %v483_v33  ;;  %v6371_v33 = vadd.f32 %v6207_v59, %v6236_v10  ;;  %v6378_v59 = vmax.f32 %v492_v17, %v493_v56  ;;  %v1586_v56 = vperm.slane %v1578_v60, 0 }
 0x1aa   :  { %v472_v44 = vmul.f32 %v6348_v54, %v449_v34  ;;  %v435_v45 = vpop.permute.xlu1 %434  ;;  %v497_v57 = vrot.slane %v496_v61, 2  ;;  %v1585_v34 = vperm.slane %v1577_v13, 0  ;;  %v6380_v10 = vmax.f32 %v510_v18, %v511_v36 }
 0x1ab   :  { %v470_v49 = vmul.f32 %v6348_v54, %v435_v45  ;;  %v485_v5 = vrot.slane %v484_v55, 2 }
 0x1ac   :  { %v480_v51 = vadd.f32 %v472_v44, %v405_v42  ;;  %v1627_v58 = vpop.permute.xlu2 %1626  ;;  %v498_v28 = vmax.f32 %v496_v61, %v497_v57  ;;  %v1601_v52 = vadd.f32 %v1585_v34, %v6371_v33 }
 0x1ad   :  { %v478_v19 = vadd.f32 %v470_v49, %v403_v46  ;;  %v486_v21 = vmax.f32 %v484_v55, %v485_v5  ;;  %v529_v46 = vrot.slane %v528_v27, 1  ;;  %v1576_v55 = vrot.slane %v6271_v37, 1 }
 0x1ae   :  { %v513_v62 = vrot.slane %v480_v51, 4  ;;  %v499_v49 = vrot.slane %v498_v28, 1 }
 0x1af   :  { %v501_v63 = vrot.slane %v478_v19, 4  ;;  %v487_v42 = vrot.slane %v486_v21, 1  ;;  %v6389_v3 = vmax.f32 %v528_v27, %v529_v46  ;;  %v1584_v13 = vperm.slane %v1576_v55, 0 }
 0x1b0   :  { %v514_v4 = vmax.f32 %v480_v51, %v513_v62  ;;  %v1580_v51 = vrot.slane %v6271_v37, 5 }
 0x1b1   :  { %v502_v7 = vmax.f32 %v478_v19, %v501_v63  ;;  %v1579_v19 = vrot.slane %v6271_v37, 4  ;;  %v6384_v61 = vmax.f32 %v486_v21, %v487_v42  ;;  %v1665_v63 = vmul.f32 %v6348_v54, %v1627_v58 }
 0x1b2   :  { %v515_v9 = vrot.slane %v514_v4, 2  ;;  %v456_v29 = vpop.permute.xlu1 %455  ;;  %v1588_v57 = vperm.slane %v1580_v51, 0  ;;  %v535_v21 = vsub.f32 0.0, %v6380_v10 }
 0x1b3   :  { %v503_v12 = vrot.slane %v502_v7, 2  ;;  %v473_v16 = vmul.f32 %v6348_v54, %v456_v29  ;;  %v1581_v29 = vrot.slane %v6271_v37, 6  ;;  %v1673_v18 = vadd.f32 %v1665_v63, %v1601_v52 }
 0x1b4   :  { %v516_v20 = vmax.f32 %v514_v4, %v515_v9  ;;  %v6367_v24 = vpop.permute.xlu2 %1647  ;;  %v6391_v4 = vmax.f32 %v498_v28, %v499_v49  ;;  %v1582_v9 = vrot.slane %v6271_v37, 7  ;;  %v1604_v63 = vadd.f32 %v1588_v57, %v6371_v33 }
 0x1b5   :  { %v504_v22 = vmax.f32 %v502_v7, %v503_v12  ;;  %v481_v23 = vadd.f32 %v473_v16, %v406_v14  ;;  %v532_v12 = vsub.f32 0.0, %v6378_v59  ;;  %v1583_v14 = vperm.slane %v6271_v37, 0 }
 0x1b6   :  { %v517_v30 = vrot.slane %v516_v20, 1  ;;  %v531_v16 = vsub.f32 0.0, %v6384_v61  ;;  %v1590_v36 = vperm.slane %v1582_v9, 0  ;;  %v1589_v42 = vperm.slane %v1581_v29, 0 }
 0x1b7   :  { %v519_v35 = vrot.slane %v481_v23, 4  ;;  %v505_v44 = vrot.slane %v504_v22, 1  ;;  %v1691_v46 = vrot.slane %v1673_v18, 4  ;;  %v1668_v51 = vmul.f32 %v6348_v54, %v6367_v24 }
 0x1b8   :  { %v6373_v50 = vmax.f32 %v516_v20, %v517_v30  ;;  %v6428_v24 = vadd.f32 %v1590_v36, %v6371_v33 }
 0x1b9   :  { %v520_v45 = vmax.f32 %v481_v23, %v519_v35  ;;  %v6386_v62 = vmax.f32 %v504_v22, %v505_v44  ;;  %v538_v22 = vsub.f32 0.0, %v6389_v3  ;;  %v533_v23 = vsub.f32 0.0, %v6391_v4 }
 0x1ba   :  { %v536_v5 = vsub.f32 0.0, %v6373_v50  ;;  %v1587_v35 = vperm.slane %v1579_v19, 0  ;;  %v539_v44 = vmax.f32 %v531_v16, %v535_v21  ;;  %v6425_v9 = vmax.f32 %v1673_v18, %v1691_v46 }
 0x1bb   :  { %v521_v53 = vrot.slane %v520_v45, 2  ;;  %v534_v17 = vsub.f32 0.0, %v6386_v62 }
 0x1bc   :  { %v2412_v2 = vpop.permute.xlu2 %2411  ;;  %v540_v27 = vmax.f32 %v532_v12, %v536_v5 }
 0x1bd   :  { %v522_v1 = vmax.f32 %v520_v45, %v521_v53  ;;  %v2456_v7 = vmul.f32 %v6348_v54, %v2412_v2  ;;  %v542_v45 = vmax.f32 %v534_v17, %v538_v22  ;;  %v4705_v53 = vld [vmem:[%s7880_s27 + $0x10] sm:$0xf]  ;;  %v1599_v2 = vadd.f32 %v1583_v14, %v6371_v33 }
 0x1be   :  { %1965 = vmatpush.bf16.xpose.msrb.mxu3 %v4705_v53  ;;  %v543_v19 = vmax.f32 %v539_v44, %v540_v27  ;;  %v6433_v27 = vadd.f32 %v1668_v51, %v1604_v63 }
 0x1bf   :  { %v523_v8 = vrot.slane %v522_v1, 1  ;;  %v6399_v58 = vadd.f32 %v2456_v7, %v6314_v25  ;;  %v1603_v7 = vadd.f32 %v1587_v35, %v6371_v33 }
 0x1c1   :  { %7885 = vst [vmem:[#allocation9_spill] sm:$0xff] %v6399_v58  ;;  %v6404_v20 = vmax.f32 %v522_v1, %v523_v8  ;;  %v1600_v1 = vadd.f32 %v1584_v13, %v6371_v33  ;;  %v1602_v8 = vadd.f32 %v1586_v56, %v6371_v33 }
 0x1c2   :  { %v6409_v28 = vpop.f32.mrf.mxu2 }
 0x1c3   :  { %v537_v25 = vsub.f32 0.0, %v6404_v20  ;;  %v814_v37 = vperm.slane %v6409_v28, 0  ;;  %v842_v30 = vperm.slane %v6409_v28, 4  ;;  %v828_v34 = vperm.slane %v6409_v28, 2 }
 0x1c4   :  { %v1620_v52 = vpop.permute.xlu1 %1619  ;;  %v821_v14 = vperm.slane %v6409_v28, 1 }
 0x1c5   :  { %v541_v49 = vmax.f32 %v533_v23, %v537_v25  ;;  %819 = vperm.xlu0 %5792, %v814_v37   ;;  %847 = vperm.xlu2 %5791, %v842_v30   ;;  %v1613_v55 = vpop.permute.xlu0 %1612  ;;  %v6431_v37 = vadd.f32 %v1589_v42, %v6371_v33  ;;  %v1664_v57 = vmul.f32 %v6348_v54, %v1620_v52  ;;  %v849_v30 = vperm.slane %v6409_v28, 5  ;;  %v2433_v52 = vpop.permute.xlu2 %2432 }
 0x1c6   :  { %833 = vperm.xlu1 %5790, %v828_v34   ;;  %v1663_v36 = vmul.f32 %v6348_v54, %v1613_v55  ;;  %v835_v33 = vperm.slane %v6409_v28, 3 }
 0x1c7   :  { %v544_v60 = vmax.f32 %v541_v49, %v542_v45 }
 0x1c8   :  { %v1671_v55 = vadd.f32 %v1663_v36, %v1599_v2 }
 0x1c9   :  { %v545_v29 = vmax.f32 %v543_v19, %v544_v60  ;;  %v2459_v60 = vmul.f32 %v6348_v54, %v2433_v52 }
 0x1ca   :  { %v780_v13 = vpop.f32.mrf.mxu2 }
 0x1cb   :  { %v546_v34 = vsub.f32 %v531_v16, %v545_v29  ;;  %v547_v35 = vsub.f32 %v532_v12, %v545_v29  ;;  %v548_v18 = vsub.f32 %v533_v23, %v545_v29  ;;  %v549_v56 = vsub.f32 %v534_v17, %v545_v29 }
 0x1cc   :  { %v550_v44 = vsub.f32 %v535_v21, %v545_v29  ;;  %v551_v45 = vsub.f32 %v536_v5, %v545_v29  ;;  %v552_v42 = vsub.f32 %v537_v25, %v545_v29  ;;  %v1641_v51 = vpop.permute.xlu1 %1640  ;;  %v553_v19 = vsub.f32 %v538_v22, %v545_v29 }
 0x1cd   :  { %v554_v46 = vmul.f32 1.442695, %v546_v34  ;;  %v556_v49 = vmul.f32 1.442695, %v547_v35  ;;  %v558_v53 = vmul.f32 1.442695, %v548_v18  ;;  %826 = vperm.xlu0 %5792, %v821_v14   ;;  %854 = vperm.xlu2 %5791, %v849_v30   ;;  %v1672_v12 = vadd.f32 %v1664_v57, %v1600_v1  ;;  %v1634_v23 = vpop.permute.xlu0 %1633 }
 0x1ce   :  { %v560_v16 = vmul.f32 1.442695, %v549_v56  ;;  %840 = vperm.xlu1 %5790, %v835_v33   ;;  %v1693_v5 = vrot.slane %v6425_v9, 2  ;;  %v562_v17 = vmul.f32 1.442695, %v550_v44  ;;  %v1709_v21 = vrot.slane %v6433_v27, 4 }
 0x1cf   :  { %5798 = vpow2.f32 %v554_v46  ;;  %v564_v25 = vmul.f32 1.442695, %v551_v45  ;;  %v566_v63 = vmul.f32 1.442695, %v552_v42  ;;  %v1667_v22 = vmul.f32 %v6348_v54, %v1641_v51 }
 0x1d0   :  { %5800 = vpow2.f32 %v556_v49  ;;  %v1666_v1 = vmul.f32 %v6348_v54, %v1634_v23  ;;  %v568_v29 = vmul.f32 1.442695, %v553_v19  ;;  %v1685_v57 = vrot.slane %v1672_v12, 4 }
 0x1d1   :  { %5802 = vpow2.f32 %v558_v53  ;;  %v856_v14 = vperm.slane %v6409_v28, 6  ;;  %v1675_v30 = vadd.f32 %v1667_v22, %v1603_v7  ;;  %v1679_v35 = vrot.slane %v1671_v55, 4 }
 0x1d2   :  { %5804 = vpow2.f32 %v560_v16  ;;  %v6445_v13 = vpop.f32.mrf.mxu2  ;;  %v1674_v34 = vadd.f32 %v1666_v1, %v1602_v8  ;;  %v2467_v18 = vadd.f32 %v2459_v60, %v6317_v26  ;;  %v863_v56 = vperm.slane %v6409_v28, 7 }
 0x1d3   :  { %5806 = vpow2.f32 %v562_v17  ;;  %v1211_v2 = vperm.slane %v6445_v13, 0  ;;  %v1703_v45 = vrot.slane %v1675_v30, 4  ;;  %v1710_v7 = vmax.f32 %v6433_v27, %v1709_v21 }
 0x1d4   :  { %5808 = vpow2.f32 %v564_v25  ;;  %v1697_v36 = vrot.slane %v1674_v34, 4  ;;  %v1662_v33 = vpop.permute.xlu1 %1661  ;;  %v1686_v8 = vmax.f32 %v1672_v12, %v1685_v57  ;;  %v6462_v53 = vmax.f32 %v6425_v9, %v1693_v5 }
 0x1d5   :  { %v6451_v44 = vpop.eup %5798  ;;  %5810 = vpow2.f32 %v566_v63  ;;  %861 = vperm.xlu0 %5792, %v856_v14   ;;  %1216 = vperm.xlu2 %5791, %v1211_v2   ;;  %v1704_v46 = vmax.f32 %v1675_v30, %v1703_v45  ;;  %v1680_v51 = vmax.f32 %v1671_v55, %v1679_v35  ;;  %v2495_v19 = vrot.slane %v2467_v18, 4  ;;  %v1655_v57 = vpop.permute.xlu0 %1654 }
 0x1d6   :  { %v6453_v42 = vpop.eup %5800  ;;  %5812 = vpow2.f32 %v568_v29  ;;  %868 = vperm.xlu1 %5790, %v863_v56   ;;  %v1698_v23 = vmax.f32 %v1674_v34, %v1697_v36  ;;  %v1670_v17 = vmul.f32 %v6348_v54, %v1662_v33  ;;  %v1711_v5 = vrot.slane %v1710_v7, 2 }
 0x1d7   :  { %v6456_v26 = vpop.eup %5802  ;;  %v578_v28 = vrot.slane %v6453_v42, 7  ;;  %v1687_v60 = vrot.slane %v1686_v8, 2  ;;  %v1705_v29 = vrot.slane %v1704_v46, 2  ;;  %v1218_v14 = vperm.slane %v6445_v13, 1 }
 0x1d8   :  { %v6459_v49 = vpop.eup %5804  ;;  %v581_v52 = vrot.slane %v6456_v26, 6  ;;  %v1681_v35 = vrot.slane %v1680_v51, 2  ;;  %v2496_v56 = vmax.f32 %v2467_v18, %v2495_v19  ;;  %v1699_v33 = vrot.slane %v1698_v23, 2 }
 0x1d9   :  { %v6465_v16 = vpop.eup %5806  ;;  %v580_v27 = vsel %vm579_vm0, %v578_v28, %v6451_v44  ;;  %v584_v12 = vrot.slane %v6459_v49, 5  ;;  %v1678_v28 = vadd.f32 %v1670_v17, %v6428_v24  ;;  %v1706_v19 = vmax.f32 %v1704_v46, %v1705_v29 }
 0x1da   :  { %v6471_v21 = vpop.eup %5808  ;;  %v583_v25 = vsel %vm582_vm1, %v581_v52, %v580_v27  ;;  %v587_v9 = vrot.slane %v6465_v16, 4  ;;  %v1177_v55 = vpop.f32.mrf.mxu2  ;;  %v1688_v27 = vmax.f32 %v1686_v8, %v1687_v60  ;;  %v1225_v24 = vperm.slane %v6445_v13, 2 }
 0x1db   :  { %v6475_v63 = vpop.eup %5810  ;;  %v586_v22 = vsel %vm585_vm2, %v584_v12, %v583_v25  ;;  %v590_v1 = vrot.slane %v6471_v21, 3  ;;  %v1669_v12 = vmul.f32 %v6348_v54, %v1655_v57  ;;  %v1232_v25 = vperm.slane %v6445_v13, 3 }
 0x1dc   :  { %v6480_v30 = vpop.eup %5812  ;;  %v589_v34 = vsel %vm588_vm3, %v587_v9, %v586_v22  ;;  %v593_v2 = vrot.slane %v6475_v63, 2  ;;  %v2405_v9 = vpop.permute.xlu1 %2404  ;;  %v1695_v55 = vrot.slane %v6462_v53, 1  ;;  %v1721_v22 = vrot.slane %v1678_v28, 4 }
 0x1dd   :  { %v592_v45 = vsel %vm591_vm4, %v590_v1, %v589_v34  ;;  %v596_v36 = vrot.slane %v6480_v30, 1  ;;  %1223 = vperm.xlu0 %5792, %v1218_v14   ;;  %v2497_v34 = vrot.slane %v2496_v56, 2  ;;  %v1677_v48 = vadd.f32 %v1669_v12, %v6431_v37  ;;  %1237 = vperm.xlu2 %5791, %v1232_v25  }
 0x1de   :  { %v595_v52 = vsel %vm594_vm5, %v593_v2, %v592_v45  ;;  %v1682_v17 = vmax.f32 %v1680_v51, %v1681_v35  ;;  %v1700_v8 = vmax.f32 %v1698_v23, %v1699_v33  ;;  %v1722_v60 = vmax.f32 %v1678_v28, %v1721_v22  ;;  %1230 = vperm.xlu1 %5790, %v1225_v24  }
 0x1df   :  { %v598_v18 = vsel %vm597_vm6, %v596_v36, %v595_v52  ;;  %v2455_v57 = vmul.f32 %v6348_v54, %v2405_v9  ;;  %v1712_v2 = vmax.f32 %v1710_v7, %v1711_v5  ;;  %v1689_v45 = vrot.slane %v1688_v27, 1 }
 0x1e0   :  { %v600_v1 = vrot.slane %v598_v18, 4  ;;  %v1715_v47 = vrot.slane %v1677_v48, 4  ;;  %v1707_v46 = vrot.slane %v1706_v19, 1  ;;  %v1723_v29 = vrot.slane %v1722_v60, 2 }
 0x1e1   :  { %v2463_v52 = vadd.f32 %v2455_v57, %v6327_v39  ;;  %v1239_v37 = vperm.slane %v6445_v13, 4  ;;  %v2498_v25 = vmax.f32 %v2496_v56, %v2497_v34  ;;  %v1683_v23 = vrot.slane %v1682_v17, 1 }
 0x1e2   :  { %v601_v14 = vadd.f32 %v600_v1, %v598_v18  ;;  %v1953_v36 = vpop.f32.mrf.mxu2  ;;  %v1716_v58 = vmax.f32 %v1677_v48, %v1715_v47  ;;  %v1701_v35 = vrot.slane %v1700_v8, 1  ;;  %v1724_v33 = vmax.f32 %v1722_v60, %v1723_v29 }
 0x1e3   :  { %v1957_v51 = vpack.c.bf16 %v1953_v36, %v1953_v36  ;;  %v2471_v28 = vrot.slane %v2463_v52, 4  ;;  %v1713_v5 = vrot.slane %v1712_v2, 1  ;;  %v1253_v18 = vperm.slane %v6445_v13, 6 }
 0x1e4   :  { %v602_v12 = vrot.slane %v601_v14, 2  ;;  %v1717_v9 = vrot.slane %v1716_v58, 2  ;;  %v6498_v22 = vmax.f32 %v1688_v27, %v1689_v45  ;;  %v6500_v39 = vmax.f32 %v1706_v19, %v1707_v46 }
 0x1e5   :  { %1244 = vperm.xlu0 %5792, %v1239_v37   ;;  %1966 = vmatmul.bf16.vlgmr.msrb.gmra.mxu3 %v1957_v51  ;;  %v1725_v1 = vrot.slane %v1724_v33, 1  ;;  %v2472_v24 = vmax.f32 %v2463_v52, %v2471_v28  ;;  %v2499_v47 = vrot.slane %v2498_v25, 1  ;;  %v1246_v34 = vperm.slane %v6445_v13, 5 }
 0x1e6   :  { %v603_v7 = vadd.f32 %v602_v12, %v601_v14  ;;  %v1718_v48 = vmax.f32 %v1716_v58, %v1717_v9  ;;  %1258 = vperm.xlu2 %5791, %v1253_v18   ;;  %v6503_v60 = vmax.f32 %v1682_v17, %v1683_v23  ;;  %v6505_v57 = vmax.f32 %v1700_v8, %v1701_v35 }
 0x1e7   :  { %v6507_v14 = vmax.f32 %v1724_v33, %v1725_v1  ;;  %v2473_v36 = vrot.slane %v2472_v24, 2  ;;  %v6510_v27 = vmax.f32 %v6462_v53, %v1695_v55  ;;  %v6512_v45 = vmax.f32 %v1712_v2, %v1713_v5  ;;  %1251 = vperm.xlu1 %5790, %v1246_v34  }
 0x1e8   :  { %v604_v56 = vrot.slane %v603_v7, 1  ;;  %v1719_v46 = vrot.slane %v1718_v48, 1  ;;  %v1731_v58 = vsub.f32 0.0, %v6500_v39  ;;  %v1260_v8 = vperm.slane %v6445_v13, 7 }
 0x1e9   :  { %v1734_v52 = vsub.f32 0.0, %v6507_v14  ;;  %v2474_v17 = vmax.f32 %v2472_v24, %v2473_v36  ;;  %v1728_v12 = vsub.f32 0.0, %v6498_v22  ;;  %v1727_v53 = vsub.f32 0.0, %v6503_v60 }
 0x1ea   :  { %v605_v19 = vadd.f32 %v604_v56, %v603_v7  ;;  %v1955_v29 = vpop.f32.mrf.mxu2  ;;  %v6518_v51 = vmax.f32 %v1718_v48, %v1719_v46  ;;  %v6521_v55 = vmax.f32 %v2498_v25, %v2499_v47  ;;  %v1730_v2 = vsub.f32 0.0, %v6505_v57 }
 0x1eb   :  { %v2475_v23 = vrot.slane %v2474_v17, 1  ;;  %v1729_v35 = vsub.f32 0.0, %v6510_v27  ;;  %v1732_v33 = vsub.f32 0.0, %v6512_v45  ;;  %v1735_v28 = vmax.f32 %v1727_v53, %v1731_v58 }
 0x1ec   :  { %v606_v37 = vperm.slane %v605_v19, 0  ;;  %7886 = vst [vmem:[#allocation10_spill] sm:$0xff] %v6521_v55  ;;  %v1738_v13 = vmax.f32 %v1730_v2, %v1734_v52  ;;  %v1733_v7 = vsub.f32 0.0, %v6518_v51  ;;  %v7877_v18 = vsub.f32 0.0, %v6521_v55 }
 0x1ed   :  { %1265 = vperm.xlu0 %5792, %v1260_v8   ;;  %v6527_v5 = vmax.f32 %v2474_v17, %v2475_v23  ;;  %v1736_v9 = vmax.f32 %v1728_v12, %v1732_v33 }
 0x1ee   :  { %5814 = vrcp.f32 %v606_v37  ;;  %v1737_v25 = vmax.f32 %v1729_v35, %v1733_v7  ;;  %v616_v19 = vand.u32 2147483647, %v606_v37  ;;  %v618_v23 = vand.u32 2147483648, %v606_v37 }
 0x1ef   :  { %7887 = vst [vmem:[#allocation11_spill] sm:$0xff] %v6527_v5  ;;  %v7878_v1 = vsub.f32 0.0, %v6527_v5  ;;  %v1739_v24 = vmax.f32 %v1735_v28, %v1736_v9  ;;  %vm612_vm8 = vweird.f32 %v606_v37 }
 0x1f0   :  { %v1740_v56 = vmax.f32 %v1737_v25, %v1738_v13  ;;  %vm617_vm10 = vcmp.eq.f32.partialorder %v616_v19, 8.507059e+37 }
 0x1f1   :  { %v6535_v47 = vmax.f32 %v7878_v1, %v7877_v18 }
 0x1f2   :  { %v1741_v36 = vmax.f32 %v1739_v24, %v1740_v56 }
 0x1f3   :  { %7888 = vst [vmem:[#allocation12_spill] sm:$0xff] %v6535_v47 }
 0x1f4   :  { %v5815_v48 = vpop.eup %5814  ;;  %v1742_v29 = vsub.f32 %v1727_v53, %v1741_v36  ;;  %v1743_v17 = vsub.f32 %v1728_v12, %v1741_v36  ;;  %v1744_v8 = vsub.f32 %v1729_v35, %v1741_v36  ;;  %v1745_v41 = vsub.f32 %v1730_v2, %v1741_v36  ;;  %v6540_v12 = vld [vmem:[%s7855_s1] sm:$0xf] }
 0x1f5   :  { %v608_v34 = vmul.f32 %v5815_v48, %v606_v37  ;;  %vm613_vm7 = vweird.f32 %v5815_v48  ;;  %v1746_v40 = vsub.f32 %v1731_v58, %v1741_v36  ;;  %v1747_v13 = vsub.f32 %v1732_v33, %v1741_v36 }
 0x1f6   :  { %v1750_v9 = vmul.f32 1.442695, %v1742_v29  ;;  %v1752_v25 = vmul.f32 1.442695, %v1743_v17  ;;  %v1748_v55 = vsub.f32 %v1733_v7, %v1741_v36  ;;  %v1749_v5 = vsub.f32 %v1734_v52, %v1741_v36  ;;  %vm614_vm9 = vmor %vm612_vm8, %vm613_vm7 }
 0x1f7   :  { %v609_v46 = vsub.f32 1.0, %v608_v34  ;;  %v1754_v18 = vmul.f32 1.442695, %v1744_v8  ;;  %v1756_v1 = vmul.f32 1.442695, %v1745_v41  ;;  %v661_v53 = vunpack.c.l.bf16 %v6540_v12 }
 0x1f8   :  { %5816 = vpow2.f32 %v1750_v9  ;;  %v619_v58 = vor.u32 1.1754944e-38, %v618_v23  ;;  %v1758_v52 = vmul.f32 1.442695, %v1746_v40  ;;  %v1760_v35 = vmul.f32 1.442695, %v1747_v13 }
 0x1f9   :  { %v610_v28 = vmul.f32 %v5815_v48, %v609_v46  ;;  %5818 = vpow2.f32 %v1752_v25  ;;  %v1762_v37 = vmul.f32 1.442695, %v1748_v55  ;;  %v1764_v33 = vmul.f32 1.442695, %v1749_v5 }
 0x1fa   :  { %5820 = vpow2.f32 %v1754_v18 }
 0x1fb   :  { %v611_v47 = vadd.f32 %v5815_v48, %v610_v28  ;;  %5822 = vpow2.f32 %v1756_v1 }
 0x1fc   :  { %5824 = vpow2.f32 %v1758_v52 }
 0x1fd   :  { %v615_v2 = vsel %vm614_vm9, %v5815_v48, %v611_v47  ;;  %5826 = vpow2.f32 %v1760_v35 }
 0x1fe   :  { %v620_v41 = vsel %vm617_vm10, %v619_v58, %v615_v2  ;;  %v6552_v47 = vpop.eup %5816  ;;  %5828 = vpow2.f32 %v1762_v37  ;;  %vm3335_vm10 = vcmask 1040384  }
 0x1ff   :  { %v621_v7 = vmul.f32 %v6451_v44, %v620_v41  ;;  %v622_v24 = vmul.f32 %v6453_v42, %v620_v41  ;;  %v623_v56 = vmul.f32 %v6456_v26, %v620_v41  ;;  %v624_v34 = vmul.f32 %v6459_v49, %v620_v41  ;;  %v6558_v5 = vpop.eup %5818 }
 0x200   :  { %v625_v36 = vmul.f32 %v6465_v16, %v620_v41  ;;  %v626_v19 = vmul.f32 %v6471_v21, %v620_v41  ;;  %v627_v18 = vmul.f32 %v6475_v63, %v620_v41  ;;  %v628_v40 = vmul.f32 %v6480_v30, %v620_v41  ;;  %v6564_v30 = vpop.eup %5820 }
 0x201   :  { %v629_v55 = vmul.f32 %v621_v7, %v6384_v61  ;;  %v630_v44 = vmul.f32 %v622_v24, %v6378_v59  ;;  %v631_v42 = vmul.f32 %v623_v56, %v6391_v4  ;;  %v632_v26 = vmul.f32 %v624_v34, %v6386_v62  ;;  %v6566_v46 = vpop.eup %5822 }
 0x202   :  { %v633_v49 = vmul.f32 %v625_v36, %v6380_v10  ;;  %v634_v16 = vmul.f32 %v626_v19, %v6373_v50  ;;  %v635_v21 = vmul.f32 %v627_v18, %v6404_v20  ;;  %v636_v63 = vmul.f32 %v628_v40, %v6389_v3 }
 0x203   :  { %v645_v1 = vrot.slane %v630_v44, 7  ;;  %v647_v61 = vrot.slane %v631_v42, 6  ;;  %v649_v48 = vrot.slane %v632_v26, 5  ;;  %v670_v59 = vrot.slane %v622_v24, 7  ;;  %v6588_v44 = vpop.eup %5824 }
 0x204   :  { %v651_v4 = vrot.slane %v633_v49, 4  ;;  %v653_v62 = vrot.slane %v634_v16, 3  ;;  %v655_v29 = vrot.slane %v635_v21, 2  ;;  %v657_v17 = vrot.slane %v636_v63, 1  ;;  %v6595_v26 = vpop.eup %5826 }
 0x205   :  { %v646_v10 = vsel %vm579_vm0, %v645_v1, %v629_v55  ;;  %v671_v50 = vsel %vm579_vm0, %v670_v59, %v621_v7  ;;  %v672_v8 = vrot.slane %v623_v56, 6  ;;  %v674_v20 = vrot.slane %v624_v34, 5  ;;  %v6598_v16 = vpop.eup %5828 }
 0x206   :  { %v648_v3 = vsel %vm582_vm1, %v647_v61, %v646_v10  ;;  %v676_v23 = vrot.slane %v625_v36, 4  ;;  %v678_v28 = vrot.slane %v626_v19, 3  ;;  %v680_v13 = vrot.slane %v627_v18, 2 }
 0x207   :  { %v650_v9 = vsel %vm585_vm2, %v649_v48, %v648_v3  ;;  %v673_v25 = vsel %vm582_vm1, %v672_v8, %v671_v50  ;;  %v682_v58 = vrot.slane %v628_v40, 1  ;;  %v1774_v7 = vrot.slane %v6558_v5, 7 }
 0x208   :  { %v652_v2 = vsel %vm588_vm3, %v651_v4, %v650_v9  ;;  %v675_v41 = vsel %vm585_vm2, %v674_v20, %v673_v25  ;;  %v1776_v34 = vrot.slane %v6564_v30, 6  ;;  %5830 = vpow2.f32 %v1764_v33 }
 0x209   :  { %v654_v24 = vsel %vm591_vm4, %v653_v62, %v652_v2  ;;  %v677_v56 = vsel %vm588_vm3, %v676_v23, %v675_v41  ;;  %v1775_v52 = vsel %vm579_vm0, %v1774_v7, %v6552_v47  ;;  %v1778_v55 = vrot.slane %v6566_v46, 5 }
 0x20a   :  { %v656_v36 = vsel %vm594_vm5, %v655_v29, %v654_v24  ;;  %v679_v19 = vsel %vm591_vm4, %v678_v28, %v677_v56  ;;  %v1777_v40 = vsel %vm582_vm1, %v1776_v34, %v1775_v52  ;;  %v1780_v49 = vrot.slane %v6588_v44, 4 }
 0x20b   :  { %v658_v18 = vsel %vm597_vm6, %v657_v17, %v656_v36  ;;  %v681_v35 = vsel %vm594_vm5, %v680_v13, %v679_v19  ;;  %v1779_v33 = vsel %vm585_vm2, %v1778_v55, %v1777_v40  ;;  %v1782_v21 = vrot.slane %v6595_v26, 3 }
 0x20c   :  { %660 = vst [vmem:[#allocation2] sm:$0xff] %v658_v18  ;;  %v683_v37 = vsel %vm597_vm6, %v682_v58, %v681_v35  ;;  %v1781_v1 = vsel %vm588_vm3, %v1780_v49, %v1779_v33  ;;  %v1784_v61 = vrot.slane %v6598_v16, 2  ;;  %v786_v3 = vrot.slane %v6267_v31, 4 }
 0x20d   :  { %v6592_v42 = vmul.f32 %v683_v37, %v661_v53  ;;  %v1783_v12 = vsel %vm591_vm4, %v1782_v21, %v1781_v1  ;;  %v787_v28 = vrot.slane %v6267_v31, 5  ;;  %v784_v25 = vrot.slane %v6267_v31, 2  ;;  %v6623_v21 = vld [vmem:[%s7855_s1 + $0xc] sm:$0xf] }
 0x20e   :  { %v6601_v63 = vpop.eup %5830  ;;  %v1785_v48 = vsel %vm594_vm5, %v1784_v61, %v1783_v12  ;;  %v794_v23 = vperm.slane %v786_v3, 0  ;;  %v783_v2 = vrot.slane %v6267_v31, 1  ;;  %v790_v34 = vperm.slane %v6267_v31, 0  ;;  %v6626_v12 = vpop.permute.xlu0 %2418 }
 0x20f   :  { %v1786_v53 = vrot.slane %v6601_v63, 1  ;;  %v795_v24 = vperm.slane %v787_v28, 0  ;;  %v785_v19 = vrot.slane %v6267_v31, 3  ;;  %v788_v52 = vrot.slane %v6267_v31, 6 }
 0x210   :  { %v810_v7 = vadd.f32 %v794_v23, %v6213_v0  ;;  %v789_v18 = vrot.slane %v6267_v31, 7  ;;  %v792_v55 = vperm.slane %v784_v25, 0  ;;  %v791_v49 = vperm.slane %v783_v2, 0 }
 0x211   :  { %v1787_v59 = vsel %vm597_vm6, %v1786_v53, %v1785_v48  ;;  %v1851_v1 = vunpack.c.l.bf16 %v6623_v21  ;;  %v811_v31 = vadd.f32 %v795_v24, %v6213_v0  ;;  %v6629_v48 = vpop.permute.xlu1 %2425 }
 0x212   :  { %v1789_v4 = vrot.slane %v1787_v59, 4 }
 0x214   :  { %v1790_v62 = vadd.f32 %v1789_v4, %v1787_v59  ;;  %v793_v59 = vperm.slane %v785_v19, 0  ;;  %v796_v4 = vperm.slane %v788_v52, 0 }
 0x216   :  { %v1791_v29 = vrot.slane %v1790_v62, 2 }
 0x218   :  { %v1792_v17 = vadd.f32 %v1791_v29, %v1790_v62  ;;  %v6633_v29 = vadd.f32 %v792_v55, %v6213_v0 }
 0x21a   :  { %v1793_v10 = vrot.slane %v1792_v17, 1 }
 0x21c   :  { %v1794_v50 = vadd.f32 %v1793_v10, %v1792_v17  ;;  %v797_v17 = vperm.slane %v789_v18, 0 }
 0x21e   :  { %v1795_v8 = vperm.slane %v1794_v50, 0 }
 0x21f   :  { %v848_v20 = vpop.permute.xlu2 %847 }
 0x220   :  { %5832 = vrcp.f32 %v1795_v8  ;;  %v874_v58 = vmul.f32 %v6348_v54, %v848_v20  ;;  %v1807_v36 = vand.u32 2147483648, %v1795_v8  ;;  %v1805_v40 = vand.u32 2147483647, %v1795_v8 }
 0x221   :  { %vm1801_vm12 = vweird.f32 %v1795_v8  ;;  %v6638_v20 = vadd.f32 %v791_v49, %v6213_v0 }
 0x222   :  { %v882_v37 = vadd.f32 %v874_v58, %v810_v7  ;;  %v1808_v53 = vor.u32 1.1754944e-38, %v1807_v36  ;;  %vm1806_vm14 = vcmp.eq.f32.partialorder %v1805_v40, 8.507059e+37 }
 0x224   :  { %v910_v50 = vrot.slane %v882_v37, 4 }
 0x226   :  { %v5833_v13 = vpop.eup %5832 }
 0x227   :  { %v1797_v9 = vmul.f32 %v5833_v13, %v1795_v8  ;;  %v855_v56 = vpop.permute.xlu2 %854  ;;  %vm1802_vm11 = vweird.f32 %v5833_v13 }
 0x228   :  { %v875_v33 = vmul.f32 %v6348_v54, %v855_v56  ;;  %vm1803_vm13 = vmor %vm1801_vm12, %vm1802_vm11  ;;  %v806_v54 = vadd.f32 %v790_v34, %v6213_v0  ;;  %v911_v34 = vmax.f32 %v882_v37, %v910_v50 }
 0x229   :  { %v1798_v41 = vsub.f32 1.0, %v1797_v9 }
 0x22a   :  { %v6635_v8 = vadd.f32 %v875_v33, %v811_v31 }
 0x22b   :  { %v1799_v35 = vmul.f32 %v5833_v13, %v1798_v41 }
 0x22d   :  { %v1800_v61 = vadd.f32 %v5833_v13, %v1799_v35 }
 0x22f   :  { %v1804_v62 = vsel %vm1803_vm13, %v5833_v13, %v1800_v61  ;;  %v1217_v24 = vpop.permute.xlu2 %1216 }
 0x230   :  { %v1809_v10 = vsel %vm1806_vm14, %v1808_v53, %v1804_v62  ;;  %v6674_v53 = vld [vmem:[%s7860_s6] ss:$0 sm:$0xff] }
 0x231   :  { %v1810_v3 = vmul.f32 %v6552_v47, %v1809_v10  ;;  %v1811_v23 = vmul.f32 %v6558_v5, %v1809_v10  ;;  %v1812_v28 = vmul.f32 %v6564_v30, %v1809_v10  ;;  %v1813_v13 = vmul.f32 %v6566_v46, %v1809_v10 }
 0x232   :  { %v1814_v9 = vmul.f32 %v6588_v44, %v1809_v10  ;;  %v1815_v25 = vmul.f32 %v6595_v26, %v1809_v10  ;;  %v1816_v58 = vmul.f32 %v6598_v16, %v1809_v10  ;;  %v1817_v2 = vmul.f32 %v6601_v63, %v1809_v10 }
 0x233   :  { %v1818_v41 = vmul.f32 %v1810_v3, %v6503_v60  ;;  %v1819_v7 = vmul.f32 %v1811_v23, %v6498_v22  ;;  %v1820_v47 = vmul.f32 %v1812_v28, %v6510_v27  ;;  %v1821_v5 = vmul.f32 %v1813_v13, %v6505_v57 }
 0x234   :  { %v1822_v30 = vmul.f32 %v1814_v9, %v6500_v39  ;;  %v1823_v46 = vmul.f32 %v1815_v25, %v6512_v45  ;;  %v809_v44 = vadd.f32 %v793_v59, %v6213_v0  ;;  %v6656_v26 = vadd.f32 %v796_v4, %v6213_v0 }
 0x235   :  { %v1824_v16 = vmul.f32 %v1816_v58, %v6518_v51  ;;  %v1834_v63 = vrot.slane %v1819_v7, 7  ;;  %v1836_v60 = vrot.slane %v1820_v47, 6  ;;  %v1860_v56 = vrot.slane %v1811_v23, 7 }
 0x236   :  { %v1825_v27 = vmul.f32 %v1817_v2, %v6507_v14  ;;  %v916_v57 = vrot.slane %v6635_v8, 4  ;;  %v6662_v45 = vadd.f32 %v797_v17, %v6213_v0  ;;  %v1838_v19 = vrot.slane %v1821_v5, 5 }
 0x237   :  { %v820_v22 = vpop.permute.xlu0 %819  ;;  %v1835_v36 = vsel %vm579_vm0, %v1834_v63, %v1818_v41  ;;  %v1861_v52 = vsel %vm579_vm0, %v1860_v56, %v1810_v3  ;;  %v1862_v18 = vrot.slane %v1812_v28, 6  ;;  %v1840_v35 = vrot.slane %v1822_v30, 4  ;;  %v1238_v30 = vpop.permute.xlu2 %1237 }
 0x238   :  { %v834_v39 = vpop.permute.xlu1 %833  ;;  %v1837_v51 = vsel %vm582_vm1, %v1836_v60, %v1835_v36  ;;  %v1842_v40 = vrot.slane %v1823_v46, 3  ;;  %v1864_v55 = vrot.slane %v1813_v13, 5  ;;  %v1844_v37 = vrot.slane %v1824_v16, 2 }
 0x239   :  { %v1839_v14 = vsel %vm585_vm2, %v1838_v19, %v1837_v51  ;;  %v1863_v33 = vsel %vm582_vm1, %v1862_v18, %v1861_v52  ;;  %v1866_v49 = vrot.slane %v1814_v9, 4  ;;  %v1868_v31 = vrot.slane %v1815_v25, 3 }
 0x23a   :  { %v1841_v0 = vsel %vm588_vm3, %v1840_v35, %v1839_v14  ;;  %v1865_v61 = vsel %vm585_vm2, %v1864_v55, %v1863_v33  ;;  %v870_v59 = vmul.f32 %v6674_v53, %v820_v22  ;;  %v1846_v62 = vrot.slane %v1825_v27, 1 }
 0x23b   :  { %v1843_v4 = vsel %vm591_vm4, %v1842_v40, %v1841_v0  ;;  %v1867_v17 = vsel %vm588_vm3, %v1866_v49, %v1865_v61  ;;  %v1870_v10 = vrot.slane %v1816_v58, 2  ;;  %v1872_v23 = vrot.slane %v1817_v2, 1 }
 0x23c   :  { %v1845_v50 = vsel %vm594_vm5, %v1844_v37, %v1843_v4  ;;  %v1869_v3 = vsel %vm591_vm4, %v1868_v31, %v1867_v17  ;;  %v878_v28 = vadd.f32 %v870_v59, %v806_v54  ;;  %v1182_v25 = vrot.slane %v6269_v32, 3 }
 0x23d   :  { %v1847_v13 = vsel %vm597_vm6, %v1846_v62, %v1845_v50  ;;  %v1871_v9 = vsel %vm594_vm5, %v1870_v10, %v1869_v3  ;;  %v1185_v7 = vrot.slane %v6269_v32, 6  ;;  %v1187_v58 = vperm.slane %v6269_v32, 0 }
 0x23e   :  { %1850 = vst [vmem:[#allocation2 + $0x18] sm:$0xff] %v1847_v13  ;;  %v1873_v47 = vsel %vm597_vm6, %v1872_v23, %v1871_v9  ;;  %v886_v5 = vrot.slane %v878_v28, 4  ;;  %v872_v46 = vmul.f32 %v6674_v53, %v834_v39  ;;  %v917_v16 = vmax.f32 %v6635_v8, %v916_v57 }
 0x23f   :  { %v827_v41 = vpop.permute.xlu0 %826  ;;  %v6690_v54 = vmul.f32 %v1873_v47, %v1851_v1  ;;  %v912_v56 = vrot.slane %v911_v34, 2  ;;  %v1180_v27 = vrot.slane %v6269_v32, 1  ;;  %v1181_v36 = vrot.slane %v6269_v32, 2 }
 0x240   :  { %v841_v2 = vpop.permute.xlu1 %840  ;;  %v871_v63 = vmul.f32 %v6674_v53, %v827_v41  ;;  %v880_v22 = vadd.f32 %v872_v46, %v6633_v29  ;;  %v1267_v39 = vmul.f32 %v6674_v53, %v1217_v24  ;;  %v887_v19 = vmax.f32 %v878_v28, %v886_v5  ;;  %v1259_v23 = vpop.permute.xlu2 %1258 }
 0x241   :  { %v873_v60 = vmul.f32 %v6674_v53, %v841_v2  ;;  %v1190_v52 = vperm.slane %v1182_v25, 0  ;;  %v1183_v8 = vrot.slane %v6269_v32, 4  ;;  %v1184_v57 = vrot.slane %v6269_v32, 5 }
 0x242   :  { %v879_v21 = vadd.f32 %v871_v63, %v6638_v20  ;;  %v898_v18 = vrot.slane %v880_v22, 4  ;;  %v918_v51 = vrot.slane %v917_v16, 2  ;;  %v1203_v35 = vadd.f32 %v1187_v58, %v6225_v6 }
 0x243   :  { %v881_v1 = vadd.f32 %v873_v60, %v809_v44  ;;  %v913_v55 = vmax.f32 %v911_v34, %v912_v56  ;;  %v1193_v37 = vperm.slane %v1185_v7, 0  ;;  %v1188_v33 = vperm.slane %v1180_v27, 0 }
 0x244   :  { %v892_v29 = vrot.slane %v879_v21, 4  ;;  %v899_v14 = vmax.f32 %v880_v22, %v898_v18  ;;  %v1275_v24 = vadd.f32 %v1267_v39, %v1203_v35  ;;  %v888_v49 = vrot.slane %v887_v19, 2 }
 0x245   :  { %v904_v40 = vrot.slane %v881_v1, 4  ;;  %v1189_v4 = vperm.slane %v1181_v36, 0  ;;  %v1191_v62 = vperm.slane %v1183_v8, 0  ;;  %v919_v17 = vmax.f32 %v917_v16, %v918_v51 }
 0x246   :  { %v893_v0 = vmax.f32 %v879_v21, %v892_v29  ;;  %v900_v61 = vrot.slane %v899_v14, 2  ;;  %v1206_v10 = vadd.f32 %v1190_v52, %v6225_v6  ;;  %v914_v34 = vrot.slane %v913_v55, 1 }
 0x247   :  { %v905_v20 = vmax.f32 %v881_v1, %v904_v40  ;;  %v862_v44 = vpop.permute.xlu0 %861  ;;  %v1209_v28 = vadd.f32 %v1193_v37, %v6225_v6  ;;  %v1283_v25 = vrot.slane %v1275_v24, 4  ;;  %v889_v41 = vmax.f32 %v887_v19, %v888_v49 }
 0x248   :  { %v876_v31 = vmul.f32 %v6674_v53, %v862_v44  ;;  %v869_v59 = vpop.permute.xlu1 %868  ;;  %v894_v50 = vrot.slane %v893_v0, 2  ;;  %v1270_v7 = vmul.f32 %v6674_v53, %v1238_v30  ;;  %v901_v58 = vmax.f32 %v899_v14, %v900_v61 }
 0x249   :  { %v906_v3 = vrot.slane %v905_v20, 2  ;;  %v877_v9 = vmul.f32 %v6674_v53, %v869_v59  ;;  %v1204_v2 = vadd.f32 %v1188_v33, %v6225_v6  ;;  %v920_v16 = vrot.slane %v919_v17, 1 }
 0x24a   :  { %v884_v13 = vadd.f32 %v876_v31, %v6656_v26  ;;  %v895_v47 = vmax.f32 %v893_v0, %v894_v50  ;;  %v1273_v63 = vmul.f32 %v6674_v53, %v1259_v23  ;;  %v1205_v56 = vadd.f32 %v1189_v4, %v6225_v6 }
 0x24b   :  { %v885_v46 = vadd.f32 %v877_v9, %v6662_v45  ;;  %v907_v60 = vmax.f32 %v905_v20, %v906_v3  ;;  %v1207_v36 = vadd.f32 %v1191_v62, %v6225_v6  ;;  %v6714_v39 = vmax.f32 %v913_v55, %v914_v34 }
 0x24c   :  { %v922_v5 = vrot.slane %v884_v13, 4  ;;  %v896_v26 = vrot.slane %v895_v47, 1  ;;  %v1284_v30 = vmax.f32 %v1275_v24, %v1283_v25  ;;  %v890_v19 = vrot.slane %v889_v41, 1 }
 0x24d   :  { %v928_v27 = vrot.slane %v885_v46, 4  ;;  %v1278_v21 = vadd.f32 %v1270_v7, %v1206_v10  ;;  %v902_v45 = vrot.slane %v901_v58, 1  ;;  %v6717_v51 = vmax.f32 %v919_v17, %v920_v16 }
 0x24e   :  { %v923_v22 = vmax.f32 %v884_v13, %v922_v5  ;;  %v1281_v35 = vadd.f32 %v1273_v63, %v1209_v28  ;;  %v908_v29 = vrot.slane %v907_v60, 1  ;;  %v1192_v40 = vperm.slane %v1184_v57, 0 }
 0x24f   :  { %v1224_v1 = vpop.permute.xlu0 %1223  ;;  %v929_v18 = vmax.f32 %v885_v46, %v928_v27  ;;  %v6719_v14 = vmax.f32 %v895_v47, %v896_v26  ;;  %v1285_v49 = vrot.slane %v1284_v30, 2  ;;  %v6721_v24 = vmax.f32 %v889_v41, %v890_v19 }
 0x250   :  { %v924_v52 = vrot.slane %v923_v22, 2  ;;  %v1268_v8 = vmul.f32 %v6674_v53, %v1224_v1  ;;  %v1301_v0 = vrot.slane %v1278_v21, 4  ;;  %v1186_v20 = vrot.slane %v6269_v32, 7  ;;  %v1231_v4 = vpop.permute.xlu1 %1230 }
 0x251   :  { %v930_v33 = vrot.slane %v929_v18, 2  ;;  %v938_v44 = vsub.f32 0.0, %v6714_v39  ;;  %v6725_v61 = vmax.f32 %v901_v58, %v902_v45  ;;  %v1319_v62 = vrot.slane %v1281_v35, 4 }
 0x252   :  { %v925_v37 = vmax.f32 %v923_v22, %v924_v52  ;;  %v1276_v55 = vadd.f32 %v1268_v8, %v1204_v2  ;;  %v6727_v57 = vmax.f32 %v907_v60, %v908_v29  ;;  %v1269_v10 = vmul.f32 %v6674_v53, %v1231_v4 }
 0x253   :  { %v931_v59 = vmax.f32 %v929_v18, %v930_v33  ;;  %v939_v50 = vsub.f32 0.0, %v6717_v51  ;;  %v935_v3 = vsub.f32 0.0, %v6719_v14  ;;  %v1286_v23 = vmax.f32 %v1284_v30, %v1285_v49 }
 0x254   :  { %v926_v31 = vrot.slane %v925_v37, 1  ;;  %v1289_v17 = vrot.slane %v1276_v55, 4  ;;  %v934_v28 = vsub.f32 0.0, %v6721_v24  ;;  %v1302_v13 = vmax.f32 %v1278_v21, %v1301_v0 }
 0x255   :  { %v932_v32 = vrot.slane %v931_v59, 1  ;;  %v1277_v9 = vadd.f32 %v1269_v10, %v1205_v56  ;;  %v936_v41 = vsub.f32 0.0, %v6725_v61  ;;  %v1320_v5 = vmax.f32 %v1281_v35, %v1319_v62 }
 0x256   :  { %v6732_v34 = vmax.f32 %v925_v37, %v926_v31  ;;  %v937_v46 = vsub.f32 0.0, %v6727_v57  ;;  %v1290_v2 = vmax.f32 %v1276_v55, %v1289_v17  ;;  %v943_v63 = vmax.f32 %v935_v3, %v939_v50 }
 0x257   :  { %v1245_v25 = vpop.permute.xlu0 %1244  ;;  %v6737_v47 = vmax.f32 %v931_v59, %v932_v32  ;;  %v1295_v16 = vrot.slane %v1277_v9, 4  ;;  %v1287_v56 = vrot.slane %v1286_v23, 1  ;;  %v1208_v30 = vadd.f32 %v1192_v40, %v6225_v6 }
 0x258   :  { %v940_v7 = vsub.f32 0.0, %v6732_v34  ;;  %v1271_v58 = vmul.f32 %v6674_v53, %v1245_v25  ;;  %v1194_v19 = vperm.slane %v1186_v20, 0  ;;  %v942_v21 = vmax.f32 %v934_v28, %v938_v44 }
 0x259   :  { %v941_v26 = vsub.f32 0.0, %v6737_v47  ;;  %v1296_v27 = vmax.f32 %v1277_v9, %v1295_v16  ;;  %v1303_v1 = vrot.slane %v1302_v13, 2  ;;  %v1252_v18 = vpop.permute.xlu1 %1251  ;;  %v1321_v8 = vrot.slane %v1320_v5, 2 }
 0x25a   :  { %v944_v60 = vmax.f32 %v936_v41, %v940_v7  ;;  %v1279_v22 = vadd.f32 %v1271_v58, %v1207_v36  ;;  %v1291_v35 = vrot.slane %v1290_v2, 2  ;;  %v1272_v37 = vmul.f32 %v6674_v53, %v1252_v18 }
 0x25b   :  { %v945_v45 = vmax.f32 %v937_v46, %v941_v26  ;;  %v1297_v29 = vrot.slane %v1296_v27, 2  ;;  %v946_v33 = vmax.f32 %v942_v21, %v943_v63  ;;  %v6744_v36 = vmax.f32 %v1286_v23, %v1287_v56 }
 0x25c   :  { %v1307_v52 = vrot.slane %v1279_v22, 4  ;;  %v1280_v0 = vadd.f32 %v1272_v37, %v1208_v30  ;;  %v1304_v31 = vmax.f32 %v1302_v13, %v1303_v1  ;;  %v1210_v20 = vadd.f32 %v1194_v19, %v6225_v6 }
 0x25d   :  { %v947_v55 = vmax.f32 %v944_v60, %v945_v45  ;;  %v1322_v4 = vmax.f32 %v1320_v5, %v1321_v8  ;;  %v1292_v62 = vmax.f32 %v1290_v2, %v1291_v35  ;;  %v1298_v17 = vmax.f32 %v1296_v27, %v1297_v29 }
 0x25e   :  { %v1308_v49 = vmax.f32 %v1279_v22, %v1307_v52  ;;  %v1313_v60 = vrot.slane %v1280_v0, 4  ;;  %v1305_v21 = vrot.slane %v1304_v31, 1 }
 0x25f   :  { %v948_v59 = vmax.f32 %v946_v33, %v947_v55  ;;  %v1266_v40 = vpop.permute.xlu0 %1265  ;;  %v1323_v2 = vrot.slane %v1322_v4, 1 }
 0x260   :  { %v1309_v10 = vrot.slane %v1308_v49, 2  ;;  %v1274_v22 = vmul.f32 %v6674_v53, %v1266_v40 }
 0x261   :  { %v949_v32 = vsub.f32 %v934_v28, %v948_v59  ;;  %v950_v9 = vsub.f32 %v935_v3, %v948_v59  ;;  %v951_v25 = vsub.f32 %v936_v41, %v948_v59  ;;  %v952_v58 = vsub.f32 %v937_v46, %v948_v59 }
 0x262   :  { %v953_v16 = vsub.f32 %v938_v44, %v948_v59  ;;  %v954_v63 = vsub.f32 %v939_v50, %v948_v59  ;;  %v955_v23 = vsub.f32 %v940_v7, %v948_v59  ;;  %v956_v1 = vsub.f32 %v941_v26, %v948_v59 }
 0x263   :  { %v957_v56 = vmul.f32 1.442695, %v949_v32  ;;  %v959_v13 = vmul.f32 1.442695, %v950_v9  ;;  %v961_v30 = vmul.f32 1.442695, %v951_v25  ;;  %v1310_v5 = vmax.f32 %v1308_v49, %v1309_v10 }
 0x264   :  { %v963_v6 = vmul.f32 1.442695, %v952_v58  ;;  %v965_v27 = vmul.f32 1.442695, %v953_v16  ;;  %v1293_v28 = vrot.slane %v1292_v62, 1  ;;  %v1314_v41 = vmax.f32 %v1280_v0, %v1313_v60 }
 0x265   :  { %5834 = vpow2.f32 %v957_v56  ;;  %v967_v3 = vmul.f32 1.442695, %v954_v63  ;;  %v1282_v44 = vadd.f32 %v1274_v22, %v1210_v20  ;;  %v969_v50 = vmul.f32 1.442695, %v955_v23 }
 0x266   :  { %5836 = vpow2.f32 %v959_v13  ;;  %v1299_v46 = vrot.slane %v1298_v17, 1  ;;  %v1311_v53 = vrot.slane %v1310_v5, 1  ;;  %v971_v7 = vmul.f32 1.442695, %v956_v1 }
 0x267   :  { %5838 = vpow2.f32 %v961_v30  ;;  %v1315_v19 = vrot.slane %v1314_v41, 2  ;;  %v1325_v45 = vrot.slane %v1282_v44, 4  ;;  %v6753_v35 = vmax.f32 %v1292_v62, %v1293_v28 }
 0x268   :  { %5840 = vpow2.f32 %v963_v6  ;;  %v6748_v52 = vpop.f32.mrf.mxu3  ;;  %v6757_v55 = vmax.f32 %v1298_v17, %v1299_v46  ;;  %v6759_v49 = vmax.f32 %v1310_v5, %v1311_v53  ;;  %v1331_v62 = vsub.f32 0.0, %v6744_v36 }
 0x269   :  { %5842 = vpow2.f32 %v965_v27  ;;  %v2010_v26 = vperm.slane %v6748_v52, 1  ;;  %v2003_v18 = vperm.slane %v6748_v52, 0  ;;  %v2017_v8 = vperm.slane %v6748_v52, 2 }
 0x26a   :  { %5844 = vpow2.f32 %v967_v3  ;;  %v1316_v29 = vmax.f32 %v1314_v41, %v1315_v19  ;;  %v1326_v37 = vmax.f32 %v1282_v44, %v1325_v45  ;;  %v6766_v10 = vmax.f32 %v1304_v31, %v1305_v21 }
 0x26b   :  { %v6755_v33 = vpop.eup %5834  ;;  %5846 = vpow2.f32 %v969_v50  ;;  %2015 = vperm.xlu0 %5792, %v2010_v26   ;;  %2008 = vperm.xlu2 %5791, %v2003_v18   ;;  %v6768_v32 = vmax.f32 %v1322_v4, %v1323_v2  ;;  %v1332_v58 = vsub.f32 0.0, %v6753_v35  ;;  %v1333_v4 = vsub.f32 0.0, %v6757_v55 }
 0x26c   :  { %v6761_v0 = vpop.eup %5836  ;;  %5848 = vpow2.f32 %v971_v7  ;;  %v1317_v59 = vrot.slane %v1316_v29, 1  ;;  %v1327_v40 = vrot.slane %v1326_v37, 2  ;;  %2022 = vperm.xlu1 %5790, %v2017_v8   ;;  %v1335_v23 = vsub.f32 0.0, %v6759_v49 }
 0x26d   :  { %v6763_v20 = vpop.eup %5838  ;;  %v981_v17 = vrot.slane %v6761_v0, 7  ;;  %v2031_v28 = vperm.slane %v6748_v52, 4  ;;  %v2024_v3 = vperm.slane %v6748_v52, 3  ;;  %v2038_v53 = vperm.slane %v6748_v52, 5 }
 0x26e   :  { %v6771_v9 = vpop.eup %5840  ;;  %v983_v25 = vrot.slane %v6763_v20, 6  ;;  %v6775_v16 = vmax.f32 %v1316_v29, %v1317_v59  ;;  %v1328_v63 = vmax.f32 %v1326_v37, %v1327_v40  ;;  %v1334_v7 = vsub.f32 0.0, %v6766_v10 }
 0x26f   :  { %v6777_v60 = vpop.eup %5842  ;;  %v982_v22 = vsel %vm579_vm0, %v981_v17, %v6755_v33  ;;  %v985_v31 = vrot.slane %v6771_v9, 5  ;;  %v1337_v19 = vsub.f32 0.0, %v6768_v32  ;;  %v1339_v8 = vmax.f32 %v1331_v62, %v1335_v23 }
 0x270   :  { %v6784_v56 = vpop.eup %5844  ;;  %v984_v13 = vsel %vm582_vm1, %v983_v25, %v982_v22  ;;  %v987_v30 = vrot.slane %v6777_v60, 4  ;;  %v1336_v21 = vsub.f32 0.0, %v6775_v16  ;;  %v1329_v1 = vrot.slane %v1328_v63, 1  ;;  %v1969_v6 = vpop.f32.mrf.mxu3 }
 0x271   :  { %v6789_v5 = vpop.eup %5846  ;;  %v986_v2 = vsel %vm585_vm2, %v985_v31, %v984_v13  ;;  %v989_v27 = vrot.slane %v6784_v56, 3  ;;  %v1341_v17 = vmax.f32 %v1333_v4, %v1337_v19  ;;  %v2052_v13 = vperm.slane %v6748_v52, 7 }
 0x272   :  { %v6795_v41 = vpop.eup %5848  ;;  %v988_v44 = vsel %vm588_vm3, %v987_v30, %v986_v2  ;;  %v991_v50 = vrot.slane %v6789_v5, 2  ;;  %v6799_v46 = vmax.f32 %v1328_v63, %v1329_v1  ;;  %v1340_v29 = vmax.f32 %v1332_v58, %v1336_v21 }
 0x273   :  { %v990_v45 = vsel %vm591_vm4, %v989_v27, %v988_v44  ;;  %v993_v26 = vrot.slane %v6795_v41, 1  ;;  %2036 = vperm.xlu0 %5792, %v2031_v28   ;;  %2029 = vperm.xlu2 %5791, %v2024_v3   ;;  %v2045_v30 = vperm.slane %v6748_v52, 6  ;;  %v2441_v2 = vperm.slane %v6304_v11, 6 }
 0x274   :  { %v992_v18 = vsel %vm594_vm5, %v991_v50, %v990_v45  ;;  %v1338_v37 = vsub.f32 0.0, %v6799_v46  ;;  %2043 = vperm.xlu1 %5790, %v2038_v53   ;;  %v1343_v22 = vmax.f32 %v1339_v8, %v1340_v29 }
 0x275   :  { %v994_v59 = vsel %vm597_vm6, %v993_v26, %v992_v18 }
 0x276   :  { %v996_v40 = vrot.slane %v994_v59, 4  ;;  %v1342_v25 = vmax.f32 %v1334_v7, %v1338_v37 }
 0x278   :  { %v997_v63 = vadd.f32 %v996_v40, %v994_v59  ;;  %v1344_v31 = vmax.f32 %v1341_v17, %v1342_v25 }
 0x27a   :  { %v998_v1 = vrot.slane %v997_v63, 2  ;;  %v1345_v6 = vmax.f32 %v1343_v22, %v1344_v31 }
 0x27b   :  { %2057 = vperm.xlu0 %5792, %v2052_v13   ;;  %2050 = vperm.xlu2 %5791, %v2045_v30  }
 0x27c   :  { %v999_v27 = vadd.f32 %v998_v1, %v997_v63  ;;  %v1346_v28 = vsub.f32 %v1331_v62, %v1345_v6  ;;  %v1347_v3 = vsub.f32 %v1332_v58, %v1345_v6  ;;  %v1348_v44 = vsub.f32 %v1333_v4, %v1345_v6  ;;  %2446 = vperm.xlu1 %5790, %v2441_v2  }
 0x27d   :  { %v1349_v50 = vsub.f32 %v1334_v7, %v1345_v6  ;;  %v1350_v53 = vsub.f32 %v1335_v23, %v1345_v6  ;;  %v1351_v26 = vsub.f32 %v1336_v21, %v1345_v6  ;;  %v1352_v29 = vsub.f32 %v1337_v19, %v1345_v6 }
 0x27e   :  { %v1000_v45 = vrot.slane %v999_v27, 1  ;;  %v1354_v18 = vmul.f32 1.442695, %v1346_v28  ;;  %v1356_v8 = vmul.f32 1.442695, %v1347_v3  ;;  %v1353_v17 = vsub.f32 %v1338_v37, %v1345_v6 }
 0x27f   :  { %v1358_v59 = vmul.f32 1.442695, %v1348_v44  ;;  %v1360_v52 = vmul.f32 1.442695, %v1349_v50  ;;  %v1362_v25 = vmul.f32 1.442695, %v1350_v53 }
 0x280   :  { %v1001_v40 = vadd.f32 %v1000_v45, %v999_v27  ;;  %5850 = vpow2.f32 %v1354_v18  ;;  %v2434_v63 = vperm.slane %v6304_v11, 5  ;;  %v2448_v62 = vperm.slane %v6304_v11, 7 }
 0x281   :  { %5852 = vpow2.f32 %v1356_v8  ;;  %v1364_v4 = vmul.f32 1.442695, %v1351_v26  ;;  %v1366_v23 = vmul.f32 1.442695, %v1352_v29  ;;  %v1368_v21 = vmul.f32 1.442695, %v1353_v17 }
 0x282   :  { %v1002_v58 = vperm.slane %v1001_v40, 0  ;;  %5854 = vpow2.f32 %v1358_v59 }
 0x283   :  { %5856 = vpow2.f32 %v1360_v52  ;;  %2439 = vperm.xlu0 %5792, %v2434_v63   ;;  %2453 = vperm.xlu2 %5791, %v2448_v62  }
 0x284   :  { %5858 = vrcp.f32 %v1002_v58  ;;  %v1012_v18 = vand.u32 2147483647, %v1002_v58  ;;  %v1014_v8 = vand.u32 2147483648, %v1002_v58  ;;  %vm1008_vm7 = vweird.f32 %v1002_v58 }
 0x285   :  { %5860 = vpow2.f32 %v1362_v25 }
 0x286   :  { %v6814_v7 = vpop.eup %5850  ;;  %5862 = vpow2.f32 %v1364_v4  ;;  %v1015_v4 = vor.u32 1.1754944e-38, %v1014_v8  ;;  %vm1013_vm9 = vcmp.eq.f32.partialorder %v1012_v18, 8.507059e+37 }
 0x287   :  { %v6816_v19 = vpop.eup %5852  ;;  %5864 = vpow2.f32 %v1366_v23 }
 0x288   :  { %v6818_v37 = vpop.eup %5854  ;;  %5866 = vpow2.f32 %v1368_v21  ;;  %v1378_v11 = vrot.slane %v6816_v19, 7 }
 0x289   :  { %v6821_v22 = vpop.eup %5856  ;;  %v1380_v31 = vrot.slane %v6818_v37, 6 }
 0x28a   :  { %v5859_v13 = vpop.eup %5858  ;;  %v1379_v30 = vsel %vm579_vm0, %v1378_v11, %v6814_v7  ;;  %v1382_v1 = vrot.slane %v6821_v22, 5 }
 0x28b   :  { %v6827_v6 = vpop.eup %5860  ;;  %v1004_v2 = vmul.f32 %v5859_v13, %v1002_v58  ;;  %v1381_v27 = vsel %vm582_vm1, %v1380_v31, %v1379_v30  ;;  %vm1009_vm15 = vweird.f32 %v5859_v13 }
 0x28c   :  { %v6830_v28 = vpop.eup %5862  ;;  %v1383_v3 = vsel %vm585_vm2, %v1382_v1, %v1381_v27  ;;  %v1384_v44 = vrot.slane %v6827_v6, 4  ;;  %vm1010_vm8 = vmor %vm1008_vm7, %vm1009_vm15  ;;  %vm3337_vm15 = vcmask 1041408   ;;  %vm3339_vm7 = vcmask 1042432  }
 0x28d   :  { %v6834_v50 = vpop.eup %5864  ;;  %v1005_v53 = vsub.f32 1.0, %v1004_v2  ;;  %v1386_v45 = vrot.slane %v6830_v28, 3 }
 0x28e   :  { %v6837_v26 = vpop.eup %5866  ;;  %v1385_v29 = vsel %vm588_vm3, %v1384_v44, %v1383_v3  ;;  %v1388_v59 = vrot.slane %v6834_v50, 2 }
 0x28f   :  { %v1006_v52 = vmul.f32 %v5859_v13, %v1005_v53  ;;  %v1387_v40 = vsel %vm591_vm4, %v1386_v45, %v1385_v29  ;;  %v1390_v17 = vrot.slane %v6837_v26, 1 }
 0x290   :  { %v1389_v25 = vsel %vm594_vm5, %v1388_v59, %v1387_v40 }
 0x291   :  { %v1007_v63 = vadd.f32 %v5859_v13, %v1006_v52  ;;  %v1391_v62 = vsel %vm597_vm6, %v1390_v17, %v1389_v25 }
 0x292   :  { %v1393_v11 = vrot.slane %v1391_v62, 4 }
 0x293   :  { %v1011_v23 = vsel %vm1010_vm8, %v5859_v13, %v1007_v63 }
 0x294   :  { %v1016_v21 = vsel %vm1013_vm9, %v1015_v4, %v1011_v23 }
 0x295   :  { %v1017_v31 = vmul.f32 %v6755_v33, %v1016_v21  ;;  %v1018_v30 = vmul.f32 %v6761_v0, %v1016_v21  ;;  %v1019_v1 = vmul.f32 %v6763_v20, %v1016_v21  ;;  %v1020_v2 = vmul.f32 %v6771_v9, %v1016_v21 }
 0x296   :  { %v1021_v27 = vmul.f32 %v6777_v60, %v1016_v21  ;;  %v1022_v58 = vmul.f32 %v6784_v56, %v1016_v21  ;;  %v1023_v3 = vmul.f32 %v6789_v5, %v1016_v21  ;;  %v1024_v44 = vmul.f32 %v6795_v41, %v1016_v21 }
 0x297   :  { %v1025_v13 = vmul.f32 %v1017_v31, %v6721_v24  ;;  %v1026_v53 = vmul.f32 %v1018_v30, %v6719_v14  ;;  %v1027_v33 = vmul.f32 %v1019_v1, %v6725_v61  ;;  %v1028_v0 = vmul.f32 %v1020_v2, %v6727_v57  ;;  %v5909_v14 = vld [vmem:[%s7855_s1 + $0x4] sm:$0xf] }
 0x298   :  { %v1029_v20 = vmul.f32 %v1021_v27, %v6714_v39  ;;  %v1030_v9 = vmul.f32 %v1022_v58, %v6717_v51  ;;  %v1031_v60 = vmul.f32 %v1023_v3, %v6732_v34  ;;  %v1032_v56 = vmul.f32 %v1024_v44, %v6737_v47 }
 0x299   :  { %v1041_v45 = vrot.slane %v1026_v53, 7  ;;  %v1043_v5 = vrot.slane %v1027_v33, 6  ;;  %v1067_v18 = vrot.slane %v1018_v30, 7  ;;  %v1394_v41 = vadd.f32 %v1393_v11, %v1391_v62 }
 0x29a   :  { %v1058_v24 = vunpack.c.l.bf16 %v5909_v14  ;;  %v1045_v61 = vrot.slane %v1028_v0, 5  ;;  %v1047_v8 = vrot.slane %v1029_v20, 4  ;;  %v1069_v51 = vrot.slane %v1019_v1, 6 }
 0x29b   :  { %v1042_v57 = vsel %vm579_vm0, %v1041_v45, %v1025_v13  ;;  %v1068_v39 = vsel %vm579_vm0, %v1067_v18, %v1017_v31  ;;  %v1049_v29 = vrot.slane %v1030_v9, 3  ;;  %v1051_v47 = vrot.slane %v1031_v60, 2 }
 0x29c   :  { %v1044_v34 = vsel %vm582_vm1, %v1043_v5, %v1042_v57  ;;  %v1071_v59 = vrot.slane %v1020_v2, 5  ;;  %v1070_v40 = vsel %vm582_vm1, %v1069_v51, %v1068_v39  ;;  %v1073_v17 = vrot.slane %v1021_v27, 4 }
 0x29d   :  { %v1046_v52 = vsel %vm585_vm2, %v1045_v61, %v1044_v34  ;;  %v1395_v25 = vrot.slane %v1394_v41, 2  ;;  %v1053_v62 = vrot.slane %v1032_v56, 1  ;;  %v1075_v23 = vrot.slane %v1022_v58, 3 }
 0x29e   :  { %v1048_v63 = vsel %vm588_vm3, %v1047_v8, %v1046_v52  ;;  %v1072_v4 = vsel %vm585_vm2, %v1071_v59, %v1070_v40  ;;  %v1077_v31 = vrot.slane %v1023_v3, 2  ;;  %v1079_v13 = vrot.slane %v1024_v44, 1 }
 0x29f   :  { %v1050_v21 = vsel %vm591_vm4, %v1049_v29, %v1048_v63  ;;  %v1074_v11 = vsel %vm588_vm3, %v1073_v17, %v1072_v4  ;;  %v1396_v30 = vadd.f32 %v1395_v25, %v1394_v41  ;;  %v3425_v9 = vrot.slane %v6592_v42, 1 }
 0x2a0   :  { %v1052_v1 = vsel %vm594_vm5, %v1051_v47, %v1050_v21  ;;  %v1076_v2 = vsel %vm591_vm4, %v1075_v23, %v1074_v11  ;;  %v3520_v3 = vrot.slane %v6592_v42, 2  ;;  %v3615_v60 = vrot.slane %v6592_v42, 3 }
 0x2a1   :  { %v1054_v27 = vsel %vm597_vm6, %v1053_v62, %v1052_v1  ;;  %v1078_v53 = vsel %vm594_vm5, %v1077_v31, %v1076_v2  ;;  %v1397_v33 = vrot.slane %v1396_v30, 1  ;;  %v3710_v56 = vrot.slane %v6592_v42, 4 }
 0x2a2   :  { %1057 = vst [vmem:[#allocation2 + $0x8] sm:$0xff] %v1054_v27  ;;  %v1080_v0 = vsel %vm597_vm6, %v1079_v13, %v1078_v53  ;;  %v3900_v8 = vrot.slane %v6592_v42, 6  ;;  %v3997_v52 = vrot.slane %v6592_v42, 7 }
 0x2a3   :  { %v1082_v58 = vmul.f32 %v1080_v0, %v1058_v24  ;;  %v1398_v20 = vadd.f32 %v1397_v33, %v1396_v30  ;;  %v3805_v24 = vrot.slane %v6592_v42, 5 }
 0x2a5   :  { %v1399_v44 = vperm.slane %v1398_v20, 0  ;;  %v3321_v45 = vrot.slane %v1082_v58, 7  ;;  %v6883_v5 = vsel %vm3335_vm10, %v3425_v9, %v1082_v58  ;;  %v3522_v18 = vrot.slane %v1082_v58, 1 }
 0x2a6   :  { %v3617_v41 = vrot.slane %v1082_v58, 2  ;;  %v3712_v14 = vrot.slane %v1082_v58, 3  ;;  %v3807_v61 = vrot.slane %v1082_v58, 4  ;;  %v3902_v57 = vrot.slane %v1082_v58, 5 }
 0x2a7   :  { %5868 = vrcp.f32 %v1399_v44  ;;  %v6889_v39 = vsel %vm3335_vm10, %v6592_v42, %v3321_v45  ;;  %v6892_v51 = vsel %vm3335_vm10, %v3520_v3, %v3522_v18  ;;  %v3999_v40 = vrot.slane %v1082_v58, 6 }
 0x2a8   :  { %v6895_v34 = vsel %vm3335_vm10, %v3615_v60, %v3617_v41  ;;  %v6898_v29 = vsel %vm3335_vm10, %v3710_v56, %v3712_v14  ;;  %v6901_v47 = vsel %vm3335_vm10, %v3805_v24, %v3807_v61  ;;  %v6904_v59 = vsel %vm3335_vm10, %v3900_v8, %v3902_v57 }
 0x2a9   :  { %v6908_v17 = vsel %vm3335_vm10, %v3997_v52, %v3999_v40  ;;  %v1411_v4 = vand.u32 2147483648, %v1399_v44  ;;  %v1409_v21 = vand.u32 2147483647, %v1399_v44  ;;  %vm1405_vm12 = vweird.f32 %v1399_v44 }
 0x2ab   :  { %v1412_v31 = vor.u32 1.1754944e-38, %v1411_v4  ;;  %vm1410_vm14 = vcmp.eq.f32.partialorder %v1409_v21, 8.507059e+37 }
 0x2ad   :  { %v5869_v25 = vpop.eup %5868 }
 0x2ae   :  { %v1401_v63 = vmul.f32 %v5869_v25, %v1399_v44  ;;  %vm1406_vm11 = vweird.f32 %v5869_v25 }
 0x2af   :  { %vm1407_vm13 = vmor %vm1405_vm12, %vm1406_vm11 }
 0x2b0   :  { %v1402_v62 = vsub.f32 1.0, %v1401_v63 }
 0x2b2   :  { %v1403_v23 = vmul.f32 %v5869_v25, %v1402_v62 }
 0x2b4   :  { %v1404_v11 = vadd.f32 %v5869_v25, %v1403_v23 }
 0x2b6   :  { %v1408_v30 = vsel %vm1407_vm13, %v5869_v25, %v1404_v11 }
 0x2b7   :  { %v1413_v1 = vsel %vm1410_vm14, %v1412_v31, %v1408_v30  ;;  %v3327_v30 = vrot.slane %v6690_v54, 5 }
 0x2b8   :  { %v1414_v42 = vmul.f32 %v6814_v7, %v1413_v1  ;;  %v1415_v2 = vmul.f32 %v6816_v19, %v1413_v1  ;;  %v1416_v13 = vmul.f32 %v6818_v37, %v1413_v1  ;;  %v1417_v27 = vmul.f32 %v6821_v22, %v1413_v1 }
 0x2b9   :  { %v1418_v53 = vmul.f32 %v6827_v6, %v1413_v1  ;;  %v1419_v33 = vmul.f32 %v6830_v28, %v1413_v1  ;;  %v1420_v0 = vmul.f32 %v6834_v50, %v1413_v1  ;;  %v1421_v58 = vmul.f32 %v6837_v26, %v1413_v1 }
 0x2ba   :  { %v1422_v20 = vmul.f32 %v1414_v42, %v6744_v36  ;;  %v1423_v9 = vmul.f32 %v1415_v2, %v6753_v35  ;;  %v1424_v7 = vmul.f32 %v1416_v13, %v6757_v55  ;;  %v1425_v19 = vmul.f32 %v1417_v27, %v6766_v10  ;;  %v5910_v55 = vld [vmem:[%s7855_s1 + $0x8] sm:$0xf] }
 0x2bb   :  { %v1426_v37 = vmul.f32 %v1418_v53, %v6759_v49  ;;  %v1427_v22 = vmul.f32 %v1419_v33, %v6775_v16  ;;  %v1464_v60 = vrot.slane %v1415_v2, 7  ;;  %v1428_v28 = vmul.f32 %v1420_v0, %v6768_v32 }
 0x2bc   :  { %v1438_v3 = vrot.slane %v1423_v9, 7  ;;  %v1440_v6 = vrot.slane %v1424_v7, 6  ;;  %v1429_v50 = vmul.f32 %v1421_v58, %v6799_v46  ;;  %v1442_v36 = vrot.slane %v1425_v19, 5 }
 0x2bd   :  { %v1465_v35 = vsel %vm579_vm0, %v1464_v60, %v1414_v42  ;;  %v1466_v56 = vrot.slane %v1416_v13, 6  ;;  %v1455_v49 = vunpack.c.l.bf16 %v5910_v55  ;;  %v1444_v16 = vrot.slane %v1426_v37, 4 }
 0x2be   :  { %v1439_v26 = vsel %vm579_vm0, %v1438_v3, %v1422_v20  ;;  %v1468_v44 = vrot.slane %v1417_v27, 5  ;;  %v1446_v32 = vrot.slane %v1427_v22, 3  ;;  %v1470_v18 = vrot.slane %v1418_v53, 4 }
 0x2bf   :  { %v1441_v10 = vsel %vm582_vm1, %v1440_v6, %v1439_v26  ;;  %v1467_v46 = vsel %vm582_vm1, %v1466_v56, %v1465_v35  ;;  %v1448_v14 = vrot.slane %v1428_v28, 2  ;;  %v1472_v57 = vrot.slane %v1419_v33, 3 }
 0x2c0   :  { %v1443_v45 = vsel %vm585_vm2, %v1442_v36, %v1441_v10  ;;  %v1469_v61 = vsel %vm585_vm2, %v1468_v44, %v1467_v46  ;;  %v1450_v8 = vrot.slane %v1429_v50, 1  ;;  %v1474_v40 = vrot.slane %v1420_v0, 2 }
 0x2c1   :  { %v1445_v41 = vsel %vm588_vm3, %v1444_v16, %v1443_v45  ;;  %v1471_v52 = vsel %vm588_vm3, %v1470_v18, %v1469_v61  ;;  %v1476_v62 = vrot.slane %v1421_v58, 1  ;;  %v3429_v1 = vrot.slane %v6690_v54, 6 }
 0x2c2   :  { %v1447_v24 = vsel %vm591_vm4, %v1446_v32, %v1445_v41  ;;  %v1473_v63 = vsel %vm591_vm4, %v1472_v57, %v1471_v52  ;;  %v3524_v42 = vrot.slane %v6690_v54, 7  ;;  %v3716_v53 = vrot.slane %v6690_v54, 1 }
 0x2c3   :  { %v1449_v25 = vsel %vm594_vm5, %v1448_v14, %v1447_v24  ;;  %v1475_v23 = vsel %vm594_vm5, %v1474_v40, %v1473_v63  ;;  %v3811_v19 = vrot.slane %v6690_v54, 2  ;;  %v3906_v28 = vrot.slane %v6690_v54, 3  ;;  %v5634_v24 = vld [vmem:[%s7862_s8 + $0x38] sm:$0xff] }
 0x2c4   :  { %v1451_v4 = vsel %vm597_vm6, %v1450_v8, %v1449_v25  ;;  %v1477_v21 = vsel %vm597_vm6, %v1476_v62, %v1475_v23  ;;  %v4003_v35 = vrot.slane %v6690_v54, 4  ;;  %v1974_v55 = vrot.slane %v6273_v43, 3  ;;  %v5642_v8 = vld [vmem:[%s7862_s8 + $0x78] sm:$0xff]  ;;  %3216 = vmatpush.bf16.msra.mxu3 %v5634_v24 }
 0x2c5   :  { %1454 = vst [vmem:[#allocation2 + $0x10] sm:$0xff] %v1451_v4  ;;  %v2009_v11 = vpop.permute.xlu2 %2008  ;;  %v1479_v31 = vmul.f32 %v1477_v21, %v1455_v49  ;;  %v1977_v49 = vrot.slane %v6273_v43, 6  ;;  %v1972_v10 = vrot.slane %v6273_v43, 1  ;;  %v1973_v44 = vrot.slane %v6273_v43, 2  ;;  %v5658_v63 = vld [vmem:[%s7862_s8 + $0xf8] sm:$0xff]  ;;  %3229 = vmatpush.bf16.msrb.mxu1 %v5642_v8 }
 0x2c6   :  { %v1982_v45 = vperm.slane %v1974_v55, 0  ;;  %3255 = vmatpush.bf16.msrb.mxu0 %v5658_v63 }
 0x2c7   :  { %v3324_v2 = vrot.slane %v1479_v31, 6  ;;  %v3427_v13 = vrot.slane %v1479_v31, 7  ;;  %v3531_v27 = vsel %vm3337_vm15, %v6892_v51, %v1479_v31  ;;  %v3619_v0 = vrot.slane %v1479_v31, 1 }
 0x2c8   :  { %v6950_v33 = vsel %vm3339_vm7, %v3531_v27, %v3524_v42  ;;  %v3714_v58 = vrot.slane %v1479_v31, 2  ;;  %v3809_v20 = vrot.slane %v1479_v31, 3  ;;  %v3904_v37 = vrot.slane %v1479_v31, 4 }
 0x2c9   :  { %v3338_v9 = vsel %vm3337_vm15, %v6889_v39, %v3324_v2  ;;  %v3436_v7 = vsel %vm3337_vm15, %v6883_v5, %v3427_v13  ;;  %v3626_v3 = vsel %vm3337_vm15, %v6895_v34, %v3619_v0  ;;  %v1985_v32 = vperm.slane %v1977_v49, 0 }
 0x2ca   :  { %v6958_v22 = vsel %vm3339_vm7, %v3338_v9, %v3327_v30  ;;  %v6961_v51 = vsel %vm3339_vm7, %v3436_v7, %v3429_v1  ;;  %v3721_v6 = vsel %vm3337_vm15, %v6898_v29, %v3714_v58  ;;  %v6969_v39 = vsel %vm3339_vm7, %v3626_v3, %v6690_v54  ;;  %v7889_v58 = vld [vmem:[#allocation5_spill] sm:$0xff]  ;;  %v7890_v9 = vld [vmem:[#allocation6_spill] sm:$0xff] }
 0x2cb   :  { %v6972_v5 = vsel %vm3339_vm7, %v3721_v6, %v3716_v53  ;;  %v3816_v60 = vsel %vm3337_vm15, %v6901_v47, %v3809_v20  ;;  %v3913_v34 = vsel %vm3337_vm15, %v6904_v59, %v3904_v37  ;;  %v4001_v29 = vrot.slane %v1479_v31, 5 }
 0x2cc   :  { %v6978_v26 = vsel %vm3339_vm7, %v3816_v60, %v3811_v19  ;;  %v6983_v36 = vsel %vm3339_vm7, %v3913_v34, %v3906_v28  ;;  %v1979_v59 = vperm.slane %v6273_v43, 0  ;;  %v1980_v54 = vperm.slane %v1972_v10, 0 }
 0x2cd   :  { %v2030_v50 = vpop.permute.xlu2 %2029  ;;  %v4010_v56 = vsel %vm3337_vm15, %v6908_v17, %v4001_v29  ;;  %v6999_v17 = vld [vmem:[%s7860_s6] ss:$0 sm:$0xff]  ;;  %v1981_v57 = vperm.slane %v1973_v44, 0  ;;  %v1998_v52 = vadd.f32 %v1982_v45, %v6248_v15  ;;  %v2001_v40 = vadd.f32 %v1985_v32, %v6248_v15  ;;  %v5633_v32 = vld [vmem:[%s7862_s8 + $0x30] sm:$0xff] }
 0x2ce   :  { %v6989_v47 = vsel %vm3339_vm7, %v4010_v56, %v4003_v35  ;;  %v2457_v46 = vmul.f32 %v6999_v17, %v6626_v12  ;;  %v2059_v18 = vmul.f32 %v6999_v17, %v2009_v11  ;;  %v2062_v41 = vmul.f32 %v6999_v17, %v2030_v50  ;;  %v5650_v12 = vld [vmem:[%s7862_s8 + $0xb8] sm:$0xff]  ;;  %3217 = vmatpush.bf16.msra.mxu3 %v5633_v32 }
 0x2cf   :  { %v1995_v14 = vadd.f32 %v1979_v59, %v6248_v15  ;;  %v1996_v25 = vadd.f32 %v1980_v54, %v6248_v15  ;;  %v2458_v4 = vmul.f32 %v6999_v17, %v6629_v48  ;;  %v1975_v2 = vrot.slane %v6273_v43, 4  ;;  %3242 = vmatpush.bf16.msra.mxu2 %v5650_v12  ;;  %v5641_v54 = vld [vmem:[%s7862_s8 + $0x70] sm:$0xff] }
 0x2d0   :  { %v2465_v62 = vadd.f32 %v2457_v46, %v6324_v38  ;;  %v2070_v31 = vadd.f32 %v2062_v41, %v1998_v52  ;;  %v1997_v38 = vadd.f32 %v1981_v57, %v6248_v15  ;;  %v1976_v27 = vrot.slane %v6273_v43, 5  ;;  %v7891_v57 = vld [vmem:[#allocation9_spill] sm:$0xff]  ;;  %3230 = vmatpush.bf16.msrb.mxu1 %v5641_v54 }
 0x2d1   :  { %v2067_v23 = vadd.f32 %v2059_v18, %v1995_v14  ;;  %v2466_v20 = vadd.f32 %v2458_v4, %v7889_v58  ;;  %v1983_v6 = vperm.slane %v1975_v2, 0  ;;  %v1978_v29 = vrot.slane %v6273_v43, 7  ;;  %v5649_v43 = vld [vmem:[%s7862_s8 + $0xb0] sm:$0xff] }
 0x2d2   :  { %v2483_v0 = vrot.slane %v2465_v62, 4  ;;  %v2093_v3 = vrot.slane %v2070_v31, 4  ;;  %v1984_v50 = vperm.slane %v1976_v27, 0  ;;  %v2477_v24 = vrot.slane %v7891_v57, 4 }
 0x2d3   :  { %v2075_v37 = vrot.slane %v2067_v23, 4  ;;  %v2489_v56 = vrot.slane %v2466_v20, 4  ;;  %v1999_v59 = vadd.f32 %v1983_v6, %v6248_v15  ;;  %v1986_v52 = vperm.slane %v1978_v29, 0  ;;  %3243 = vmatpush.bf16.msra.mxu2 %v5649_v43 }
 0x2d4   :  { %v2484_v35 = vmax.f32 %v2465_v62, %v2483_v0  ;;  %v2000_v41 = vadd.f32 %v1984_v50, %v6248_v15  ;;  %v5647_v50 = vld [vmem:[%s7862_s8 + $0xa0] sm:$0xff]  ;;  %vm3341_vm15 = vcmask 1043456  }
 0x2d5   :  { %v2051_v16 = vpop.permute.xlu2 %2050  ;;  %v2076_v10 = vmax.f32 %v2067_v23, %v2075_v37 }
 0x2d6   :  { %v2065_v61 = vmul.f32 %v6999_v17, %v2051_v16  ;;  %v2094_v16 = vmax.f32 %v2070_v31, %v2093_v3  ;;  %v5640_v31 = vld [vmem:[%s7862_s8 + $0x68] sm:$0xff] }
 0x2d7   :  { %v2077_v4 = vrot.slane %v2076_v10, 2  ;;  %3231 = vmatpush.bf16.msrb.mxu1 %v5640_v31 }
 0x2d8   :  { %v2073_v13 = vadd.f32 %v2065_v61, %v2001_v40  ;;  %v5657_v61 = vld [vmem:[%s7862_s8 + $0xf0] sm:$0xff]  ;;  %v2485_v40 = vrot.slane %v2484_v35, 2  ;;  %v2095_v23 = vrot.slane %v2094_v16, 2 }
 0x2d9   :  { %3256 = vmatpush.bf16.msrb.mxu0 %v5657_v61  ;;  %v5646_v61 = vld [vmem:[%s7862_s8 + $0x98] sm:$0xff] }
 0x2da   :  { %v2111_v60 = vrot.slane %v2073_v13, 4  ;;  %v7067_v0 = vmax.f32 %v2484_v35, %v2485_v40  ;;  %v2096_v37 = vmax.f32 %v2094_v16, %v2095_v23 }
 0x2dc   :  { %v2112_v46 = vmax.f32 %v2073_v13, %v2111_v60  ;;  %v5656_v13 = vld [vmem:[%s7862_s8 + $0xe8] sm:$0xff] }
 0x2dd   :  { %v2016_v21 = vpop.permute.xlu0 %2015  ;;  %v2454_v11 = vpop.permute.xlu2 %2453  ;;  %3257 = vmatpush.bf16.msrb.mxu0 %v5656_v13  ;;  %v5629_v13 = vld [vmem:[%s7862_s8 + $0x10] sm:$0xff] }
 0x2de   :  { %v2060_v30 = vmul.f32 %v6999_v17, %v2016_v21  ;;  %v2462_v1 = vmul.f32 %v6999_v17, %v2454_v11  ;;  %v2023_v42 = vpop.permute.xlu1 %2022  ;;  %v5632_v11 = vld [vmem:[%s7862_s8 + $0x28] sm:$0xff] }
 0x2df   :  { %v2061_v48 = vmul.f32 %v6999_v17, %v2023_v42  ;;  %3218 = vmatpush.bf16.msra.mxu3 %v5632_v11 }
 0x2e0   :  { %v2068_v53 = vadd.f32 %v2060_v30, %v1996_v25  ;;  %v2470_v7 = vadd.f32 %v2462_v1, %v7890_v9  ;;  %v2490_v25 = vmax.f32 %v2466_v20, %v2489_v56  ;;  %v5648_v30 = vld [vmem:[%s7862_s8 + $0xa8] sm:$0xff]  ;;  %v2113_v1 = vrot.slane %v2112_v46, 2 }
 0x2e1   :  { %v2069_v19 = vadd.f32 %v2061_v48, %v1997_v38  ;;  %v7064_v38 = vmax.f32 %v7891_v57, %v2477_v24  ;;  %3244 = vmatpush.bf16.msra.mxu2 %v5648_v30  ;;  %v2097_v57 = vrot.slane %v2096_v37, 1 }
 0x2e2   :  { %v2081_v28 = vrot.slane %v2068_v53, 4  ;;  %v2513_v55 = vrot.slane %v2470_v7, 4  ;;  %v2491_v58 = vrot.slane %v2490_v25, 2 }
 0x2e3   :  { %v2087_v34 = vrot.slane %v2069_v19, 4  ;;  %v2479_v40 = vrot.slane %v7064_v38, 2 }
 0x2e4   :  { %v2082_v18 = vmax.f32 %v2068_v53, %v2081_v28  ;;  %v2514_v63 = vmax.f32 %v2470_v7, %v2513_v55  ;;  %v2002_v53 = vadd.f32 %v1986_v52, %v6248_v15  ;;  %v5631_v15 = vld [vmem:[%s7862_s8 + $0x20] sm:$0xff]  ;;  %v2492_v54 = vmax.f32 %v2490_v25, %v2491_v58  ;;  %v5654_v52 = vld [vmem:[%s7862_s8 + $0xd8] sm:$0xff] }
 0x2e5   :  { %v2037_v49 = vpop.permute.xlu0 %2036  ;;  %v2088_v8 = vmax.f32 %v2069_v19, %v2087_v34  ;;  %v2078_v19 = vmax.f32 %v2076_v10, %v2077_v4  ;;  %v5639_v28 = vld [vmem:[%s7862_s8 + $0x60] sm:$0xff]  ;;  %v2114_v34 = vmax.f32 %v2112_v46, %v2113_v1  ;;  %3219 = vmatpush.bf16.msra.mxu3 %v5631_v15  ;;  %3245 = vmatpush.bf16.msra.mxu2 %v5647_v50  ;;  %v2487_v25 = vrot.slane %v7067_v0, 1 }
 0x2e6   :  { %v2063_v44 = vmul.f32 %v6999_v17, %v2037_v49  ;;  %v2044_v45 = vpop.permute.xlu1 %2043  ;;  %v2083_v42 = vrot.slane %v2082_v18, 2  ;;  %v2515_v20 = vrot.slane %v2514_v63, 2  ;;  %v5655_v55 = vld [vmem:[%s7862_s8 + $0xe0] sm:$0xff]  ;;  %3232 = vmatpush.bf16.msrb.mxu1 %v5639_v28  ;;  %v2493_v30 = vrot.slane %v2492_v54, 1 }
 0x2e7   :  { %v2064_v14 = vmul.f32 %v6999_v17, %v2044_v45  ;;  %v2089_v48 = vrot.slane %v2088_v8, 2  ;;  %v7892_v45 = vld [vmem:[#allocation7_spill] sm:$0xff]  ;;  %3258 = vmatpush.bf16.msrb.mxu0 %v5655_v55  ;;  %v2079_v43 = vrot.slane %v2078_v19, 1  ;;  %v2115_v4 = vrot.slane %v2114_v34, 1  ;;  %v5628_v55 = vld [vmem:[%s7862_s8 + $0x8] sm:$0xff] }
 0x2e8   :  { %v2071_v12 = vadd.f32 %v2063_v44, %v1999_v59  ;;  %v2084_v29 = vmax.f32 %v2082_v18, %v2083_v42  ;;  %v2516_v59 = vmax.f32 %v2514_v63, %v2515_v20  ;;  %v7114_v58 = vmax.f32 %v2096_v37, %v2097_v57 }
 0x2e9   :  { %v2072_v62 = vadd.f32 %v2064_v14, %v2000_v41  ;;  %v2090_v49 = vmax.f32 %v2088_v8, %v2089_v48  ;;  %v5630_v41 = vld [vmem:[%s7862_s8 + $0x18] sm:$0xff]  ;;  %3246 = vmatpush.bf16.msra.mxu2 %v5646_v61  ;;  %v5637_v48 = vld [vmem:[%s7862_s8 + $0x50] sm:$0xff]  ;;  %v7124_v15 = vmax.f32 %v2114_v34, %v2115_v4  ;;  %v2480_v50 = vmax.f32 %v7064_v38, %v2479_v40  ;;  %v5636_v34 = vld [vmem:[%s7862_s8 + $0x48] sm:$0xff] }
 0x2ea   :  { %v2099_v21 = vrot.slane %v2071_v12, 4  ;;  %v5638_v14 = vld [vmem:[%s7862_s8 + $0x58] sm:$0xff]  ;;  %v2085_v24 = vrot.slane %v2084_v29, 1  ;;  %3220 = vmatpush.bf16.msra.mxu3 %v5630_v41  ;;  %v2517_v23 = vrot.slane %v2516_v59, 1  ;;  %v7143_v38 = vmax.f32 %v2492_v54, %v2493_v30 }
 0x2eb   :  { %v2105_v2 = vrot.slane %v2072_v62, 4  ;;  %v2091_v63 = vrot.slane %v2090_v49, 1  ;;  %3233 = vmatpush.bf16.msrb.mxu1 %v5638_v14  ;;  %3259 = vmatpush.bf16.msrb.mxu0 %v5654_v52  ;;  %v2129_v54 = vsub.f32 0.0, %v7124_v15  ;;  %v5643_v52 = vld [vmem:[%s7862_s8 + $0x80] sm:$0xff]  ;;  %v5666_v4 = vld [vmem:[%s7862_s8 + $0x138] sm:$0xff] }
 0x2ec   :  { %v2100_v27 = vmax.f32 %v2071_v12, %v2099_v21  ;;  %v7116_v20 = vmax.f32 %v2084_v29, %v2085_v24 }
 0x2ed   :  { %v2106_v9 = vmax.f32 %v2072_v62, %v2105_v2  ;;  %v2058_v7 = vpop.permute.xlu0 %2057 }
 0x2ee   :  { %v2101_v3 = vrot.slane %v2100_v27, 2  ;;  %v2066_v6 = vmul.f32 %v6999_v17, %v2058_v7  ;;  %v2447_v60 = vpop.permute.xlu1 %2446  ;;  %v7121_v7 = vmax.f32 %v2090_v49, %v2091_v63  ;;  %3221 = vmatpush.bf16.msra.mxu3 %v5629_v13  ;;  %v5644_v49 = vld [vmem:[%s7862_s8 + $0x88] sm:$0xff]  ;;  %v2481_v13 = vrot.slane %v2480_v50, 1 }
 0x2ef   :  { %v2107_v35 = vrot.slane %v2106_v9, 2  ;;  %v2461_v56 = vmul.f32 %v6999_v17, %v2447_v60  ;;  %3234 = vmatpush.bf16.msrb.mxu1 %v5637_v48 }
 0x2f0   :  { %v2102_v10 = vmax.f32 %v2100_v27, %v2101_v3  ;;  %v2074_v16 = vadd.f32 %v2066_v6, %v2002_v53  ;;  %v5645_v27 = vld [vmem:[%s7862_s8 + $0x90] sm:$0xff]  ;;  %v7112_v53 = vmax.f32 %v2078_v19, %v2079_v43  ;;  %v7893_v6 = vld [vmem:[#allocation8_spill] sm:$0xff]  ;;  %v7126_v19 = vmax.f32 %v2516_v59, %v2517_v23  ;;  %v5674_v23 = vld [vmem:[%s7862_s8 + $0x178] sm:$0xff] }
 0x2f1   :  { %v2108_v44 = vmax.f32 %v2106_v9, %v2107_v35  ;;  %v2469_v32 = vadd.f32 %v2461_v56, %v7892_v45  ;;  %3247 = vmatpush.bf16.msra.mxu2 %v5645_v27  ;;  %v2124_v45 = vsub.f32 0.0, %v7116_v20 }
 0x2f2   :  { %v2103_v46 = vrot.slane %v2102_v10, 1  ;;  %v2117_v18 = vrot.slane %v2074_v16, 4  ;;  %3222 = vmatpush.bf16.msra.mxu3 %v5628_v55  ;;  %v5689_v55 = vld [vmem:[%s7862_s8 + $0x1f0] sm:$0xff] }
 0x2f3   :  { %v2109_v8 = vrot.slane %v2108_v44, 1  ;;  %v2507_v12 = vrot.slane %v2469_v32, 4  ;;  %3235 = vmatpush.bf16.msrb.mxu1 %v5636_v34  ;;  %v7216_v34 = vmax.f32 %v2480_v50, %v2481_v13  ;;  %v5672_v50 = vld [vmem:[%s7862_s8 + $0x168] sm:$0xff] }
 0x2f4   :  { %v2118_v62 = vmax.f32 %v2074_v16, %v2117_v18  ;;  %v7098_v21 = vmax.f32 %v2102_v10, %v2103_v46  ;;  %v7141_v10 = vmax.f32 %v7067_v0, %v2487_v25  ;;  %v2123_v16 = vsub.f32 0.0, %v7112_v53 }
 0x2f5   :  { %v2508_v11 = vmax.f32 %v2469_v32, %v2507_v12  ;;  %v2440_v31 = vpop.permute.xlu0 %2439  ;;  %v7100_v1 = vmax.f32 %v2108_v44, %v2109_v8  ;;  %v5652_v44 = vld [vmem:[%s7862_s8 + $0xc8] sm:$0xff]  ;;  %v2125_v32 = vsub.f32 0.0, %v7121_v7  ;;  %v2126_v0 = vsub.f32 0.0, %v7114_v58  ;;  %3248 = vmatpush.bf16.msra.mxu2 %v5644_v49  ;;  %v5627_v8 = vld [vmem:[%s7862_s8] sm:$0xff] }
 0x2f6   :  { %v2119_v42 = vrot.slane %v2118_v62, 2  ;;  %v2460_v2 = vmul.f32 %v6999_v17, %v2440_v31  ;;  %v5653_v17 = vld [vmem:[%s7862_s8 + $0xd0] sm:$0xff]  ;;  %v2127_v37 = vsub.f32 0.0, %v7098_v21  ;;  %v2526_v18 = vsub.f32 0.0, %v7126_v19  ;;  %v5635_v12 = vld [vmem:[%s7862_s8 + $0x40] sm:$0xff]  ;;  %3223 = vmatpush.bf16.msra.mxu3 %v5627_v8  ;;  %v5664_v8 = vld [vmem:[%s7862_s8 + $0x128] sm:$0xff] }
 0x2f7   :  { %v2509_v9 = vrot.slane %v2508_v11, 2  ;;  %3260 = vmatpush.bf16.msrb.mxu0 %v5653_v17  ;;  %v2128_v29 = vsub.f32 0.0, %v7100_v1  ;;  %v2521_v40 = vsub.f32 0.0, %v7141_v10  ;;  %v2522_v25 = vsub.f32 0.0, %v7143_v38  ;;  %3236 = vmatpush.bf16.msrb.mxu1 %v5635_v12 }
 0x2f8   :  { %v2120_v3 = vmax.f32 %v2118_v62, %v2119_v42  ;;  %v2468_v60 = vadd.f32 %v2460_v2, %v7893_v6  ;;  %v2131_v14 = vmax.f32 %v2123_v16, %v2127_v37  ;;  %v5651_v62 = vld [vmem:[%s7862_s8 + $0xc0] sm:$0xff]  ;;  %v5682_v42 = vld [vmem:[%s7862_s8 + $0x1b8] sm:$0xff] }
 0x2f9   :  { %v2510_v28 = vmax.f32 %v2508_v11, %v2509_v9  ;;  %v2132_v61 = vmax.f32 %v2124_v45, %v2128_v29  ;;  %v2133_v11 = vmax.f32 %v2125_v32, %v2129_v54  ;;  %v5690_v2 = vld [vmem:[%s7862_s8 + $0x1f8] sm:$0xff]  ;;  %v7194_v48 = vmax.f32 %v2522_v25, %v2526_v18  ;;  %3249 = vmatpush.bf16.msra.mxu2 %v5643_v52 }
 0x2fa   :  { %v2121_v35 = vrot.slane %v2120_v3, 1  ;;  %v2501_v56 = vrot.slane %v2468_v60, 4  ;;  %3268 = vmatpush.bf16.msrb.mxu3 %v5666_v4  ;;  %v2520_v52 = vsub.f32 0.0, %v7216_v34 }
 0x2fb   :  { %v2511_v59 = vrot.slane %v2510_v28, 1  ;;  %3261 = vmatpush.bf16.msrb.mxu0 %v5652_v44  ;;  %v2135_v9 = vmax.f32 %v2131_v14, %v2132_v61  ;;  %3281 = vmatpush.bf16.msra.mxu1 %v5674_v23  ;;  %v5688_v23 = vld [vmem:[%s7862_s8 + $0x1e8] sm:$0xff] }
 0x2fc   :  { %v7151_v43 = vmax.f32 %v2120_v3, %v2121_v35  ;;  %v2502_v46 = vmax.f32 %v2468_v60, %v2501_v56  ;;  %v5665_v60 = vld [vmem:[%s7862_s8 + $0x130] sm:$0xff] }
 0x2fd   :  { %v7156_v41 = vmax.f32 %v2510_v28, %v2511_v59  ;;  %3294 = vmatpush.bf16.msrb.mxu2 %v5682_v42  ;;  %v5673_v28 = vld [vmem:[%s7862_s8 + $0x170] sm:$0xff]  ;;  %v5679_v42 = vld [vmem:[%s7862_s8 + $0x1a0] sm:$0xff] }
 0x2fe   :  { %v2130_v57 = vsub.f32 0.0, %v7151_v43  ;;  %v2503_v24 = vrot.slane %v2502_v46, 2  ;;  %v5681_v56 = vld [vmem:[%s7862_s8 + $0x1b0] sm:$0xff]  ;;  %3269 = vmatpush.bf16.msrb.mxu3 %v5665_v60 }
 0x2ff   :  { %v2525_v63 = vsub.f32 0.0, %v7156_v41  ;;  %3262 = vmatpush.bf16.msrb.mxu0 %v5651_v62  ;;  %3282 = vmatpush.bf16.msra.mxu1 %v5673_v28  ;;  %v5678_v28 = vld [vmem:[%s7862_s8 + $0x198] sm:$0xff] }
 0x300   :  { %v2134_v31 = vmax.f32 %v2126_v0, %v2130_v57  ;;  %v2504_v30 = vmax.f32 %v2502_v46, %v2503_v24 }
 0x301   :  { %v7200_v27 = vmax.f32 %v2521_v40, %v2525_v63  ;;  %3295 = vmatpush.bf16.msrb.mxu2 %v5681_v56 }
 0x302   :  { %v2136_v17 = vmax.f32 %v2133_v11, %v2134_v31  ;;  %v2505_v3 = vrot.slane %v2504_v30, 1  ;;  %3270 = vmatpush.bf16.msrb.mxu3 %v5664_v8  ;;  %v5663_v11 = vld [vmem:[%s7862_s8 + $0x120] sm:$0xff] }
 0x303   :  { %v2532_v6 = vmax.f32 %v7200_v27, %v7194_v48  ;;  %3307 = vmatpush.bf16.msra.mxu0 %v5690_v2  ;;  %3283 = vmatpush.bf16.msra.mxu1 %v5672_v50  ;;  %v5687_v2 = vld [vmem:[%s7862_s8 + $0x1e0] sm:$0xff]  ;;  %v7894_v48 = vld [vmem:[#allocation12_spill] sm:$0xff] }
 0x304   :  { %v2137_v35 = vmax.f32 %v2135_v9, %v2136_v17  ;;  %v7218_v49 = vmax.f32 %v2504_v30, %v2505_v3  ;;  %v5662_v9 = vld [vmem:[%s7862_s8 + $0x118] sm:$0xff] }
 0x305   :  { %v5670_v17 = vld [vmem:[%s7862_s8 + $0x158] sm:$0xff] }
 0x306   :  { %v2138_v59 = vsub.f32 %v2123_v16, %v2137_v35  ;;  %v2139_v44 = vsub.f32 %v2124_v45, %v2137_v35  ;;  %v2140_v46 = vsub.f32 %v2125_v32, %v2137_v35  ;;  %v2141_v14 = vsub.f32 %v2126_v0, %v2137_v35  ;;  %v5680_v16 = vld [vmem:[%s7862_s8 + $0x1a8] sm:$0xff]  ;;  %3271 = vmatpush.bf16.msrb.mxu3 %v5663_v11 }
 0x307   :  { %v2142_v61 = vsub.f32 %v2127_v37, %v2137_v35  ;;  %v2143_v24 = vsub.f32 %v2128_v29, %v2137_v35  ;;  %v2144_v45 = vsub.f32 %v2129_v54, %v2137_v35  ;;  %3308 = vmatpush.bf16.msra.mxu0 %v5689_v55  ;;  %v2145_v29 = vsub.f32 %v2130_v57, %v2137_v35  ;;  %v5671_v57 = vld [vmem:[%s7862_s8 + $0x160] sm:$0xff]  ;;  %v5686_v35 = vld [vmem:[%s7862_s8 + $0x1d8] sm:$0xff] }
 0x308   :  { %v2146_v32 = vmul.f32 1.442695, %v2138_v59  ;;  %v2148_v0 = vmul.f32 1.442695, %v2139_v44  ;;  %v2150_v37 = vmul.f32 1.442695, %v2140_v46  ;;  %3296 = vmatpush.bf16.msrb.mxu2 %v5680_v16  ;;  %3284 = vmatpush.bf16.msra.mxu1 %v5671_v57 }
 0x309   :  { %v2152_v12 = vmul.f32 1.442695, %v2141_v14  ;;  %v2154_v62 = vmul.f32 1.442695, %v2142_v61  ;;  %v2524_v4 = vsub.f32 0.0, %v7218_v49  ;;  %v7895_v44 = vld [vmem:[#allocation11_spill] sm:$0xff] }
 0x30a   :  { %5870 = vpow2.f32 %v2146_v32  ;;  %v2156_v54 = vmul.f32 1.442695, %v2143_v24  ;;  %v2158_v31 = vmul.f32 1.442695, %v2144_v45  ;;  %v2160_v13 = vmul.f32 1.442695, %v2145_v29  ;;  %3272 = vmatpush.bf16.msrb.mxu3 %v5662_v9 }
 0x30b   :  { %5872 = vpow2.f32 %v2148_v0  ;;  %v2528_v30 = vmax.f32 %v2520_v52, %v2524_v4  ;;  %3309 = vmatpush.bf16.msra.mxu0 %v5688_v23  ;;  %v7896_v46 = vsub.f32 0.0, %v7895_v44  ;;  %v7897_v16 = vld [vmem:[#allocation10_spill] sm:$0xff]  ;;  %v5685_v23 = vld [vmem:[%s7862_s8 + $0x1d0] sm:$0xff] }
 0x30c   :  { %5874 = vpow2.f32 %v2150_v37  ;;  %3297 = vmatpush.bf16.msrb.mxu2 %v5679_v42  ;;  %v7898_v45 = vsub.f32 0.0, %v7897_v16  ;;  %3285 = vmatpush.bf16.msra.mxu1 %v5670_v17  ;;  %v5661_v37 = vld [vmem:[%s7862_s8 + $0x110] sm:$0xff] }
 0x30d   :  { %5876 = vpow2.f32 %v2152_v12  ;;  %v2531_v27 = vmax.f32 %v7894_v48, %v2528_v30 }
 0x30e   :  { %5878 = vpow2.f32 %v2154_v62  ;;  %3273 = vmatpush.bf16.msrb.mxu3 %v5661_v37 }
 0x30f   :  { %5880 = vpow2.f32 %v2156_v54  ;;  %v2533_v60 = vmax.f32 %v2531_v27, %v2532_v6  ;;  %3310 = vmatpush.bf16.msra.mxu0 %v5687_v2 }
 0x310   :  { %v7257_v3 = vpop.eup %5870  ;;  %5882 = vpow2.f32 %v2158_v31  ;;  %3298 = vmatpush.bf16.msrb.mxu2 %v5678_v28  ;;  %v5660_v28 = vld [vmem:[%s7862_s8 + $0x108] sm:$0xff] }
 0x311   :  { %v7265_v56 = vpop.eup %5872  ;;  %5884 = vpow2.f32 %v2160_v13  ;;  %v2534_v6 = vsub.f32 %v7896_v46, %v2533_v60  ;;  %v2535_v14 = vsub.f32 %v2520_v52, %v2533_v60  ;;  %v2536_v61 = vsub.f32 %v2521_v40, %v2533_v60  ;;  %v5669_v40 = vld [vmem:[%s7862_s8 + $0x150] sm:$0xff] }
 0x312   :  { %v7267_v55 = vpop.eup %5874  ;;  %v2170_v59 = vrot.slane %v7265_v56, 7  ;;  %v2537_v50 = vsub.f32 %v2522_v25, %v2533_v60  ;;  %v2538_v32 = vsub.f32 %v7898_v45, %v2533_v60  ;;  %v2539_v0 = vsub.f32 %v2524_v4, %v2533_v60  ;;  %v5677_v4 = vld [vmem:[%s7862_s8 + $0x190] sm:$0xff]  ;;  %3286 = vmatpush.bf16.msra.mxu1 %v5669_v40  ;;  %3274 = vmatpush.bf16.msrb.mxu3 %v5660_v28 }
 0x313   :  { %v7274_v24 = vpop.eup %5876  ;;  %v2172_v8 = vrot.slane %v7267_v55, 6  ;;  %v2540_v52 = vsub.f32 %v2525_v63, %v2533_v60  ;;  %v2541_v62 = vsub.f32 %v2526_v18, %v2533_v60  ;;  %3311 = vmatpush.bf16.msra.mxu0 %v5686_v35  ;;  %v2542_v63 = vmul.f32 1.442695, %v2534_v6  ;;  %v2668_v18 = vld [vmem:[%s7856_s2] sm:$0x77]  ;;  %v5668_v35 = vld [vmem:[%s7862_s8 + $0x148] sm:$0xff] }
 0x314   :  { %v7287_v29 = vpop.eup %5878  ;;  %v2171_v12 = vsel %vm579_vm0, %v2170_v59, %v7257_v3  ;;  %v2174_v25 = vrot.slane %v7274_v24, 5  ;;  %v2544_v31 = vmul.f32 1.442695, %v2535_v14  ;;  %v2546_v13 = vmul.f32 1.442695, %v2536_v61  ;;  %v5676_v59 = vld [vmem:[%s7862_s8 + $0x188] sm:$0xff]  ;;  %3299 = vmatpush.bf16.msrb.mxu2 %v5677_v4 }
 0x315   :  { %v7302_v54 = vpop.eup %5880  ;;  %v2173_v11 = vsel %vm582_vm1, %v2172_v8, %v2171_v12  ;;  %v2176_v57 = vrot.slane %v7287_v29, 4  ;;  %v2548_v48 = vmul.f32 1.442695, %v2537_v50  ;;  %5886 = vpow2.f32 %v2542_v63  ;;  %v5684_v61 = vld [vmem:[%s7862_s8 + $0x1c8] sm:$0xff]  ;;  %v5667_v4 = vld [vmem:[%s7862_s8 + $0x140] sm:$0xff] }
 0x316   :  { %v7309_v30 = vpop.eup %5882  ;;  %v2175_v42 = vsel %vm585_vm2, %v2174_v25, %v2173_v11  ;;  %v2178_v2 = vrot.slane %v7302_v54, 3  ;;  %v2550_v60 = vmul.f32 1.442695, %v2538_v32  ;;  %5888 = vpow2.f32 %v2544_v31  ;;  %v2669_v8 = vld [vmem:[%s7856_s2 + $0x8] sm:$0x77]  ;;  %3287 = vmatpush.bf16.msra.mxu1 %v5668_v35  ;;  %v5659_v25 = vld [vmem:[%s7862_s8 + $0x100] sm:$0xff] }
 0x317   :  { %v7313_v27 = vpop.eup %5884  ;;  %v2177_v9 = vsel %vm588_vm3, %v2176_v57, %v2175_v42  ;;  %v2180_v17 = vrot.slane %v7309_v30, 2  ;;  %v2552_v14 = vmul.f32 1.442695, %v2539_v0  ;;  %3312 = vmatpush.bf16.msra.mxu0 %v5685_v23  ;;  %5890 = vpow2.f32 %v2546_v13  ;;  %v5675_v57 = vld [vmem:[%s7862_s8 + $0x180] sm:$0xff]  ;;  %3275 = vmatpush.bf16.msrb.mxu3 %v5659_v25  ;;  %v5714_v35 = vld [vmem:[%s7863_s9 + $0xb8] sm:$0xff] }
 0x318   :  { %v2179_v46 = vsel %vm591_vm4, %v2178_v2, %v2177_v9  ;;  %v2182_v6 = vrot.slane %v7313_v27, 1  ;;  %v2554_v45 = vmul.f32 1.442695, %v2540_v52  ;;  %v2556_v32 = vmul.f32 1.442695, %v2541_v62  ;;  %3300 = vmatpush.bf16.msrb.mxu2 %v5676_v59  ;;  %v5683_v63 = vld [vmem:[%s7862_s8 + $0x1c0] sm:$0xff] }
 0x319   :  { %v2181_v50 = vsel %vm594_vm5, %v2180_v17, %v2179_v46  ;;  %5892 = vpow2.f32 %v2548_v48  ;;  %v2808_v40 = vunpack.c.l.b16 %v2668_v18  ;;  %v2810_v0 = vunpack.c.l.b16 %v2669_v8  ;;  %v5698_v48 = vld [vmem:[%s7863_s9 + $0x38] sm:$0xff] }
 0x31a   :  { %v2183_v37 = vsel %vm597_vm6, %v2182_v6, %v2181_v50  ;;  %5894 = vpow2.f32 %v2550_v60  ;;  %v2809_v23 = vunpack.c.h.b16 %v2668_v18  ;;  %v2811_v52 = vunpack.c.h.b16 %v2669_v8  ;;  %v5706_v9 = vld [vmem:[%s7863_s9 + $0x78] sm:$0xff]  ;;  %3288 = vmatpush.bf16.msra.mxu1 %v5667_v4 }
 0x31b   :  { %v2185_v12 = vrot.slane %v2183_v37, 4  ;;  %5896 = vpow2.f32 %v2552_v14  ;;  %v2816_v62 = vpack.c.b16 %v2808_v40, %v2808_v40  ;;  %3313 = vmatpush.bf16.msra.mxu0 %v5684_v61  ;;  %v2818_v11 = vpack.c.b16 %v2810_v0, %v2810_v0  ;;  %v7348_v31 = vpop.eup %5886  ;;  %v5722_v59 = vld [vmem:[%s7863_s9 + $0xf8] sm:$0xff]  ;;  %v5697_v40 = vld [vmem:[%s7863_s9 + $0x30] sm:$0xff] }
 0x31c   :  { %5898 = vpow2.f32 %v2554_v45  ;;  %v2817_v2 = vpack.c.b16 %v2809_v23, %v2809_v23  ;;  %v2819_v18 = vpack.c.b16 %v2811_v52, %v2811_v52  ;;  %v7350_v13 = vpop.eup %5888  ;;  %3301 = vmatpush.bf16.msrb.mxu2 %v5675_v57  ;;  %v5705_v0 = vld [vmem:[%s7863_s9 + $0x70] sm:$0xff] }
 0x31d   :  { %v2186_v42 = vadd.f32 %v2185_v12, %v2183_v37  ;;  %5900 = vpow2.f32 %v2556_v32  ;;  %3224 = vmatmul.bf16.vlgmr.msra.gmra.mxu3 %v2816_v62  ;;  %3250 = vmatmul.bf16.vlgmr.msra.gmra.mxu2 %v2818_v11  ;;  %v7358_v17 = vpop.eup %5890  ;;  %v2566_v28 = vrot.slane %v7350_v13, 7  ;;  %v5713_v52 = vld [vmem:[%s7863_s9 + $0xb0] sm:$0xff] }
 0x31e   :  { %v2568_v6 = vrot.slane %v7358_v17, 6  ;;  %3237 = vmatmul.bf16.vlgmr.msrb.gmra.mxu1 %v2817_v2  ;;  %3263 = vmatmul.bf16.vlgmr.msrb.gmra.mxu0 %v2819_v18  ;;  %v5721_v62 = vld [vmem:[%s7863_s9 + $0xf0] sm:$0xff] }
 0x31f   :  { %v2187_v60 = vrot.slane %v2186_v42, 2  ;;  %v7367_v46 = vpop.eup %5892  ;;  %3314 = vmatpush.bf16.msra.mxu0 %v5683_v63  ;;  %v2567_v8 = vsel %vm579_vm0, %v2566_v28, %v7348_v31  ;;  %3410 = vmatpush.bf16.msra.mxu3 %v5698_v48  ;;  %v2670_v11 = vld [vmem:[%s7856_s2 + $0x10] sm:$0x77] }
 0x320   :  { %v7370_v14 = vpop.eup %5894  ;;  %v2570_v50 = vrot.slane %v7367_v46, 5  ;;  %v2569_v32 = vsel %vm582_vm1, %v2568_v6, %v2567_v8  ;;  %3506 = vmatpush.bf16.msrb.mxu1 %v5706_v9  ;;  %3601 = vmatpush.bf16.msra.mxu2 %v5714_v35  ;;  %v2671_v9 = vld [vmem:[%s7856_s2 + $0x18] sm:$0x77]  ;;  %v2812_v28 = vunpack.c.l.b16 %v2670_v11  ;;  %v5696_v35 = vld [vmem:[%s7863_s9 + $0x28] sm:$0xff] }
 0x321   :  { %v2188_v61 = vadd.f32 %v2187_v60, %v2186_v42  ;;  %v7375_v45 = vpop.eup %5896  ;;  %v2572_v37 = vrot.slane %v7370_v14, 4  ;;  %v2814_v6 = vunpack.c.l.b16 %v2671_v9 }
 0x322   :  { %v7385_v12 = vpop.eup %5898  ;;  %v2571_v4 = vsel %vm585_vm2, %v2570_v50, %v2569_v32  ;;  %v2574_v23 = vrot.slane %v7375_v45, 3  ;;  %v5712_v50 = vld [vmem:[%s7863_s9 + $0xa8] sm:$0xff] }
 0x323   :  { %v2189_v25 = vrot.slane %v2188_v61, 1  ;;  %3696 = vmatpush.bf16.msrb.mxu0 %v5722_v59  ;;  %v7398_v57 = vpop.eup %5900  ;;  %v2573_v63 = vsel %vm588_vm3, %v2572_v37, %v2571_v4  ;;  %v2576_v42 = vrot.slane %v7385_v12, 2  ;;  %3411 = vmatpush.bf16.msra.mxu3 %v5697_v40  ;;  %v5704_v59 = vld [vmem:[%s7863_s9 + $0x68] sm:$0xff]  ;;  %v2813_v4 = vunpack.c.h.b16 %v2670_v11 }
 0x324   :  { %v2575_v18 = vsel %vm591_vm4, %v2574_v23, %v2573_v63  ;;  %v2578_v48 = vrot.slane %v7398_v57, 1  ;;  %3507 = vmatpush.bf16.msrb.mxu1 %v5705_v0  ;;  %3602 = vmatpush.bf16.msra.mxu2 %v5713_v52  ;;  %v5720_v32 = vld [vmem:[%s7863_s9 + $0xe8] sm:$0xff]  ;;  %v2820_v0 = vpack.c.b16 %v2812_v28, %v2812_v28  ;;  %v5695_v23 = vld [vmem:[%s7863_s9 + $0x20] sm:$0xff]  ;;  %v5702_v28 = vld [vmem:[%s7863_s9 + $0x58] sm:$0xff] }
 0x325   :  { %v2190_v2 = vadd.f32 %v2189_v25, %v2188_v61  ;;  %v2577_v60 = vsel %vm594_vm5, %v2576_v42, %v2575_v18  ;;  %v2822_v25 = vpack.c.b16 %v2814_v6, %v2814_v6  ;;  %v5703_v52 = vld [vmem:[%s7863_s9 + $0x60] sm:$0xff]  ;;  %v2821_v11 = vpack.c.b16 %v2813_v4, %v2813_v4  ;;  %v5718_v6 = vld [vmem:[%s7863_s9 + $0xd8] sm:$0xff] }
 0x326   :  { %v2579_v8 = vsel %vm597_vm6, %v2578_v48, %v2577_v60  ;;  %v5711_v63 = vld [vmem:[%s7863_s9 + $0xa0] sm:$0xff]  ;;  %v2815_v18 = vunpack.c.h.b16 %v2671_v9  ;;  %v5694_v60 = vld [vmem:[%s7863_s9 + $0x18] sm:$0xff] }
 0x327   :  { %v7414_v61 = vperm.slane %v2190_v2, 0  ;;  %3697 = vmatpush.bf16.msrb.mxu0 %v5721_v62  ;;  %v2581_v37 = vrot.slane %v2579_v8, 4  ;;  %3412 = vmatpush.bf16.msra.mxu3 %v5696_v35  ;;  %v5719_v42 = vld [vmem:[%s7863_s9 + $0xe0] sm:$0xff]  ;;  %v5710_v9 = vld [vmem:[%s7863_s9 + $0x98] sm:$0xff] }
 0x328   :  { %3508 = vmatpush.bf16.msrb.mxu1 %v5704_v59  ;;  %3603 = vmatpush.bf16.msra.mxu2 %v5712_v50 }
 0x329   :  { %5902 = vrcp.f32 %v7414_v61  ;;  %v2582_v40 = vadd.f32 %v2581_v37, %v2579_v8  ;;  %v2823_v8 = vpack.c.b16 %v2815_v18, %v2815_v18  ;;  %v2203_v37 = vand.u32 2147483648, %v7414_v61  ;;  %v5700_v18 = vld [vmem:[%s7863_s9 + $0x48] sm:$0xff] }
 0x32a   :  { %v2201_v4 = vand.u32 2147483647, %v7414_v61  ;;  %vm2197_vm9 = vweird.f32 %v7414_v61 }
 0x32b   :  { %3698 = vmatpush.bf16.msrb.mxu0 %v5720_v32  ;;  %v2583_v62 = vrot.slane %v2582_v40, 2  ;;  %3413 = vmatpush.bf16.msra.mxu3 %v5695_v23  ;;  %v5709_v23 = vld [vmem:[%s7863_s9 + $0x90] sm:$0xff] }
 0x32c   :  { %3509 = vmatpush.bf16.msrb.mxu1 %v5703_v52  ;;  %3604 = vmatpush.bf16.msra.mxu2 %v5711_v63  ;;  %v5717_v52 = vld [vmem:[%s7863_s9 + $0xd0] sm:$0xff]  ;;  %vm2202_vm12 = vcmp.eq.f32.partialorder %v2201_v4, 8.507059e+37 }
 0x32d   :  { %v2584_v2 = vadd.f32 %v2583_v62, %v2582_v40  ;;  %3276 = vmatmul.bf16.vlgmr.msrb.gmra.mxu3 %v2820_v0  ;;  %3302 = vmatmul.bf16.vlgmr.msrb.gmra.mxu2 %v2822_v25  ;;  %v5693_v40 = vld [vmem:[%s7863_s9 + $0x10] sm:$0xff] }
 0x32e   :  { %3289 = vmatmul.bf16.vlgmr.msra.gmra.mxu1 %v2821_v11  ;;  %3315 = vmatmul.bf16.vlgmr.msra.gmra.mxu0 %v2823_v8  ;;  %v5701_v0 = vld [vmem:[%s7863_s9 + $0x50] sm:$0xff]  ;;  %v5692_v11 = vld [vmem:[%s7863_s9 + $0x8] sm:$0xff] }
 0x32f   :  { %v5903_v48 = vpop.eup %5902  ;;  %v2585_v59 = vrot.slane %v2584_v2, 1  ;;  %3699 = vmatpush.bf16.msrb.mxu0 %v5719_v42  ;;  %3414 = vmatpush.bf16.msra.mxu3 %v5694_v60  ;;  %v2204_v42 = vor.u32 1.1754944e-38, %v2203_v37  ;;  %v5738_v37 = vld [vmem:[%s7863_s9 + $0x178] sm:$0xff] }
 0x330   :  { %v2193_v35 = vmul.f32 %v5903_v48, %v7414_v61  ;;  %3510 = vmatpush.bf16.msrb.mxu1 %v5702_v28  ;;  %vm2198_vm8 = vweird.f32 %v5903_v48  ;;  %3605 = vmatpush.bf16.msra.mxu2 %v5710_v9  ;;  %v5708_v61 = vld [vmem:[%s7863_s9 + $0x88] sm:$0xff] }
 0x331   :  { %v2586_v32 = vadd.f32 %v2585_v59, %v2584_v2  ;;  %vm2199_vm11 = vmor %vm2197_vm9, %vm2198_vm8  ;;  %v5716_v9 = vld [vmem:[%s7863_s9 + $0xc8] sm:$0xff] }
 0x332   :  { %v2194_v50 = vsub.f32 1.0, %v2193_v35 }
 0x333   :  { %3700 = vmatpush.bf16.msrb.mxu0 %v5718_v6  ;;  %v7463_v62 = vperm.slane %v2586_v32, 0  ;;  %3415 = vmatpush.bf16.msra.mxu3 %v5693_v40 }
 0x334   :  { %v2195_v25 = vmul.f32 %v5903_v48, %v2194_v50  ;;  %3511 = vmatpush.bf16.msrb.mxu1 %v5701_v0  ;;  %3606 = vmatpush.bf16.msra.mxu2 %v5709_v23 }
 0x335   :  { %5904 = vrcp.f32 %v7463_v62  ;;  %vm2593_vm14 = vweird.f32 %v7463_v62 }
 0x336   :  { %v2196_v63 = vadd.f32 %v5903_v48, %v2195_v25  ;;  %v5912_v25 = vld [vmem:[%s7855_s1 + $0x10] sm:$0xf] }
 0x337   :  { %3701 = vmatpush.bf16.msrb.mxu0 %v5717_v52  ;;  %3416 = vmatpush.bf16.msra.mxu3 %v5692_v11  ;;  %v2247_v4 = vunpack.c.l.bf16 %v5912_v25  ;;  %v2597_v52 = vand.u32 2147483647, %v7463_v62 }
 0x338   :  { %v2200_v2 = vsel %vm2199_vm11, %v5903_v48, %v2196_v63  ;;  %3512 = vmatpush.bf16.msrb.mxu1 %v5700_v18  ;;  %3607 = vmatpush.bf16.msra.mxu2 %v5708_v61  ;;  %v5754_v63 = vld [vmem:[%s7863_s9 + $0x1f8] sm:$0xff] }
 0x339   :  { %v2205_v60 = vsel %vm2202_vm12, %v2204_v42, %v2200_v2  ;;  %vm2598_vm8 = vcmp.eq.f32.partialorder %v2597_v52, 8.507059e+37 }
 0x33a   :  { %v2206_v28 = vmul.f32 %v7257_v3, %v2205_v60  ;;  %v2207_v35 = vmul.f32 %v7265_v56, %v2205_v60  ;;  %v2208_v48 = vmul.f32 %v7267_v55, %v2205_v60  ;;  %v2209_v59 = vmul.f32 %v7274_v24, %v2205_v60  ;;  %v5691_v56 = vld [vmem:[%s7863_s9] sm:$0xff] }
 0x33b   :  { %v7484_v6 = vmul.f32 %v7287_v29, %v2205_v60  ;;  %v7487_v8 = vmul.f32 %v7302_v54, %v2205_v60  ;;  %v7490_v50 = vmul.f32 %v7309_v30, %v2205_v60  ;;  %v7493_v3 = vmul.f32 %v7313_v27, %v2205_v60  ;;  %v5699_v30 = vld [vmem:[%s7863_s9 + $0x40] sm:$0xff]  ;;  %v5730_v27 = vld [vmem:[%s7863_s9 + $0x138] sm:$0xff]  ;;  %3702 = vmatpush.bf16.msrb.mxu0 %v5716_v9  ;;  %v5729_v60 = vld [vmem:[%s7863_s9 + $0x130] sm:$0xff] }
 0x33c   :  { %v2214_v55 = vmul.f32 %v2206_v28, %v7112_v53  ;;  %v2215_v24 = vmul.f32 %v2207_v35, %v7116_v20  ;;  %v2216_v29 = vmul.f32 %v2208_v48, %v7121_v7  ;;  %v2217_v54 = vmul.f32 %v2209_v59, %v7114_v58  ;;  %v5707_v7 = vld [vmem:[%s7863_s9 + $0x80] sm:$0xff]  ;;  %3417 = vmatpush.bf16.msra.mxu3 %v5691_v56 }
 0x33d   :  { %v2218_v32 = vmul.f32 %v7484_v6, %v7098_v21  ;;  %v2219_v53 = vmul.f32 %v7487_v8, %v7100_v1  ;;  %v2220_v20 = vmul.f32 %v7490_v50, %v7124_v15  ;;  %v2221_v58 = vmul.f32 %v7493_v3, %v7151_v43  ;;  %v5715_v1 = vld [vmem:[%s7863_s9 + $0xc0] sm:$0xff]  ;;  %v5746_v15 = vld [vmem:[%s7863_s9 + $0x1b8] sm:$0xff]  ;;  %v7528_v43 = vpop.eup %5904  ;;  %3513 = vmatpush.bf16.msrb.mxu1 %v5699_v30 }
 0x33e   :  { %v2230_v40 = vrot.slane %v2215_v24, 7  ;;  %v2232_v21 = vrot.slane %v2216_v29, 6  ;;  %v2256_v0 = vrot.slane %v2207_v35, 7  ;;  %v2234_v23 = vrot.slane %v2217_v54, 5  ;;  %3608 = vmatpush.bf16.msra.mxu2 %v5707_v7 }
 0x33f   :  { %v2236_v11 = vrot.slane %v2218_v32, 4  ;;  %v2258_v18 = vrot.slane %v2208_v48, 6  ;;  %v2238_v35 = vrot.slane %v2219_v53, 3  ;;  %v2240_v9 = vrot.slane %v2220_v20, 2  ;;  %3703 = vmatpush.bf16.msrb.mxu0 %v5715_v1  ;;  %v5736_v1 = vld [vmem:[%s7863_s9 + $0x168] sm:$0xff] }
 0x340   :  { %v2231_v42 = vsel %vm579_vm0, %v2230_v40, %v2214_v55  ;;  %v2257_v2 = vsel %vm579_vm0, %v2256_v0, %v2206_v28  ;;  %3791 = vmatpush.bf16.msrb.mxu3 %v5730_v27  ;;  %v2260_v56 = vrot.slane %v2209_v59, 5  ;;  %v5737_v55 = vld [vmem:[%s7863_s9 + $0x170] sm:$0xff]  ;;  %v2262_v24 = vrot.slane %v7484_v6, 4 }
 0x341   :  { %v2233_v61 = vsel %vm582_vm1, %v2232_v21, %v2231_v42  ;;  %3886 = vmatpush.bf16.msra.mxu1 %v5738_v37  ;;  %v2259_v48 = vsel %vm582_vm1, %v2258_v18, %v2257_v2  ;;  %v2589_v29 = vmul.f32 %v7528_v43, %v7463_v62  ;;  %v5745_v59 = vld [vmem:[%s7863_s9 + $0x1b0] sm:$0xff]  ;;  %v2242_v30 = vrot.slane %v2221_v58, 1  ;;  %v5728_v58 = vld [vmem:[%s7863_s9 + $0x128] sm:$0xff]  ;;  %v5727_v2 = vld [vmem:[%s7863_s9 + $0x120] sm:$0xff] }
 0x342   :  { %v2235_v28 = vsel %vm585_vm2, %v2234_v23, %v2233_v61  ;;  %3983 = vmatpush.bf16.msrb.mxu2 %v5746_v15  ;;  %v2261_v27 = vsel %vm585_vm2, %v2260_v56, %v2259_v48  ;;  %v2264_v32 = vrot.slane %v7487_v8, 3  ;;  %v5753_v6 = vld [vmem:[%s7863_s9 + $0x1f0] sm:$0xff]  ;;  %v2266_v7 = vrot.slane %v7490_v50, 2 }
 0x343   :  { %v2237_v54 = vsel %vm588_vm3, %v2236_v11, %v2235_v28  ;;  %4080 = vmatpush.bf16.msra.mxu0 %v5754_v63  ;;  %v2263_v20 = vsel %vm588_vm3, %v2262_v24, %v2261_v27  ;;  %v2590_v37 = vsub.f32 1.0, %v2589_v29  ;;  %v2268_v21 = vrot.slane %v7493_v3, 1  ;;  %v5744_v3 = vld [vmem:[%s7863_s9 + $0x1a8] sm:$0xff]  ;;  %v7594_v18 = vld [vmem:[%s7855_s1 + $0x14] sm:$0xf]  ;;  %v5751_v28 = vld [vmem:[%s7863_s9 + $0x1e0] sm:$0xff] }
 0x344   :  { %v2239_v53 = vsel %vm591_vm4, %v2238_v35, %v2237_v54  ;;  %3792 = vmatpush.bf16.msrb.mxu3 %v5729_v60  ;;  %v2265_v8 = vsel %vm591_vm4, %v2264_v32, %v2263_v20  ;;  %v2599_v0 = vand.u32 2147483648, %v7463_v62  ;;  %vm2594_vm13 = vweird.f32 %v7528_v43  ;;  %v5752_v63 = vld [vmem:[%s7863_s9 + $0x1e8] sm:$0xff]  ;;  %v5735_v62 = vld [vmem:[%s7863_s9 + $0x160] sm:$0xff]  ;;  %v5726_v27 = vld [vmem:[%s7863_s9 + $0x118] sm:$0xff] }
 0x345   :  { %v2241_v40 = vsel %vm594_vm5, %v2240_v9, %v2239_v53  ;;  %3887 = vmatpush.bf16.msra.mxu1 %v5737_v55  ;;  %v2267_v15 = vsel %vm594_vm5, %v2266_v7, %v2265_v8  ;;  %v2591_v25 = vmul.f32 %v7528_v43, %v2590_v37  ;;  %v2643_v60 = vunpack.c.l.bf16 %v7594_v18  ;;  %vm2595_vm7 = vmor %vm2593_vm14, %vm2594_vm13  ;;  %v5743_v35 = vld [vmem:[%s7863_s9 + $0x1a0] sm:$0xff] }
 0x346   :  { %v2243_v50 = vsel %vm597_vm6, %v2242_v30, %v2241_v40  ;;  %3984 = vmatpush.bf16.msrb.mxu2 %v5745_v59  ;;  %v2269_v23 = vsel %vm597_vm6, %v2268_v21, %v2267_v15 }
 0x347   :  { %2246 = vst [vmem:[#allocation2 + $0x20] sm:$0xff] %v2243_v50  ;;  %4081 = vmatpush.bf16.msra.mxu0 %v5753_v6  ;;  %v7584_v42 = vmul.f32 %v2269_v23, %v2247_v4  ;;  %v2592_v11 = vadd.f32 %v7528_v43, %v2591_v25  ;;  %v2600_v4 = vor.u32 1.1754944e-38, %v2599_v0  ;;  %v5741_v50 = vld [vmem:[%s7863_s9 + $0x190] sm:$0xff] }
 0x348   :  { %3793 = vmatpush.bf16.msrb.mxu3 %v5728_v58 }
 0x349   :  { %3888 = vmatpush.bf16.msra.mxu1 %v5736_v1  ;;  %v2596_v61 = vsel %vm2595_vm7, %v7528_v43, %v2592_v11  ;;  %v3330_v9 = vrot.slane %v7584_v42, 4  ;;  %v3431_v56 = vrot.slane %v7584_v42, 5  ;;  %v3526_v55 = vrot.slane %v7584_v42, 6 }
 0x34a   :  { %3985 = vmatpush.bf16.msrb.mxu2 %v5744_v3  ;;  %v2601_v52 = vsel %vm2598_vm8, %v2600_v4, %v2596_v61  ;;  %v3621_v48 = vrot.slane %v7584_v42, 7  ;;  %v7616_v43 = vsel %vm3341_vm15, %v6972_v5, %v7584_v42  ;;  %v3813_v24 = vrot.slane %v7584_v42, 1  ;;  %v5724_v61 = vld [vmem:[%s7863_s9 + $0x108] sm:$0xff] }
 0x34b   :  { %4082 = vmatpush.bf16.msra.mxu0 %v5752_v63  ;;  %v2602_v29 = vmul.f32 %v7348_v31, %v2601_v52  ;;  %v2603_v59 = vmul.f32 %v7350_v13, %v2601_v52  ;;  %v2604_v54 = vmul.f32 %v7358_v17, %v2601_v52  ;;  %v2605_v30 = vmul.f32 %v7367_v46, %v2601_v52  ;;  %v5734_v13 = vld [vmem:[%s7863_s9 + $0x158] sm:$0xff]  ;;  %v5749_v63 = vld [vmem:[%s7863_s9 + $0x1d0] sm:$0xff] }
 0x34c   :  { %3794 = vmatpush.bf16.msrb.mxu3 %v5727_v2  ;;  %v2606_v32 = vmul.f32 %v7370_v14, %v2601_v52  ;;  %v2607_v5 = vmul.f32 %v7375_v45, %v2601_v52  ;;  %v7629_v6 = vmul.f32 %v7385_v12, %v2601_v52  ;;  %v7632_v31 = vmul.f32 %v7398_v57, %v2601_v52  ;;  %v5742_v45 = vld [vmem:[%s7863_s9 + $0x198] sm:$0xff] }
 0x34d   :  { %3889 = vmatpush.bf16.msra.mxu1 %v5735_v62  ;;  %v2610_v17 = vmul.f32 %v2602_v29, %v7895_v44  ;;  %v2611_v46 = vmul.f32 %v2603_v59, %v7216_v34  ;;  %v2612_v53 = vmul.f32 %v2604_v54, %v7141_v10  ;;  %v2613_v14 = vmul.f32 %v2605_v30, %v7143_v38  ;;  %v5750_v10 = vld [vmem:[%s7863_s9 + $0x1d8] sm:$0xff] }
 0x34e   :  { %3986 = vmatpush.bf16.msrb.mxu2 %v5743_v35  ;;  %v2614_v12 = vmul.f32 %v2606_v32, %v7897_v16  ;;  %v2615_v57 = vmul.f32 %v2607_v5, %v7218_v49  ;;  %v2616_v20 = vmul.f32 %v7629_v6, %v7156_v41  ;;  %v2617_v44 = vmul.f32 %v7632_v31, %v7126_v19  ;;  %v5725_v49 = vld [vmem:[%s7863_s9 + $0x110] sm:$0xff] }
 0x34f   :  { %4083 = vmatpush.bf16.msra.mxu0 %v5751_v28  ;;  %v2626_v38 = vrot.slane %v2611_v46, 7  ;;  %v2628_v34 = vrot.slane %v2612_v53, 6  ;;  %v2630_v7 = vrot.slane %v2613_v14, 5  ;;  %v2652_v37 = vrot.slane %v2603_v59, 7  ;;  %v5733_v19 = vld [vmem:[%s7863_s9 + $0x150] sm:$0xff] }
 0x350   :  { %3795 = vmatpush.bf16.msrb.mxu3 %v5726_v27  ;;  %v2632_v16 = vrot.slane %v2614_v12, 4  ;;  %v2634_v58 = vrot.slane %v2615_v57, 3  ;;  %v2636_v41 = vrot.slane %v2616_v20, 2  ;;  %v2638_v40 = vrot.slane %v2617_v44, 1 }
 0x351   :  { %3890 = vmatpush.bf16.msra.mxu1 %v5734_v13  ;;  %v2627_v8 = vsel %vm579_vm0, %v2626_v38, %v2610_v17  ;;  %v2653_v21 = vsel %vm579_vm0, %v2652_v37, %v2602_v29  ;;  %v2654_v0 = vrot.slane %v2604_v54, 6  ;;  %v2656_v1 = vrot.slane %v2605_v30, 5  ;;  %v5748_v30 = vld [vmem:[%s7863_s9 + $0x1c8] sm:$0xff]  ;;  %v5739_v13 = vld [vmem:[%s7863_s9 + $0x180] sm:$0xff] }
 0x352   :  { %3987 = vmatpush.bf16.msrb.mxu2 %v5742_v45  ;;  %v2629_v15 = vsel %vm582_vm1, %v2628_v34, %v2627_v8  ;;  %v2658_v25 = vrot.slane %v2606_v32, 4  ;;  %v2660_v3 = vrot.slane %v2607_v5, 3  ;;  %v2662_v23 = vrot.slane %v7629_v6, 2  ;;  %v5731_v5 = vld [vmem:[%s7863_s9 + $0x140] sm:$0xff] }
 0x353   :  { %4084 = vmatpush.bf16.msra.mxu0 %v5750_v10  ;;  %v2631_v11 = vsel %vm585_vm2, %v2630_v7, %v2629_v15  ;;  %v2655_v2 = vsel %vm582_vm1, %v2654_v0, %v2653_v21  ;;  %v2664_v4 = vrot.slane %v7632_v31, 1  ;;  %v3342_v62 = vsel %vm3341_vm15, %v6958_v22, %v3330_v9  ;;  %v5732_v22 = vld [vmem:[%s7863_s9 + $0x148] sm:$0xff]  ;;  %v5747_v17 = vld [vmem:[%s7863_s9 + $0x1c0] sm:$0xff] }
 0x354   :  { %3796 = vmatpush.bf16.msrb.mxu3 %v5725_v49  ;;  %v2633_v35 = vsel %vm588_vm3, %v2632_v16, %v2631_v11  ;;  %v2657_v52 = vsel %vm585_vm2, %v2656_v1, %v2655_v2  ;;  %v3438_v28 = vsel %vm3341_vm15, %v6961_v51, %v3431_v56  ;;  %v3533_v29 = vsel %vm3341_vm15, %v6950_v33, %v3526_v55  ;;  %v5740_v51 = vld [vmem:[%s7863_s9 + $0x188] sm:$0xff] }
 0x355   :  { %3891 = vmatpush.bf16.msra.mxu1 %v5733_v19  ;;  %v2635_v9 = vsel %vm591_vm4, %v2634_v58, %v2633_v35  ;;  %v2659_v59 = vsel %vm588_vm3, %v2658_v25, %v2657_v52  ;;  %v3628_v54 = vsel %vm3341_vm15, %v6969_v39, %v3621_v48  ;;  %v3818_v33 = vsel %vm3341_vm15, %v6978_v26, %v3813_v24  ;;  %v5723_v26 = vld [vmem:[%s7863_s9 + $0x100] sm:$0xff] }
 0x356   :  { %3988 = vmatpush.bf16.msrb.mxu2 %v5741_v50  ;;  %v2637_v56 = vsel %vm594_vm5, %v2636_v41, %v2635_v9  ;;  %v2661_v55 = vsel %vm591_vm4, %v2660_v3, %v2659_v59  ;;  %v3908_v39 = vrot.slane %v7584_v42, 2  ;;  %v4005_v48 = vrot.slane %v7584_v42, 3  ;;  %v5762_v9 = vld [vmem:[%s7865_s11 + $0x38] sm:$0xff] }
 0x357   :  { %4085 = vmatpush.bf16.msra.mxu0 %v5749_v63  ;;  %v2639_v27 = vsel %vm597_vm6, %v2638_v40, %v2637_v56  ;;  %v2663_v32 = vsel %vm594_vm5, %v2662_v23, %v2661_v55  ;;  %vm3343_vm0 = vcmask 1044480   ;;  %v5770_v59 = vld [vmem:[%s7865_s11 + $0x78] sm:$0xff]  ;;  %v5777_v56 = vld [vmem:[%s7865_s11 + $0xb0] sm:$0xff]  ;;  %v5760_v55 = vld [vmem:[%s7865_s11 + $0x28] sm:$0xff] }
 0x358   :  { %3797 = vmatpush.bf16.msrb.mxu3 %v5724_v61  ;;  %2642 = vst [vmem:[#allocation2 + $0x28] sm:$0xff] %v2639_v27  ;;  %v2665_v24 = vsel %vm597_vm6, %v2664_v4, %v2663_v32  ;;  %v3915_v42 = vsel %vm3341_vm15, %v6983_v36, %v3908_v39  ;;  %v4012_v6 = vsel %vm3341_vm15, %v6989_v47, %v4005_v48  ;;  %v5776_v39 = vld [vmem:[%s7865_s11 + $0xa8] sm:$0xff]  ;;  %v5759_v48 = vld [vmem:[%s7865_s11 + $0x20] sm:$0xff] }
 0x359   :  { %3892 = vmatpush.bf16.msra.mxu1 %v5732_v22  ;;  %v2667_v31 = vmul.f32 %v2665_v24, %v2643_v60  ;;  %v5767_v27 = vld [vmem:[%s7865_s11 + $0x60] sm:$0xff] }
 0x35a   :  { %3989 = vmatpush.bf16.msrb.mxu2 %v5740_v51  ;;  %v5761_v51 = vld [vmem:[%s7865_s11 + $0x30] sm:$0xff]  ;;  %v5775_v32 = vld [vmem:[%s7865_s11 + $0xa0] sm:$0xff] }
 0x35b   :  { %4086 = vmatpush.bf16.msra.mxu0 %v5748_v30  ;;  %v3333_v46 = vrot.slane %v2667_v31, 3  ;;  %v3433_v53 = vrot.slane %v2667_v31, 4  ;;  %v3528_v36 = vrot.slane %v2667_v31, 5  ;;  %v3623_v14 = vrot.slane %v2667_v31, 6  ;;  %v5768_v30 = vld [vmem:[%s7865_s11 + $0x68] sm:$0xff] }
 0x35c   :  { %3798 = vmatpush.bf16.msrb.mxu3 %v5723_v26  ;;  %v3718_v47 = vrot.slane %v2667_v31, 7  ;;  %v3819_v18 = vsel %vm3343_vm0, %v3818_v33, %v2667_v31  ;;  %v3910_v60 = vrot.slane %v2667_v31, 1  ;;  %v4007_v45 = vrot.slane %v2667_v31, 2  ;;  %v5769_v33 = vld [vmem:[%s7865_s11 + $0x70] sm:$0xff]  ;;  %v5758_v31 = vld [vmem:[%s7865_s11 + $0x18] sm:$0xff] }
 0x35d   :  { %3893 = vmatpush.bf16.msra.mxu1 %v5731_v5  ;;  %v3344_v12 = vsel %vm3343_vm0, %v3342_v62, %v3333_v46  ;;  %v3439_v57 = vsel %vm3343_vm0, %v3438_v28, %v3433_v53  ;;  %v3534_v20 = vsel %vm3343_vm0, %v3533_v29, %v3528_v36  ;;  %v3629_v44 = vsel %vm3343_vm0, %v3628_v54, %v3623_v14  ;;  %v5778_v54 = vld [vmem:[%s7865_s11 + $0xb8] sm:$0xff]  ;;  %v5757_v46 = vld [vmem:[%s7865_s11 + $0x10] sm:$0xff] }
 0x35e   :  { %3990 = vmatpush.bf16.msrb.mxu2 %v5739_v13  ;;  %v3345_v10 = vpack.c.bf16 %v3344_v12, %v3344_v12  ;;  %v3440_v38 = vpack.c.bf16 %v3439_v57, %v3439_v57  ;;  %v3535_v34 = vpack.c.bf16 %v3534_v20, %v3534_v20  ;;  %v3630_v7 = vpack.c.bf16 %v3629_v44, %v3629_v44  ;;  %v5766_v13 = vld [vmem:[%s7865_s11 + $0x58] sm:$0xff]  ;;  %v5765_v53 = vld [vmem:[%s7865_s11 + $0x50] sm:$0xff]  ;;  %v5756_v20 = vld [vmem:[%s7865_s11 + $0x8] sm:$0xff] }
 0x35f   :  { %4087 = vmatpush.bf16.msra.mxu0 %v5747_v17  ;;  %v3724_v37 = vsel %vm3343_vm0, %v7616_v43, %v3718_v47  ;;  %v3916_v49 = vsel %vm3343_vm0, %v3915_v42, %v3910_v60  ;;  %v4013_v16 = vsel %vm3343_vm0, %v4012_v6, %v4007_v45  ;;  %v3820_v41 = vpack.c.bf16 %v3819_v18, %v3819_v18  ;;  %v5795_v43 = vld [vmem:[%s7864_s10] ss:$0 sm:$0xff]  ;;  %v5774_v17 = vld [vmem:[%s7865_s11 + $0x98] sm:$0xff]  ;;  %v5773_v14 = vld [vmem:[%s7865_s11 + $0x90] sm:$0xff] }
 0x360   :  { %3418 = vmatmul.bf16.vlgmr.msra.gmra.mxu3 %v3345_v10  ;;  %3514 = vmatmul.bf16.vlgmr.msrb.gmra.mxu1 %v3440_v38  ;;  %v3725_v58 = vpack.c.bf16 %v3724_v37, %v3724_v37  ;;  %v3917_v40 = vpack.c.bf16 %v3916_v49, %v3916_v49  ;;  %v4014_v19 = vpack.c.bf16 %v4013_v16, %v4013_v16  ;;  %v5786_v45 = vld [vmem:[%s7867_s13 + $0x38] sm:$0xff]  ;;  %v5764_v44 = vld [vmem:[%s7865_s11 + $0x48] sm:$0xff]  ;;  %v5785_v38 = vld [vmem:[%s7867_s13 + $0x30] sm:$0xff] }
 0x361   :  { %3609 = vmatmul.bf16.vlgmr.msra.gmra.mxu2 %v3535_v34  ;;  %3704 = vmatmul.bf16.vlgmr.msrb.gmra.mxu0 %v3630_v7  ;;  %v5772_v10 = vld [vmem:[%s7865_s11 + $0x88] sm:$0xff]  ;;  %v5755_v7 = vld [vmem:[%s7865_s11] sm:$0xff] }
 0x362   :  { %4306 = vmatpush.bf16.msra.mxu3 %v5762_v9  ;;  %4319 = vmatpush.bf16.msrb.mxu1 %v5770_v59  ;;  %v5763_v37 = vld [vmem:[%s7865_s11 + $0x40] sm:$0xff] }
 0x363   :  { %4332 = vmatpush.bf16.msra.mxu2 %v5778_v54  ;;  %4415 = vmatpush.bf16.msrb.mxu0 %v5786_v45  ;;  %v5771_v16 = vld [vmem:[%s7865_s11 + $0x80] sm:$0xff] }
 0x366   :  { %4307 = vmatpush.bf16.msra.mxu3 %v5761_v51  ;;  %4320 = vmatpush.bf16.msrb.mxu1 %v5769_v33  ;;  %v5782_v51 = vld [vmem:[%s7867_s13 + $0x18] sm:$0xff]  ;;  %v5781_v33 = vld [vmem:[%s7867_s13 + $0x10] sm:$0xff] }
 0x367   :  { %4333 = vmatpush.bf16.msra.mxu2 %v5777_v56  ;;  %4416 = vmatpush.bf16.msrb.mxu0 %v5785_v38  ;;  %v5780_v56 = vld [vmem:[%s7867_s13 + $0x8] sm:$0xff] }
 0x36a   :  { %4308 = vmatpush.bf16.msra.mxu3 %v5760_v55  ;;  %4321 = vmatpush.bf16.msrb.mxu1 %v5768_v30  ;;  %v5779_v55 = vld [vmem:[%s7867_s13] sm:$0xff] }
 0x36b   :  { %4334 = vmatpush.bf16.msra.mxu2 %v5776_v39  ;;  %v5796_v39 = vld [vmem:[%s7866_s12] ss:$0 sm:$0xff]  ;;  %s5941_s12 = smov 128  }
 0x36e   :  { %4309 = vmatpush.bf16.msra.mxu3 %v5759_v48  ;;  %4322 = vmatpush.bf16.msrb.mxu1 %v5767_v27 }
 0x36f   :  { %4335 = vmatpush.bf16.msra.mxu2 %v5775_v32 }
 0x370   :  { %3799 = vmatmul.bf16.vlgmr.msrb.gmra.mxu3 %v3725_v58  ;;  %3894 = vmatmul.bf16.vlgmr.msra.gmra.mxu1 %v3820_v41  ;;  %v5784_v58 = vld [vmem:[%s7867_s13 + $0x28] sm:$0xff] }
 0x371   :  { %3991 = vmatmul.bf16.vlgmr.msrb.gmra.mxu2 %v3917_v40  ;;  %4088 = vmatmul.bf16.vlgmr.msra.gmra.mxu0 %v4014_v19 }
 0x372   :  { %4310 = vmatpush.bf16.msra.mxu3 %v5758_v31  ;;  %4323 = vmatpush.bf16.msrb.mxu1 %v5766_v13 }
 0x373   :  { %4336 = vmatpush.bf16.msra.mxu2 %v5774_v17  ;;  %4417 = vmatpush.bf16.msrb.mxu0 %v5784_v58  ;;  %v5797_v17 = vld [vmem:[%s7868_s14] ss:$0 sm:$0xff] }
 0x376   :  { %4311 = vmatpush.bf16.msra.mxu3 %v5757_v46  ;;  %4324 = vmatpush.bf16.msrb.mxu1 %v5765_v53 }
 0x377   :  { %4337 = vmatpush.bf16.msra.mxu2 %v5773_v14 }
 0x37a   :  { %4312 = vmatpush.bf16.msra.mxu3 %v5756_v20  ;;  %4325 = vmatpush.bf16.msrb.mxu1 %v5764_v44 }
 0x37b   :  { %4338 = vmatpush.bf16.msra.mxu2 %v5772_v10 }
 0x37e   :  { %4313 = vmatpush.bf16.msra.mxu3 %v5755_v7  ;;  %4326 = vmatpush.bf16.msrb.mxu1 %v5763_v37 }
 0x37f   :  { %4339 = vmatpush.bf16.msra.mxu2 %v5771_v16 }
 0x39b   :  { %v3238_v8 = vpop.f32.mrf.mxu1  ;;  %v3264_v21 = vpop.f32.mrf.mxu0 }
 0x3a0   :  { %v3225_v0 = vpop.f32.mrf.mxu3  ;;  %v3251_v1 = vpop.f32.mrf.mxu2 }
 0x3a1   :  { %v3226_v50 = vadd.f32 %v5795_v43, %v3225_v0 }
 0x3a3   :  { %v3239_v15 = vadd.f32 %v3238_v8, %v3226_v50  ;;  %v3240_v3 = vpop.f32.mrf.mxu1  ;;  %v3266_v23 = vpop.f32.mrf.mxu0  ;;  %v5783_v8 = vld [vmem:[%s7867_s13 + $0x20] sm:$0xff]  ;;  %s4437_s13 = sshll.u32 %s7870_s16, 4  ;;  %s4438_s13 = int_to_ptr.hbm [resolvable:$true] %s4437_s13 }
 0x3a4   :  { %4418 = vmatpush.bf16.msrb.mxu0 %v5783_v8  ;;  %4443 = dma.vmem_to_hbm [thread:$0]  %s4436_s17, 768, %s4438_s13, [#allocation3], %s5941_s12, %s5941_s12, %s5942_s18  }
 0x3a5   :  { %v3252_v25 = vadd.f32 %v3251_v1, %v3239_v15 }
 0x3a7   :  { %v3265_v63 = vadd.f32 %v3264_v21, %v3252_v25 }
 0x3a8   :  { %v3227_v11 = vpop.f32.mrf.mxu3  ;;  %v3253_v2 = vpop.f32.mrf.mxu2  ;;  %4419 = vmatpush.bf16.msrb.mxu0 %v5782_v51 }
 0x3ab   :  { %v3290_v4 = vpop.f32.mrf.mxu1  ;;  %v3316_v62 = vpop.f32.mrf.mxu0 }
 0x3ac   :  { %4420 = vmatpush.bf16.msrb.mxu0 %v5781_v33 }
 0x3b0   :  { %v3277_v61 = vpop.f32.mrf.mxu3  ;;  %v3303_v35 = vpop.f32.mrf.mxu2  ;;  %4421 = vmatpush.bf16.msrb.mxu0 %v5780_v56 }
 0x3b1   :  { %v3278_v26 = vadd.f32 %v3277_v61, %v3265_v63 }
 0x3b3   :  { %v3292_v52 = vpop.f32.mrf.mxu1  ;;  %v3318_v28 = vpop.f32.mrf.mxu0  ;;  %v3291_v24 = vadd.f32 %v3290_v4, %v3278_v26 }
 0x3b4   :  { %4422 = vmatpush.bf16.msrb.mxu0 %v5779_v55 }
 0x3b5   :  { %v3304_v6 = vadd.f32 %v3303_v35, %v3291_v24 }
 0x3b7   :  { %v3317_v47 = vadd.f32 %v3316_v62, %v3304_v6 }
 0x3b8   :  { %v3279_v29 = vpop.f32.mrf.mxu3  ;;  %v3305_v22 = vpop.f32.mrf.mxu2 }
 0x3dd   :  { %v3515_v5 = vpop.f32.mrf.mxu1 }
 0x3de   :  { %v3705_v42 = vpop.f32.mrf.mxu0 }
 0x3e3   :  { %v3419_v36 = vpop.f32.mrf.mxu3 }
 0x3e4   :  { %v3610_v18 = vpop.f32.mrf.mxu2  ;;  %v3423_v12 = vadd.f32 %v3419_v36, %v3317_v47 }
 0x3e5   :  { %v3517_v60 = vpop.f32.mrf.mxu1 }
 0x3e6   :  { %v3707_v57 = vpop.f32.mrf.mxu0  ;;  %v3519_v34 = vadd.f32 %v3515_v5, %v3423_v12 }
 0x3e8   :  { %v3614_v19 = vadd.f32 %v3610_v18, %v3519_v34 }
 0x3ea   :  { %v3709_v21 = vadd.f32 %v3705_v42, %v3614_v19 }
 0x3eb   :  { %v3421_v49 = vpop.f32.mrf.mxu3 }
 0x3ec   :  { %v3612_v41 = vpop.f32.mrf.mxu2 }
 0x3ed   :  { %v3895_v40 = vpop.f32.mrf.mxu1 }
 0x3ee   :  { %v4089_v43 = vpop.f32.mrf.mxu0 }
 0x3f3   :  { %v3800_v0 = vpop.f32.mrf.mxu3 }
 0x3f4   :  { %v3804_v1 = vadd.f32 %v3800_v0, %v3709_v21  ;;  %v3992_v50 = vpop.f32.mrf.mxu2 }
 0x3f5   :  { %v3897_v15 = vpop.f32.mrf.mxu1 }
 0x3f6   :  { %v3899_v25 = vadd.f32 %v3895_v40, %v3804_v1  ;;  %v4091_v3 = vpop.f32.mrf.mxu0 }
 0x3f8   :  { %v3996_v23 = vadd.f32 %v3992_v50, %v3899_v25 }
 0x3fa   :  { %v4093_v63 = vadd.f32 %v4089_v43, %v3996_v23 }
 0x3fb   :  { %v3802_v11 = vpop.f32.mrf.mxu3 }
 0x3fc   :  { %v4094_v2 = vmax.f32 %v4093_v63, 0.0  ;;  %v3994_v4 = vpop.f32.mrf.mxu2 }
 0x3fe   :  { %v4096_v62 = vrot.slane %v4094_v2, 1  ;;  %v4098_v61 = vrot.slane %v4094_v2, 2 }
 0x400   :  { %v4100_v35 = vrot.slane %v4096_v62, 2  ;;  %v4101_v52 = vrot.slane %v4098_v61, 2  ;;  %v4104_v28 = vsel %vm3335_vm10, %v4094_v2, %v4098_v61 }
 0x401   :  { %v4107_v29 = vpack.c.bf16 %v4104_v28, %v4104_v28 }
 0x402   :  { %v4105_v22 = vsel %vm3335_vm10, %v4096_v62, %v4100_v35  ;;  %v4106_v9 = vsel %vm3335_vm10, %v4098_v61, %v4101_v52 }
 0x403   :  { %4314 = vmatmul.bf16.vlgmr.msra.gmra.mxu3 %v4107_v29  ;;  %v4108_v59 = vpack.c.bf16 %v4105_v22, %v4105_v22  ;;  %v4109_v54 = vpack.c.bf16 %v4106_v9, %v4106_v9 }
 0x405   :  { %4327 = vmatmul.bf16.vlgmr.msrb.gmra.mxu1 %v4108_v59  ;;  %4340 = vmatmul.bf16.vlgmr.msra.gmra.mxu2 %v4109_v54 }
 0x482   :  { %v4328_v30 = vpop.f32.mrf.mxu1 }
 0x486   :  { %v4315_v48 = vpop.f32.mrf.mxu3 }
 0x487   :  { %v4316_v27 = vadd.f32 %v5796_v39, %v4315_v48 }
 0x488   :  { %v4341_v32 = vpop.f32.mrf.mxu2 }
 0x489   :  { %v4329_v26 = vadd.f32 %v4328_v30, %v4316_v27 }
 0x48a   :  { %v4330_v24 = vpop.f32.mrf.mxu1 }
 0x48b   :  { %v4342_v5 = vadd.f32 %v4341_v32, %v4329_v26 }
 0x48d   :  { %v4345_v42 = vmax.f32 %v4342_v5, 0.0 }
 0x48e   :  { %v4317_v6 = vpop.f32.mrf.mxu3 }
 0x48f   :  { %v4346_v31 = vpack.c.bf16 %v4345_v42, %v4345_v42 }
 0x490   :  { %v4343_v13 = vpop.f32.mrf.mxu2 }
 0x491   :  { %4423 = vmatmul.bf16.vlgmr.msrb.gmra.mxu0 %v4346_v31 }
 0x50e   :  { %v4424_v46 = vpop.f32.mrf.mxu0 }
 0x50f   :  { %v4425_v53 = vadd.f32 %v5797_v17, %v4424_v46 }
 0x511   :  { %4428 = vst [vmem:[%s7869_s15] sm:$0x3] %v4425_v53 }
 0x516   :  { %v4426_v36 = vpop.f32.mrf.mxu0 }
 0x517   :  { %5938 = dma.done.wait [#allocation3], 768  }
 0x518   :  { %5939 = vsyncadd [#allocation3], 4294966528 }
 0x519   :  { %4450 = vsyncpa [#allocation3], 1 }

</bundles_post_ra>
